<compile_context>
chip_gen: v5e
topology: v5e:2x2
jax: 0.10.0
libtpu: 0.0.40
codegen_flags: <defaults>
</compile_context>

<pallas_src>
import math

import jax
import jax.numpy as jnp
from jax.experimental import pallas as pl
from jax.experimental.pallas import tpu as pltpu


def _round_up(n, m):
    return ((n + m - 1) // m) * m


# ----------------------------------------------------------------------------
# Fused kernel (one batch tile per grid point)
# ----------------------------------------------------------------------------
def _make_fused_kernel(T, BT, H, D):
    """Builds the fused 2-layer-LSTM + FC kernel for static (T, BT, H, D)."""
    H4 = 4 * H
    f32 = jnp.float32
    bf16 = jnp.bfloat16

    def _sigmoid(x):
        # Single EUP pass: sigmoid(x) == 0.5 * tanh(0.5 * x) + 0.5  (no divide).
        return 0.5 * jnp.tanh(0.5 * x) + 0.5

    def kernel(x_ref, wih1_ref, whh1_ref, b1_ref,
               wih2_ref, whh2_ref, b2_ref,
               wfc_ref, bfc_ref, out_ref,
               gx_ref, hseq_ref):
        # x_ref:    (T, BT, D)   f32   time-major batch tile
        # wih1_ref: (D, 4H)      bf16  gate order i,f,g,o along columns
        # whh*_ref: (H, 4H)      bf16
        # b*_ref:   (1, 4H)      f32   (b_ih + b_hh)
        # wih2_ref: (H, 4H)      bf16
        # wfc_ref:  (H, 128)     f32   real head in column 0
        # bfc_ref:  (1, 128)     f32
        # out_ref:  (BT, 128)    f32   lane-dense padded FC output
        # gx_ref:   (T*BT, 4H)   f32 scratch  hoisted input-gate projections
        # hseq_ref: (T*BT, H)    bf16 scratch layer-1 hidden sequence

        def run_layer(whh_ref, store_seq):
            """Serial recurrence; returns the final hidden state (BT, H) f32."""
            h = jnp.zeros((BT, H), f32)
            c = jnp.zeros((BT, H), f32)
            # T is small & static here -> full unroll for LLO visibility.
            for t in range(T):
                gates = (gx_ref[t * BT:(t + 1) * BT, :]
                         + jnp.dot(h.astype(bf16), whh_ref[...],
                                   preferred_element_type=f32))      # (BT, 4H)
                i_g = _sigmoid(gates[:, 0 * H:1 * H])
                f_g = _sigmoid(gates[:, 1 * H:2 * H])
                g_g = jnp.tanh(gates[:, 2 * H:3 * H])
                o_g = _sigmoid(gates[:, 3 * H:4 * H])
                c = f_g * c + i_g * g_g
                h = o_g * jnp.tanh(c)
                if store_seq:
                    hseq_ref[t * BT:(t + 1) * BT, :] = h.astype(bf16)
            return h

        # ---- Layer 1: input projection hoisted out of the recurrence ----
        # Per-timestep (BT, D) @ (D, 4H) matmuls (K=D=6 is tiny); avoids any
        # lane-narrow (T*BT, D) reshape of x.  Bias broadcast hoisted once.
        b1 = jnp.broadcast_to(b1_ref[...], (BT, H4))
        for t in range(T):
            gx_ref[t * BT:(t + 1) * BT, :] = (
                jnp.dot(x_ref[t].astype(bf16), wih1_ref[...],
                        preferred_element_type=f32) + b1)
        run_layer(whh1_ref, store_seq=True)

        # ---- Layer 2: hoisted input projection, one matmul over all steps ----
        gx_ref[...] = (jnp.dot(hseq_ref[...], wih2_ref[...],
                               preferred_element_type=f32) + b2_ref[...])
        h_last = run_layer(whh2_ref, store_seq=False)   # only last h is needed

        # ---- FC head folded in; lane-dense padded (BT, 128) output ----
        out_ref[...] = (jnp.dot(h_last, wfc_ref[...],
                                preferred_element_type=f32) + bfc_ref[...])

    return kernel


# ----------------------------------------------------------------------------
# Parameter packing (PyTorch gate order i, f, g, o; unpadded 4*H layout)
# ----------------------------------------------------------------------------
def init_params(key, input_size=6, hidden_size=64, num_layers=2):
    """PyTorch-style U(-1/sqrt(H), 1/sqrt(H)) init.

    Returns (packed_params_for_kernel, raw_params_for_reference).
    """
    assert num_layers == 2, "fused kernel implements the module's 2-layer LSTM"
    H = hidden_size
    k = 1.0 / math.sqrt(H)

    packed_layers, raw_layers = [], []
    for layer in range(num_layers):
        in_dim = input_size if layer == 0 else H
        key, k1, k2, k3, k4 = jax.random.split(key, 5)
        w_ih = jax.random.uniform(k1, (4 * H, in_dim), jnp.float32, -k, k)
        w_hh = jax.random.uniform(k2, (4 * H, H), jnp.float32, -k, k)
        b_ih = jax.random.uniform(k3, (4 * H,), jnp.float32, -k, k)
        b_hh = jax.random.uniform(k4, (4 * H,), jnp.float32, -k, k)
        raw_layers.append((w_ih, w_hh, b_ih, b_hh))
        packed_layers.append({
            # bf16 weights for the MXU; unpadded (in_dim, 4H) gate layout.
            "wih": jnp.transpose(w_ih).astype(jnp.bfloat16),   # (in_dim, 4H)
            "whh": jnp.transpose(w_hh).astype(jnp.bfloat16),   # (H, 4H)
            "b": (b_ih + b_hh).reshape(1, 4 * H),              # f32
        })

    key, k5, k6 = jax.random.split(key, 3)
    w_fc = jax.random.uniform(k5, (1, H), jnp.float32, -k, k)
    b_fc = jax.random.uniform(k6, (1,), jnp.float32, -k, k)
    FCP = 128  # lane-dense padded FC output width
    wfc_pad = jnp.zeros((H, FCP), jnp.float32).at[:, 0].set(w_fc[0])
    bfc_pad = jnp.zeros((1, FCP), jnp.float32).at[0, 0].set(b_fc[0])

    params = {"layers": packed_layers, "fc_w": wfc_pad, "fc_b": bfc_pad}
    raw = {"layers": raw_layers, "w_fc": w_fc, "b_fc": b_fc}
    return params, raw


# ----------------------------------------------------------------------------
# Forward
# ----------------------------------------------------------------------------
def lstm_forward(params, x, *, max_batch_tile=256):
    """x: (B, T, input_size) float32 -> (B,) float32 (matches torch .squeeze())."""
    B, T, D = x.shape
    l0, l1 = params["layers"]
    H = l0["whh"].shape[0]
    H4 = 4 * H
    FCP = params["fc_w"].shape[1]

    # Batch tile: multiple of 16 (bf16 sublane packing -> tile-aligned scratch
    # stores), capped so per-step VMEM stays bounded; grid is parallel over tiles.
    BT = min(_round_up(B, 16), max_batch_tile)
    Bpad = _round_up(B, BT)
    n_tiles = Bpad // BT

    # batch_first -> time-major, pad batch: (T, Bpad, D).  Single wrapper pass.
    x_tm = jnp.transpose(x.astype(jnp.float32), (1, 0, 2))
    x_tm = jnp.pad(x_tm, ((0, 0), (0, Bpad - B), (0, 0)))

    in_specs = [
        pl.BlockSpec((T, BT, D), lambda b: (0, b, 0)),   # x batch tile
        pl.BlockSpec((D, H4), lambda b: (0, 0)),         # wih1
        pl.BlockSpec((H, H4), lambda b: (0, 0)),         # whh1
        pl.BlockSpec((1, H4), lambda b: (0, 0)),         # b1
        pl.BlockSpec((H, H4), lambda b: (0, 0)),         # wih2
        pl.BlockSpec((H, H4), lambda b: (0, 0)),         # whh2
        pl.BlockSpec((1, H4), lambda b: (0, 0)),         # b2
        pl.BlockSpec((H, FCP), lambda b: (0, 0)),        # wfc
        pl.BlockSpec((1, FCP), lambda b: (0, 0)),        # bfc
    ]
    out_specs = pl.BlockSpec((BT, FCP), lambda b: (b, 0))

    # Approximate per-grid-step VMEM footprint (inputs/outputs double-buffered
    # by the pipeline + resident scratch).  Only raise the scoped limit when
    # needed, and never above 48 MiB so the plan also fits v7x (64 MiB / TC).
    tile_io_bytes = 2 * (T * BT * D * 4 + BT * FCP * 4)
    weight_bytes = 2 * ((D + 3 * H) * H4 * 2 + 2 * H4 * 4 + H * FCP * 4 + FCP * 4)
    scratch_bytes = T * BT * H4 * 4 + T * BT * H * 2
    need = tile_io_bytes + weight_bytes + scratch_bytes
    vmem_limit = None if need < 12 * 2**20 else min(int(1.5 * need), 48 * 2**20)

    out = pl.pallas_call(
        _make_fused_kernel(T, BT, H, D),
        grid=(n_tiles,),
        out_shape=jax.ShapeDtypeStruct((Bpad, FCP), jnp.float32),
        in_specs=in_specs,
        out_specs=out_specs,
        scratch_shapes=[
            pltpu.VMEM((T * BT, H4), jnp.float32),    # hoisted gate projections
            pltpu.VMEM((T * BT, H), jnp.bfloat16),    # layer-1 hidden sequence
        ],
        compiler_params=pltpu.CompilerParams(
            dimension_semantics=("parallel",),
            vmem_limit_bytes=vmem_limit,
        ),
    )(x_tm, l0["wih"], l0["whh"], l0["b"],
      l1["wih"], l1["whh"], l1["b"],
      params["fc_w"], params["fc_b"])

    # Real batch rows, real FC column; matches torch's .squeeze() on (B, 1).
    return jnp.squeeze(out[:B, :1])


# ----------------------------------------------------------------------------
# Pure-JAX f32 reference (for correctness check)
# ----------------------------------------------------------------------------
def lstm_reference(raw, x):
    B, T, _ = x.shape
    h_seq = x
    for (w_ih, w_hh, b_ih, b_hh) in raw["layers"]:
        H = w_hh.shape[1]
        h = jnp.zeros((B, H), jnp.float32)
        c = jnp.zeros((B, H), jnp.float32)
        outs = []
        for t in range(T):
            g = h_seq[:, t, :] @ w_ih.T + h @ w_hh.T + b_ih + b_hh
            i_g = jax.nn.sigmoid(g[:, 0 * H:1 * H])
            f_g = jax.nn.sigmoid(g[:, 1 * H:2 * H])
            g_g = jnp.tanh(g[:, 2 * H:3 * H])
            o_g = jax.nn.sigmoid(g[:, 3 * H:4 * H])
            c = f_g * c + i_g * g_g
            h = o_g * jnp.tanh(c)
            outs.append(h)
        h_seq = jnp.stack(outs, axis=1)
    return jnp.squeeze(h_seq[:, -1, :] @ raw["w_fc"].T + raw["b_fc"])


if __name__ == "__main__":
    key = jax.random.PRNGKey(0)
    key, pkey, xkey = jax.random.split(key, 3)

    B, T, INPUT_SIZE, HIDDEN, LAYERS = 2, 8, 6, 64, 2
    params, raw = init_params(pkey, INPUT_SIZE, HIDDEN, LAYERS)
    x = jax.random.normal(xkey, (B, T, INPUT_SIZE), jnp.float32)

    out = jax.jit(lstm_forward)(params, x)
    jax.block_until_ready(out)

    assert out.shape == (B,), out.shape
    assert bool(jnp.all(jnp.isfinite(out)))

    # bf16 weights / bf16 layer-1 sequence inside the kernel -> loose tolerance
    # vs. the f32 reference (deliberate accuracy/speed tradeoff).
    ref = lstm_reference(raw, x)
    assert jnp.allclose(out, ref, atol=5e-2, rtol=5e-2), (out, ref)

    print("KERNEL_OK")
</pallas_src>

<mosaic_0001>
module attributes {stable_mosaic.version = 11 : i64} {
  func.func @kernel(%arg0: i32, %arg1: memref<8x16x6xf32, #tpu.memory_space<vmem>>, %arg2: memref<6x256xbf16, #tpu.memory_space<vmem>>, %arg3: memref<64x256xbf16, #tpu.memory_space<vmem>>, %arg4: memref<1x256xf32, #tpu.memory_space<vmem>>, %arg5: memref<64x256xbf16, #tpu.memory_space<vmem>>, %arg6: memref<64x256xbf16, #tpu.memory_space<vmem>>, %arg7: memref<1x256xf32, #tpu.memory_space<vmem>>, %arg8: memref<64x128xf32, #tpu.memory_space<vmem>>, %arg9: memref<1x128xf32, #tpu.memory_space<vmem>>, %arg10: memref<16x128xf32, #tpu.memory_space<vmem>>, %arg11: memref<128x256xf32, #tpu.memory_space<vmem>>, %arg12: memref<128x64xbf16, #tpu.memory_space<vmem>>) attributes {dimension_semantics = [#tpu.dimension_semantics<parallel>], iteration_bounds = array<i64: 1>, scalar_prefetch = 0 : i64, scratch_operands = 2 : i64, tpu.core_type = #tpu.core_type<tc>, window_params = [{transform_indices = @transform_0, window_bounds = array<i64: 8, 16, 6>}, {pipeline_mode = #tpu.pipeline_mode<synchronous>, transform_indices = @transform_1, window_bounds = array<i64: 6, 256>}, {pipeline_mode = #tpu.pipeline_mode<synchronous>, transform_indices = @transform_2, window_bounds = array<i64: 64, 256>}, {pipeline_mode = #tpu.pipeline_mode<synchronous>, transform_indices = @transform_3, window_bounds = array<i64: 1, 256>}, {pipeline_mode = #tpu.pipeline_mode<synchronous>, transform_indices = @transform_4, window_bounds = array<i64: 64, 256>}, {pipeline_mode = #tpu.pipeline_mode<synchronous>, transform_indices = @transform_5, window_bounds = array<i64: 64, 256>}, {pipeline_mode = #tpu.pipeline_mode<synchronous>, transform_indices = @transform_6, window_bounds = array<i64: 1, 256>}, {pipeline_mode = #tpu.pipeline_mode<synchronous>, transform_indices = @transform_7, window_bounds = array<i64: 64, 128>}, {pipeline_mode = #tpu.pipeline_mode<synchronous>, transform_indices = @transform_8, window_bounds = array<i64: 1, 128>}, {transform_indices = @transform_9, window_bounds = array<i64: 16, 128>}]} {
    %c0 = arith.constant 0 : index
    %c0_0 = arith.constant 0 : index
    %0 = vector.load %arg4[%c0, %c0_0] : memref<1x256xf32, #tpu.memory_space<vmem>>, vector<1x256xf32>
    %1 = vector.shape_cast %0 : vector<1x256xf32> to vector<1x256xf32>
    %2 = vector.broadcast %1 : vector<1x256xf32> to vector<16x256xf32>
    %c0_1 = arith.constant 0 : index
    %c0_2 = arith.constant 0 : index
    %c0_3 = arith.constant 0 : index
    %3 = vector.load %arg1[%c0_1, %c0_2, %c0_3] : memref<8x16x6xf32, #tpu.memory_space<vmem>>, vector<1x16x6xf32>
    %4 = vector.shape_cast %3 : vector<1x16x6xf32> to vector<16x6xf32>
    %5 = arith.truncf %4 : vector<16x6xf32> to vector<16x6xbf16>
    %c0_4 = arith.constant 0 : index
    %c0_5 = arith.constant 0 : index
    %6 = vector.load %arg2[%c0_4, %c0_5] : memref<6x256xbf16, #tpu.memory_space<vmem>>, vector<6x256xbf16>
    %cst = arith.constant dense<0.000000e+00> : vector<16x256xf32>
    %7 = tpu.matmul %5, %6, %cst {dimension_numbers = #tpu.dot_dimension_numbers<[1], [0], [0], [1], [0, 0, 1, 1], [], []>} : vector<16x6xbf16>, vector<6x256xbf16>, vector<16x256xf32> -> vector<16x256xf32>
    %8 = arith.addf %7, %2 : vector<16x256xf32>
    %c0_6 = arith.constant 0 : index
    %c0_7 = arith.constant 0 : index
    %9 = vector.load %arg11[%c0_6, %c0_7] : memref<128x256xf32, #tpu.memory_space<vmem>>, vector<16x256xf32>
    tpu.vector_store %arg11[%c0_6, %c0_7], %8 {strides = array<i32>} : memref<128x256xf32, #tpu.memory_space<vmem>>, vector<16x256xf32>,
    %c1 = arith.constant 1 : index
    %c0_8 = arith.constant 0 : index
    %c0_9 = arith.constant 0 : index
    %10 = vector.load %arg1[%c1, %c0_8, %c0_9] : memref<8x16x6xf32, #tpu.memory_space<vmem>>, vector<1x16x6xf32>
    %11 = vector.shape_cast %10 : vector<1x16x6xf32> to vector<16x6xf32>
    %12 = arith.truncf %11 : vector<16x6xf32> to vector<16x6xbf16>
    %c0_10 = arith.constant 0 : index
    %c0_11 = arith.constant 0 : index
    %13 = vector.load %arg2[%c0_10, %c0_11] : memref<6x256xbf16, #tpu.memory_space<vmem>>, vector<6x256xbf16>
    %cst_12 = arith.constant dense<0.000000e+00> : vector<16x256xf32>
    %14 = tpu.matmul %12, %13, %cst_12 {dimension_numbers = #tpu.dot_dimension_numbers<[1], [0], [0], [1], [0, 0, 1, 1], [], []>} : vector<16x6xbf16>, vector<6x256xbf16>, vector<16x256xf32> -> vector<16x256xf32>
    %15 = arith.addf %14, %2 : vector<16x256xf32>
    %c16 = arith.constant 16 : index
    %c0_13 = arith.constant 0 : index
    %16 = vector.load %arg11[%c16, %c0_13] : memref<128x256xf32, #tpu.memory_space<vmem>>, vector<16x256xf32>
    tpu.vector_store %arg11[%c16, %c0_13], %15 {strides = array<i32>} : memref<128x256xf32, #tpu.memory_space<vmem>>, vector<16x256xf32>,
    %c2 = arith.constant 2 : index
    %c0_14 = arith.constant 0 : index
    %c0_15 = arith.constant 0 : index
    %17 = vector.load %arg1[%c2, %c0_14, %c0_15] : memref<8x16x6xf32, #tpu.memory_space<vmem>>, vector<1x16x6xf32>
    %18 = vector.shape_cast %17 : vector<1x16x6xf32> to vector<16x6xf32>
    %19 = arith.truncf %18 : vector<16x6xf32> to vector<16x6xbf16>
    %c0_16 = arith.constant 0 : index
    %c0_17 = arith.constant 0 : index
    %20 = vector.load %arg2[%c0_16, %c0_17] : memref<6x256xbf16, #tpu.memory_space<vmem>>, vector<6x256xbf16>
    %cst_18 = arith.constant dense<0.000000e+00> : vector<16x256xf32>
    %21 = tpu.matmul %19, %20, %cst_18 {dimension_numbers = #tpu.dot_dimension_numbers<[1], [0], [0], [1], [0, 0, 1, 1], [], []>} : vector<16x6xbf16>, vector<6x256xbf16>, vector<16x256xf32> -> vector<16x256xf32>
    %22 = arith.addf %21, %2 : vector<16x256xf32>
    %c32 = arith.constant 32 : index
    %c0_19 = arith.constant 0 : index
    %23 = vector.load %arg11[%c32, %c0_19] : memref<128x256xf32, #tpu.memory_space<vmem>>, vector<16x256xf32>
    tpu.vector_store %arg11[%c32, %c0_19], %22 {strides = array<i32>} : memref<128x256xf32, #tpu.memory_space<vmem>>, vector<16x256xf32>,
    %c3 = arith.constant 3 : index
    %c0_20 = arith.constant 0 : index
    %c0_21 = arith.constant 0 : index
    %24 = vector.load %arg1[%c3, %c0_20, %c0_21] : memref<8x16x6xf32, #tpu.memory_space<vmem>>, vector<1x16x6xf32>
    %25 = vector.shape_cast %24 : vector<1x16x6xf32> to vector<16x6xf32>
    %26 = arith.truncf %25 : vector<16x6xf32> to vector<16x6xbf16>
    %c0_22 = arith.constant 0 : index
    %c0_23 = arith.constant 0 : index
    %27 = vector.load %arg2[%c0_22, %c0_23] : memref<6x256xbf16, #tpu.memory_space<vmem>>, vector<6x256xbf16>
    %cst_24 = arith.constant dense<0.000000e+00> : vector<16x256xf32>
    %28 = tpu.matmul %26, %27, %cst_24 {dimension_numbers = #tpu.dot_dimension_numbers<[1], [0], [0], [1], [0, 0, 1, 1], [], []>} : vector<16x6xbf16>, vector<6x256xbf16>, vector<16x256xf32> -> vector<16x256xf32>
    %29 = arith.addf %28, %2 : vector<16x256xf32>
    %c48 = arith.constant 48 : index
    %c0_25 = arith.constant 0 : index
    %30 = vector.load %arg11[%c48, %c0_25] : memref<128x256xf32, #tpu.memory_space<vmem>>, vector<16x256xf32>
    tpu.vector_store %arg11[%c48, %c0_25], %29 {strides = array<i32>} : memref<128x256xf32, #tpu.memory_space<vmem>>, vector<16x256xf32>,
    %c4 = arith.constant 4 : index
    %c0_26 = arith.constant 0 : index
    %c0_27 = arith.constant 0 : index
    %31 = vector.load %arg1[%c4, %c0_26, %c0_27] : memref<8x16x6xf32, #tpu.memory_space<vmem>>, vector<1x16x6xf32>
    %32 = vector.shape_cast %31 : vector<1x16x6xf32> to vector<16x6xf32>
    %33 = arith.truncf %32 : vector<16x6xf32> to vector<16x6xbf16>
    %c0_28 = arith.constant 0 : index
    %c0_29 = arith.constant 0 : index
    %34 = vector.load %arg2[%c0_28, %c0_29] : memref<6x256xbf16, #tpu.memory_space<vmem>>, vector<6x256xbf16>
    %cst_30 = arith.constant dense<0.000000e+00> : vector<16x256xf32>
    %35 = tpu.matmul %33, %34, %cst_30 {dimension_numbers = #tpu.dot_dimension_numbers<[1], [0], [0], [1], [0, 0, 1, 1], [], []>} : vector<16x6xbf16>, vector<6x256xbf16>, vector<16x256xf32> -> vector<16x256xf32>
    %36 = arith.addf %35, %2 : vector<16x256xf32>
    %c64 = arith.constant 64 : index
    %c0_31 = arith.constant 0 : index
    %37 = vector.load %arg11[%c64, %c0_31] : memref<128x256xf32, #tpu.memory_space<vmem>>, vector<16x256xf32>
    tpu.vector_store %arg11[%c64, %c0_31], %36 {strides = array<i32>} : memref<128x256xf32, #tpu.memory_space<vmem>>, vector<16x256xf32>,
    %c5 = arith.constant 5 : index
    %c0_32 = arith.constant 0 : index
    %c0_33 = arith.constant 0 : index
    %38 = vector.load %arg1[%c5, %c0_32, %c0_33] : memref<8x16x6xf32, #tpu.memory_space<vmem>>, vector<1x16x6xf32>
    %39 = vector.shape_cast %38 : vector<1x16x6xf32> to vector<16x6xf32>
    %40 = arith.truncf %39 : vector<16x6xf32> to vector<16x6xbf16>
    %c0_34 = arith.constant 0 : index
    %c0_35 = arith.constant 0 : index
    %41 = vector.load %arg2[%c0_34, %c0_35] : memref<6x256xbf16, #tpu.memory_space<vmem>>, vector<6x256xbf16>
    %cst_36 = arith.constant dense<0.000000e+00> : vector<16x256xf32>
    %42 = tpu.matmul %40, %41, %cst_36 {dimension_numbers = #tpu.dot_dimension_numbers<[1], [0], [0], [1], [0, 0, 1, 1], [], []>} : vector<16x6xbf16>, vector<6x256xbf16>, vector<16x256xf32> -> vector<16x256xf32>
    %43 = arith.addf %42, %2 : vector<16x256xf32>
    %c80 = arith.constant 80 : index
    %c0_37 = arith.constant 0 : index
    %44 = vector.load %arg11[%c80, %c0_37] : memref<128x256xf32, #tpu.memory_space<vmem>>, vector<16x256xf32>
    tpu.vector_store %arg11[%c80, %c0_37], %43 {strides = array<i32>} : memref<128x256xf32, #tpu.memory_space<vmem>>, vector<16x256xf32>,
    %c6 = arith.constant 6 : index
    %c0_38 = arith.constant 0 : index
    %c0_39 = arith.constant 0 : index
    %45 = vector.load %arg1[%c6, %c0_38, %c0_39] : memref<8x16x6xf32, #tpu.memory_space<vmem>>, vector<1x16x6xf32>
    %46 = vector.shape_cast %45 : vector<1x16x6xf32> to vector<16x6xf32>
    %47 = arith.truncf %46 : vector<16x6xf32> to vector<16x6xbf16>
    %c0_40 = arith.constant 0 : index
    %c0_41 = arith.constant 0 : index
    %48 = vector.load %arg2[%c0_40, %c0_41] : memref<6x256xbf16, #tpu.memory_space<vmem>>, vector<6x256xbf16>
    %cst_42 = arith.constant dense<0.000000e+00> : vector<16x256xf32>
    %49 = tpu.matmul %47, %48, %cst_42 {dimension_numbers = #tpu.dot_dimension_numbers<[1], [0], [0], [1], [0, 0, 1, 1], [], []>} : vector<16x6xbf16>, vector<6x256xbf16>, vector<16x256xf32> -> vector<16x256xf32>
    %50 = arith.addf %49, %2 : vector<16x256xf32>
    %c96 = arith.constant 96 : index
    %c0_43 = arith.constant 0 : index
    %51 = vector.load %arg11[%c96, %c0_43] : memref<128x256xf32, #tpu.memory_space<vmem>>, vector<16x256xf32>
    tpu.vector_store %arg11[%c96, %c0_43], %50 {strides = array<i32>} : memref<128x256xf32, #tpu.memory_space<vmem>>, vector<16x256xf32>,
    %c7 = arith.constant 7 : index
    %c0_44 = arith.constant 0 : index
    %c0_45 = arith.constant 0 : index
    %52 = vector.load %arg1[%c7, %c0_44, %c0_45] : memref<8x16x6xf32, #tpu.memory_space<vmem>>, vector<1x16x6xf32>
    %53 = vector.shape_cast %52 : vector<1x16x6xf32> to vector<16x6xf32>
    %54 = arith.truncf %53 : vector<16x6xf32> to vector<16x6xbf16>
    %c0_46 = arith.constant 0 : index
    %c0_47 = arith.constant 0 : index
    %55 = vector.load %arg2[%c0_46, %c0_47] : memref<6x256xbf16, #tpu.memory_space<vmem>>, vector<6x256xbf16>
    %cst_48 = arith.constant dense<0.000000e+00> : vector<16x256xf32>
    %56 = tpu.matmul %54, %55, %cst_48 {dimension_numbers = #tpu.dot_dimension_numbers<[1], [0], [0], [1], [0, 0, 1, 1], [], []>} : vector<16x6xbf16>, vector<6x256xbf16>, vector<16x256xf32> -> vector<16x256xf32>
    %57 = arith.addf %56, %2 : vector<16x256xf32>
    %c112 = arith.constant 112 : index
    %c0_49 = arith.constant 0 : index
    %58 = vector.load %arg11[%c112, %c0_49] : memref<128x256xf32, #tpu.memory_space<vmem>>, vector<16x256xf32>
    tpu.vector_store %arg11[%c112, %c0_49], %57 {strides = array<i32>} : memref<128x256xf32, #tpu.memory_space<vmem>>, vector<16x256xf32>,
    %cst_50 = arith.constant 0.000000e+00 : f32
    %59 = vector.broadcast %cst_50 : f32 to vector<16x64xf32>
    %cst_51 = arith.constant 0.000000e+00 : f32
    %60 = vector.broadcast %cst_51 : f32 to vector<16x64xf32>
    %c0_52 = arith.constant 0 : index
    %c0_53 = arith.constant 0 : index
    %61 = vector.load %arg11[%c0_52, %c0_53] : memref<128x256xf32, #tpu.memory_space<vmem>>, vector<16x256xf32>
    %62 = arith.truncf %59 : vector<16x64xf32> to vector<16x64xbf16>
    %c0_54 = arith.constant 0 : index
    %c0_55 = arith.constant 0 : index
    %63 = vector.load %arg3[%c0_54, %c0_55] : memref<64x256xbf16, #tpu.memory_space<vmem>>, vector<64x256xbf16>
    %cst_56 = arith.constant dense<0.000000e+00> : vector<16x256xf32>
    %64 = tpu.matmul %62, %63, %cst_56 {dimension_numbers = #tpu.dot_dimension_numbers<[1], [0], [0], [1], [0, 0, 1, 1], [], []>} : vector<16x64xbf16>, vector<64x256xbf16>, vector<16x256xf32> -> vector<16x256xf32>
    %65 = arith.addf %61, %64 : vector<16x256xf32>
    %66 = vector.extract_strided_slice %65 {offsets = [0, 0], sizes = [16, 64], strides = [1, 1]} : vector<16x256xf32> to vector<16x64xf32>
    %cst_57 = arith.constant 5.000000e-01 : f32
    %67 = vector.broadcast %cst_57 : f32 to vector<16x64xf32>
    %68 = arith.mulf %67, %66 : vector<16x64xf32>
    %69 = math.tanh %68 : vector<16x64xf32>
    %cst_58 = arith.constant 5.000000e-01 : f32
    %70 = vector.broadcast %cst_58 : f32 to vector<16x64xf32>
    %71 = arith.mulf %70, %69 : vector<16x64xf32>
    %cst_59 = arith.constant 5.000000e-01 : f32
    %72 = vector.broadcast %cst_59 : f32 to vector<16x64xf32>
    %73 = arith.addf %71, %72 : vector<16x64xf32>
    %74 = vector.extract_strided_slice %65 {offsets = [0, 64], sizes = [16, 64], strides = [1, 1]} : vector<16x256xf32> to vector<16x64xf32>
    %cst_60 = arith.constant 5.000000e-01 : f32
    %75 = vector.broadcast %cst_60 : f32 to vector<16x64xf32>
    %76 = arith.mulf %75, %74 : vector<16x64xf32>
    %77 = math.tanh %76 : vector<16x64xf32>
    %cst_61 = arith.constant 5.000000e-01 : f32
    %78 = vector.broadcast %cst_61 : f32 to vector<16x64xf32>
    %79 = arith.mulf %78, %77 : vector<16x64xf32>
    %cst_62 = arith.constant 5.000000e-01 : f32
    %80 = vector.broadcast %cst_62 : f32 to vector<16x64xf32>
    %81 = arith.addf %79, %80 : vector<16x64xf32>
    %82 = vector.extract_strided_slice %65 {offsets = [0, 128], sizes = [16, 64], strides = [1, 1]} : vector<16x256xf32> to vector<16x64xf32>
    %83 = math.tanh %82 : vector<16x64xf32>
    %84 = vector.extract_strided_slice %65 {offsets = [0, 192], sizes = [16, 64], strides = [1, 1]} : vector<16x256xf32> to vector<16x64xf32>
    %cst_63 = arith.constant 5.000000e-01 : f32
    %85 = vector.broadcast %cst_63 : f32 to vector<16x64xf32>
    %86 = arith.mulf %85, %84 : vector<16x64xf32>
    %87 = math.tanh %86 : vector<16x64xf32>
    %cst_64 = arith.constant 5.000000e-01 : f32
    %88 = vector.broadcast %cst_64 : f32 to vector<16x64xf32>
    %89 = arith.mulf %88, %87 : vector<16x64xf32>
    %cst_65 = arith.constant 5.000000e-01 : f32
    %90 = vector.broadcast %cst_65 : f32 to vector<16x64xf32>
    %91 = arith.addf %89, %90 : vector<16x64xf32>
    %92 = arith.mulf %81, %60 : vector<16x64xf32>
    %93 = arith.mulf %73, %83 : vector<16x64xf32>
    %94 = arith.addf %92, %93 : vector<16x64xf32>
    %95 = math.tanh %94 : vector<16x64xf32>
    %96 = arith.mulf %91, %95 : vector<16x64xf32>
    %97 = arith.truncf %96 : vector<16x64xf32> to vector<16x64xbf16>
    %c0_66 = arith.constant 0 : index
    %c0_67 = arith.constant 0 : index
    %98 = vector.load %arg12[%c0_66, %c0_67] : memref<128x64xbf16, #tpu.memory_space<vmem>>, vector<16x64xbf16>
    tpu.vector_store %arg12[%c0_66, %c0_67], %97 {strides = array<i32>} : memref<128x64xbf16, #tpu.memory_space<vmem>>, vector<16x64xbf16>,
    %c16_68 = arith.constant 16 : index
    %c0_69 = arith.constant 0 : index
    %99 = vector.load %arg11[%c16_68, %c0_69] : memref<128x256xf32, #tpu.memory_space<vmem>>, vector<16x256xf32>
    %100 = arith.truncf %96 : vector<16x64xf32> to vector<16x64xbf16>
    %c0_70 = arith.constant 0 : index
    %c0_71 = arith.constant 0 : index
    %101 = vector.load %arg3[%c0_70, %c0_71] : memref<64x256xbf16, #tpu.memory_space<vmem>>, vector<64x256xbf16>
    %cst_72 = arith.constant dense<0.000000e+00> : vector<16x256xf32>
    %102 = tpu.matmul %100, %101, %cst_72 {dimension_numbers = #tpu.dot_dimension_numbers<[1], [0], [0], [1], [0, 0, 1, 1], [], []>} : vector<16x64xbf16>, vector<64x256xbf16>, vector<16x256xf32> -> vector<16x256xf32>
    %103 = arith.addf %99, %102 : vector<16x256xf32>
    %104 = vector.extract_strided_slice %103 {offsets = [0, 0], sizes = [16, 64], strides = [1, 1]} : vector<16x256xf32> to vector<16x64xf32>
    %cst_73 = arith.constant 5.000000e-01 : f32
    %105 = vector.broadcast %cst_73 : f32 to vector<16x64xf32>
    %106 = arith.mulf %105, %104 : vector<16x64xf32>
    %107 = math.tanh %106 : vector<16x64xf32>
    %cst_74 = arith.constant 5.000000e-01 : f32
    %108 = vector.broadcast %cst_74 : f32 to vector<16x64xf32>
    %109 = arith.mulf %108, %107 : vector<16x64xf32>
    %cst_75 = arith.constant 5.000000e-01 : f32
    %110 = vector.broadcast %cst_75 : f32 to vector<16x64xf32>
    %111 = arith.addf %109, %110 : vector<16x64xf32>
    %112 = vector.extract_strided_slice %103 {offsets = [0, 64], sizes = [16, 64], strides = [1, 1]} : vector<16x256xf32> to vector<16x64xf32>
    %cst_76 = arith.constant 5.000000e-01 : f32
    %113 = vector.broadcast %cst_76 : f32 to vector<16x64xf32>
    %114 = arith.mulf %113, %112 : vector<16x64xf32>
    %115 = math.tanh %114 : vector<16x64xf32>
    %cst_77 = arith.constant 5.000000e-01 : f32
    %116 = vector.broadcast %cst_77 : f32 to vector<16x64xf32>
    %117 = arith.mulf %116, %115 : vector<16x64xf32>
    %cst_78 = arith.constant 5.000000e-01 : f32
    %118 = vector.broadcast %cst_78 : f32 to vector<16x64xf32>
    %119 = arith.addf %117, %118 : vector<16x64xf32>
    %120 = vector.extract_strided_slice %103 {offsets = [0, 128], sizes = [16, 64], strides = [1, 1]} : vector<16x256xf32> to vector<16x64xf32>
    %121 = math.tanh %120 : vector<16x64xf32>
    %122 = vector.extract_strided_slice %103 {offsets = [0, 192], sizes = [16, 64], strides = [1, 1]} : vector<16x256xf32> to vector<16x64xf32>
    %cst_79 = arith.constant 5.000000e-01 : f32
    %123 = vector.broadcast %cst_79 : f32 to vector<16x64xf32>
    %124 = arith.mulf %123, %122 : vector<16x64xf32>
    %125 = math.tanh %124 : vector<16x64xf32>
    %cst_80 = arith.constant 5.000000e-01 : f32
    %126 = vector.broadcast %cst_80 : f32 to vector<16x64xf32>
    %127 = arith.mulf %126, %125 : vector<16x64xf32>
    %cst_81 = arith.constant 5.000000e-01 : f32
    %128 = vector.broadcast %cst_81 : f32 to vector<16x64xf32>
    %129 = arith.addf %127, %128 : vector<16x64xf32>
    %130 = arith.mulf %119, %94 : vector<16x64xf32>
    %131 = arith.mulf %111, %121 : vector<16x64xf32>
    %132 = arith.addf %130, %131 : vector<16x64xf32>
    %133 = math.tanh %132 : vector<16x64xf32>
    %134 = arith.mulf %129, %133 : vector<16x64xf32>
    %135 = arith.truncf %134 : vector<16x64xf32> to vector<16x64xbf16>
    %c16_82 = arith.constant 16 : index
    %c0_83 = arith.constant 0 : index
    %136 = vector.load %arg12[%c16_82, %c0_83] : memref<128x64xbf16, #tpu.memory_space<vmem>>, vector<16x64xbf16>
    tpu.vector_store %arg12[%c16_82, %c0_83], %135 {strides = array<i32>} : memref<128x64xbf16, #tpu.memory_space<vmem>>, vector<16x64xbf16>,
    %c32_84 = arith.constant 32 : index
    %c0_85 = arith.constant 0 : index
    %137 = vector.load %arg11[%c32_84, %c0_85] : memref<128x256xf32, #tpu.memory_space<vmem>>, vector<16x256xf32>
    %138 = arith.truncf %134 : vector<16x64xf32> to vector<16x64xbf16>
    %c0_86 = arith.constant 0 : index
    %c0_87 = arith.constant 0 : index
    %139 = vector.load %arg3[%c0_86, %c0_87] : memref<64x256xbf16, #tpu.memory_space<vmem>>, vector<64x256xbf16>
    %cst_88 = arith.constant dense<0.000000e+00> : vector<16x256xf32>
    %140 = tpu.matmul %138, %139, %cst_88 {dimension_numbers = #tpu.dot_dimension_numbers<[1], [0], [0], [1], [0, 0, 1, 1], [], []>} : vector<16x64xbf16>, vector<64x256xbf16>, vector<16x256xf32> -> vector<16x256xf32>
    %141 = arith.addf %137, %140 : vector<16x256xf32>
    %142 = vector.extract_strided_slice %141 {offsets = [0, 0], sizes = [16, 64], strides = [1, 1]} : vector<16x256xf32> to vector<16x64xf32>
    %cst_89 = arith.constant 5.000000e-01 : f32
    %143 = vector.broadcast %cst_89 : f32 to vector<16x64xf32>
    %144 = arith.mulf %143, %142 : vector<16x64xf32>
    %145 = math.tanh %144 : vector<16x64xf32>
    %cst_90 = arith.constant 5.000000e-01 : f32
    %146 = vector.broadcast %cst_90 : f32 to vector<16x64xf32>
    %147 = arith.mulf %146, %145 : vector<16x64xf32>
    %cst_91 = arith.constant 5.000000e-01 : f32
    %148 = vector.broadcast %cst_91 : f32 to vector<16x64xf32>
    %149 = arith.addf %147, %148 : vector<16x64xf32>
    %150 = vector.extract_strided_slice %141 {offsets = [0, 64], sizes = [16, 64], strides = [1, 1]} : vector<16x256xf32> to vector<16x64xf32>
    %cst_92 = arith.constant 5.000000e-01 : f32
    %151 = vector.broadcast %cst_92 : f32 to vector<16x64xf32>
    %152 = arith.mulf %151, %150 : vector<16x64xf32>
    %153 = math.tanh %152 : vector<16x64xf32>
    %cst_93 = arith.constant 5.000000e-01 : f32
    %154 = vector.broadcast %cst_93 : f32 to vector<16x64xf32>
    %155 = arith.mulf %154, %153 : vector<16x64xf32>
    %cst_94 = arith.constant 5.000000e-01 : f32
    %156 = vector.broadcast %cst_94 : f32 to vector<16x64xf32>
    %157 = arith.addf %155, %156 : vector<16x64xf32>
    %158 = vector.extract_strided_slice %141 {offsets = [0, 128], sizes = [16, 64], strides = [1, 1]} : vector<16x256xf32> to vector<16x64xf32>
    %159 = math.tanh %158 : vector<16x64xf32>
    %160 = vector.extract_strided_slice %141 {offsets = [0, 192], sizes = [16, 64], strides = [1, 1]} : vector<16x256xf32> to vector<16x64xf32>
    %cst_95 = arith.constant 5.000000e-01 : f32
    %161 = vector.broadcast %cst_95 : f32 to vector<16x64xf32>
    %162 = arith.mulf %161, %160 : vector<16x64xf32>
    %163 = math.tanh %162 : vector<16x64xf32>
    %cst_96 = arith.constant 5.000000e-01 : f32
    %164 = vector.broadcast %cst_96 : f32 to vector<16x64xf32>
    %165 = arith.mulf %164, %163 : vector<16x64xf32>
    %cst_97 = arith.constant 5.000000e-01 : f32
    %166 = vector.broadcast %cst_97 : f32 to vector<16x64xf32>
    %167 = arith.addf %165, %166 : vector<16x64xf32>
    %168 = arith.mulf %157, %132 : vector<16x64xf32>
    %169 = arith.mulf %149, %159 : vector<16x64xf32>
    %170 = arith.addf %168, %169 : vector<16x64xf32>
    %171 = math.tanh %170 : vector<16x64xf32>
    %172 = arith.mulf %167, %171 : vector<16x64xf32>
    %173 = arith.truncf %172 : vector<16x64xf32> to vector<16x64xbf16>
    %c32_98 = arith.constant 32 : index
    %c0_99 = arith.constant 0 : index
    %174 = vector.load %arg12[%c32_98, %c0_99] : memref<128x64xbf16, #tpu.memory_space<vmem>>, vector<16x64xbf16>
    tpu.vector_store %arg12[%c32_98, %c0_99], %173 {strides = array<i32>} : memref<128x64xbf16, #tpu.memory_space<vmem>>, vector<16x64xbf16>,
    %c48_100 = arith.constant 48 : index
    %c0_101 = arith.constant 0 : index
    %175 = vector.load %arg11[%c48_100, %c0_101] : memref<128x256xf32, #tpu.memory_space<vmem>>, vector<16x256xf32>
    %176 = arith.truncf %172 : vector<16x64xf32> to vector<16x64xbf16>
    %c0_102 = arith.constant 0 : index
    %c0_103 = arith.constant 0 : index
    %177 = vector.load %arg3[%c0_102, %c0_103] : memref<64x256xbf16, #tpu.memory_space<vmem>>, vector<64x256xbf16>
    %cst_104 = arith.constant dense<0.000000e+00> : vector<16x256xf32>
    %178 = tpu.matmul %176, %177, %cst_104 {dimension_numbers = #tpu.dot_dimension_numbers<[1], [0], [0], [1], [0, 0, 1, 1], [], []>} : vector<16x64xbf16>, vector<64x256xbf16>, vector<16x256xf32> -> vector<16x256xf32>
    %179 = arith.addf %175, %178 : vector<16x256xf32>
    %180 = vector.extract_strided_slice %179 {offsets = [0, 0], sizes = [16, 64], strides = [1, 1]} : vector<16x256xf32> to vector<16x64xf32>
    %cst_105 = arith.constant 5.000000e-01 : f32
    %181 = vector.broadcast %cst_105 : f32 to vector<16x64xf32>
    %182 = arith.mulf %181, %180 : vector<16x64xf32>
    %183 = math.tanh %182 : vector<16x64xf32>
    %cst_106 = arith.constant 5.000000e-01 : f32
    %184 = vector.broadcast %cst_106 : f32 to vector<16x64xf32>
    %185 = arith.mulf %184, %183 : vector<16x64xf32>
    %cst_107 = arith.constant 5.000000e-01 : f32
    %186 = vector.broadcast %cst_107 : f32 to vector<16x64xf32>
    %187 = arith.addf %185, %186 : vector<16x64xf32>
    %188 = vector.extract_strided_slice %179 {offsets = [0, 64], sizes = [16, 64], strides = [1, 1]} : vector<16x256xf32> to vector<16x64xf32>
    %cst_108 = arith.constant 5.000000e-01 : f32
    %189 = vector.broadcast %cst_108 : f32 to vector<16x64xf32>
    %190 = arith.mulf %189, %188 : vector<16x64xf32>
    %191 = math.tanh %190 : vector<16x64xf32>
    %cst_109 = arith.constant 5.000000e-01 : f32
    %192 = vector.broadcast %cst_109 : f32 to vector<16x64xf32>
    %193 = arith.mulf %192, %191 : vector<16x64xf32>
    %cst_110 = arith.constant 5.000000e-01 : f32
    %194 = vector.broadcast %cst_110 : f32 to vector<16x64xf32>
    %195 = arith.addf %193, %194 : vector<16x64xf32>
    %196 = vector.extract_strided_slice %179 {offsets = [0, 128], sizes = [16, 64], strides = [1, 1]} : vector<16x256xf32> to vector<16x64xf32>
    %197 = math.tanh %196 : vector<16x64xf32>
    %198 = vector.extract_strided_slice %179 {offsets = [0, 192], sizes = [16, 64], strides = [1, 1]} : vector<16x256xf32> to vector<16x64xf32>
    %cst_111 = arith.constant 5.000000e-01 : f32
    %199 = vector.broadcast %cst_111 : f32 to vector<16x64xf32>
    %200 = arith.mulf %199, %198 : vector<16x64xf32>
    %201 = math.tanh %200 : vector<16x64xf32>
    %cst_112 = arith.constant 5.000000e-01 : f32
    %202 = vector.broadcast %cst_112 : f32 to vector<16x64xf32>
    %203 = arith.mulf %202, %201 : vector<16x64xf32>
    %cst_113 = arith.constant 5.000000e-01 : f32
    %204 = vector.broadcast %cst_113 : f32 to vector<16x64xf32>
    %205 = arith.addf %203, %204 : vector<16x64xf32>
    %206 = arith.mulf %195, %170 : vector<16x64xf32>
    %207 = arith.mulf %187, %197 : vector<16x64xf32>
    %208 = arith.addf %206, %207 : vector<16x64xf32>
    %209 = math.tanh %208 : vector<16x64xf32>
    %210 = arith.mulf %205, %209 : vector<16x64xf32>
    %211 = arith.truncf %210 : vector<16x64xf32> to vector<16x64xbf16>
    %c48_114 = arith.constant 48 : index
    %c0_115 = arith.constant 0 : index
    %212 = vector.load %arg12[%c48_114, %c0_115] : memref<128x64xbf16, #tpu.memory_space<vmem>>, vector<16x64xbf16>
    tpu.vector_store %arg12[%c48_114, %c0_115], %211 {strides = array<i32>} : memref<128x64xbf16, #tpu.memory_space<vmem>>, vector<16x64xbf16>,
    %c64_116 = arith.constant 64 : index
    %c0_117 = arith.constant 0 : index
    %213 = vector.load %arg11[%c64_116, %c0_117] : memref<128x256xf32, #tpu.memory_space<vmem>>, vector<16x256xf32>
    %214 = arith.truncf %210 : vector<16x64xf32> to vector<16x64xbf16>
    %c0_118 = arith.constant 0 : index
    %c0_119 = arith.constant 0 : index
    %215 = vector.load %arg3[%c0_118, %c0_119] : memref<64x256xbf16, #tpu.memory_space<vmem>>, vector<64x256xbf16>
    %cst_120 = arith.constant dense<0.000000e+00> : vector<16x256xf32>
    %216 = tpu.matmul %214, %215, %cst_120 {dimension_numbers = #tpu.dot_dimension_numbers<[1], [0], [0], [1], [0, 0, 1, 1], [], []>} : vector<16x64xbf16>, vector<64x256xbf16>, vector<16x256xf32> -> vector<16x256xf32>
    %217 = arith.addf %213, %216 : vector<16x256xf32>
    %218 = vector.extract_strided_slice %217 {offsets = [0, 0], sizes = [16, 64], strides = [1, 1]} : vector<16x256xf32> to vector<16x64xf32>
    %cst_121 = arith.constant 5.000000e-01 : f32
    %219 = vector.broadcast %cst_121 : f32 to vector<16x64xf32>
    %220 = arith.mulf %219, %218 : vector<16x64xf32>
    %221 = math.tanh %220 : vector<16x64xf32>
    %cst_122 = arith.constant 5.000000e-01 : f32
    %222 = vector.broadcast %cst_122 : f32 to vector<16x64xf32>
    %223 = arith.mulf %222, %221 : vector<16x64xf32>
    %cst_123 = arith.constant 5.000000e-01 : f32
    %224 = vector.broadcast %cst_123 : f32 to vector<16x64xf32>
    %225 = arith.addf %223, %224 : vector<16x64xf32>
    %226 = vector.extract_strided_slice %217 {offsets = [0, 64], sizes = [16, 64], strides = [1, 1]} : vector<16x256xf32> to vector<16x64xf32>
    %cst_124 = arith.constant 5.000000e-01 : f32
    %227 = vector.broadcast %cst_124 : f32 to vector<16x64xf32>
    %228 = arith.mulf %227, %226 : vector<16x64xf32>
    %229 = math.tanh %228 : vector<16x64xf32>
    %cst_125 = arith.constant 5.000000e-01 : f32
    %230 = vector.broadcast %cst_125 : f32 to vector<16x64xf32>
    %231 = arith.mulf %230, %229 : vector<16x64xf32>
    %cst_126 = arith.constant 5.000000e-01 : f32
    %232 = vector.broadcast %cst_126 : f32 to vector<16x64xf32>
    %233 = arith.addf %231, %232 : vector<16x64xf32>
    %234 = vector.extract_strided_slice %217 {offsets = [0, 128], sizes = [16, 64], strides = [1, 1]} : vector<16x256xf32> to vector<16x64xf32>
    %235 = math.tanh %234 : vector<16x64xf32>
    %236 = vector.extract_strided_slice %217 {offsets = [0, 192], sizes = [16, 64], strides = [1, 1]} : vector<16x256xf32> to vector<16x64xf32>
    %cst_127 = arith.constant 5.000000e-01 : f32
    %237 = vector.broadcast %cst_127 : f32 to vector<16x64xf32>
    %238 = arith.mulf %237, %236 : vector<16x64xf32>
    %239 = math.tanh %238 : vector<16x64xf32>
    %cst_128 = arith.constant 5.000000e-01 : f32
    %240 = vector.broadcast %cst_128 : f32 to vector<16x64xf32>
    %241 = arith.mulf %240, %239 : vector<16x64xf32>
    %cst_129 = arith.constant 5.000000e-01 : f32
    %242 = vector.broadcast %cst_129 : f32 to vector<16x64xf32>
    %243 = arith.addf %241, %242 : vector<16x64xf32>
    %244 = arith.mulf %233, %208 : vector<16x64xf32>
    %245 = arith.mulf %225, %235 : vector<16x64xf32>
    %246 = arith.addf %244, %245 : vector<16x64xf32>
    %247 = math.tanh %246 : vector<16x64xf32>
    %248 = arith.mulf %243, %247 : vector<16x64xf32>
    %249 = arith.truncf %248 : vector<16x64xf32> to vector<16x64xbf16>
    %c64_130 = arith.constant 64 : index
    %c0_131 = arith.constant 0 : index
    %250 = vector.load %arg12[%c64_130, %c0_131] : memref<128x64xbf16, #tpu.memory_space<vmem>>, vector<16x64xbf16>
    tpu.vector_store %arg12[%c64_130, %c0_131], %249 {strides = array<i32>} : memref<128x64xbf16, #tpu.memory_space<vmem>>, vector<16x64xbf16>,
    %c80_132 = arith.constant 80 : index
    %c0_133 = arith.constant 0 : index
    %251 = vector.load %arg11[%c80_132, %c0_133] : memref<128x256xf32, #tpu.memory_space<vmem>>, vector<16x256xf32>
    %252 = arith.truncf %248 : vector<16x64xf32> to vector<16x64xbf16>
    %c0_134 = arith.constant 0 : index
    %c0_135 = arith.constant 0 : index
    %253 = vector.load %arg3[%c0_134, %c0_135] : memref<64x256xbf16, #tpu.memory_space<vmem>>, vector<64x256xbf16>
    %cst_136 = arith.constant dense<0.000000e+00> : vector<16x256xf32>
    %254 = tpu.matmul %252, %253, %cst_136 {dimension_numbers = #tpu.dot_dimension_numbers<[1], [0], [0], [1], [0, 0, 1, 1], [], []>} : vector<16x64xbf16>, vector<64x256xbf16>, vector<16x256xf32> -> vector<16x256xf32>
    %255 = arith.addf %251, %254 : vector<16x256xf32>
    %256 = vector.extract_strided_slice %255 {offsets = [0, 0], sizes = [16, 64], strides = [1, 1]} : vector<16x256xf32> to vector<16x64xf32>
    %cst_137 = arith.constant 5.000000e-01 : f32
    %257 = vector.broadcast %cst_137 : f32 to vector<16x64xf32>
    %258 = arith.mulf %257, %256 : vector<16x64xf32>
    %259 = math.tanh %258 : vector<16x64xf32>
    %cst_138 = arith.constant 5.000000e-01 : f32
    %260 = vector.broadcast %cst_138 : f32 to vector<16x64xf32>
    %261 = arith.mulf %260, %259 : vector<16x64xf32>
    %cst_139 = arith.constant 5.000000e-01 : f32
    %262 = vector.broadcast %cst_139 : f32 to vector<16x64xf32>
    %263 = arith.addf %261, %262 : vector<16x64xf32>
    %264 = vector.extract_strided_slice %255 {offsets = [0, 64], sizes = [16, 64], strides = [1, 1]} : vector<16x256xf32> to vector<16x64xf32>
    %cst_140 = arith.constant 5.000000e-01 : f32
    %265 = vector.broadcast %cst_140 : f32 to vector<16x64xf32>
    %266 = arith.mulf %265, %264 : vector<16x64xf32>
    %267 = math.tanh %266 : vector<16x64xf32>
    %cst_141 = arith.constant 5.000000e-01 : f32
    %268 = vector.broadcast %cst_141 : f32 to vector<16x64xf32>
    %269 = arith.mulf %268, %267 : vector<16x64xf32>
    %cst_142 = arith.constant 5.000000e-01 : f32
    %270 = vector.broadcast %cst_142 : f32 to vector<16x64xf32>
    %271 = arith.addf %269, %270 : vector<16x64xf32>
    %272 = vector.extract_strided_slice %255 {offsets = [0, 128], sizes = [16, 64], strides = [1, 1]} : vector<16x256xf32> to vector<16x64xf32>
    %273 = math.tanh %272 : vector<16x64xf32>
    %274 = vector.extract_strided_slice %255 {offsets = [0, 192], sizes = [16, 64], strides = [1, 1]} : vector<16x256xf32> to vector<16x64xf32>
    %cst_143 = arith.constant 5.000000e-01 : f32
    %275 = vector.broadcast %cst_143 : f32 to vector<16x64xf32>
    %276 = arith.mulf %275, %274 : vector<16x64xf32>
    %277 = math.tanh %276 : vector<16x64xf32>
    %cst_144 = arith.constant 5.000000e-01 : f32
    %278 = vector.broadcast %cst_144 : f32 to vector<16x64xf32>
    %279 = arith.mulf %278, %277 : vector<16x64xf32>
    %cst_145 = arith.constant 5.000000e-01 : f32
    %280 = vector.broadcast %cst_145 : f32 to vector<16x64xf32>
    %281 = arith.addf %279, %280 : vector<16x64xf32>
    %282 = arith.mulf %271, %246 : vector<16x64xf32>
    %283 = arith.mulf %263, %273 : vector<16x64xf32>
    %284 = arith.addf %282, %283 : vector<16x64xf32>
    %285 = math.tanh %284 : vector<16x64xf32>
    %286 = arith.mulf %281, %285 : vector<16x64xf32>
    %287 = arith.truncf %286 : vector<16x64xf32> to vector<16x64xbf16>
    %c80_146 = arith.constant 80 : index
    %c0_147 = arith.constant 0 : index
    %288 = vector.load %arg12[%c80_146, %c0_147] : memref<128x64xbf16, #tpu.memory_space<vmem>>, vector<16x64xbf16>
    tpu.vector_store %arg12[%c80_146, %c0_147], %287 {strides = array<i32>} : memref<128x64xbf16, #tpu.memory_space<vmem>>, vector<16x64xbf16>,
    %c96_148 = arith.constant 96 : index
    %c0_149 = arith.constant 0 : index
    %289 = vector.load %arg11[%c96_148, %c0_149] : memref<128x256xf32, #tpu.memory_space<vmem>>, vector<16x256xf32>
    %290 = arith.truncf %286 : vector<16x64xf32> to vector<16x64xbf16>
    %c0_150 = arith.constant 0 : index
    %c0_151 = arith.constant 0 : index
    %291 = vector.load %arg3[%c0_150, %c0_151] : memref<64x256xbf16, #tpu.memory_space<vmem>>, vector<64x256xbf16>
    %cst_152 = arith.constant dense<0.000000e+00> : vector<16x256xf32>
    %292 = tpu.matmul %290, %291, %cst_152 {dimension_numbers = #tpu.dot_dimension_numbers<[1], [0], [0], [1], [0, 0, 1, 1], [], []>} : vector<16x64xbf16>, vector<64x256xbf16>, vector<16x256xf32> -> vector<16x256xf32>
    %293 = arith.addf %289, %292 : vector<16x256xf32>
    %294 = vector.extract_strided_slice %293 {offsets = [0, 0], sizes = [16, 64], strides = [1, 1]} : vector<16x256xf32> to vector<16x64xf32>
    %cst_153 = arith.constant 5.000000e-01 : f32
    %295 = vector.broadcast %cst_153 : f32 to vector<16x64xf32>
    %296 = arith.mulf %295, %294 : vector<16x64xf32>
    %297 = math.tanh %296 : vector<16x64xf32>
    %cst_154 = arith.constant 5.000000e-01 : f32
    %298 = vector.broadcast %cst_154 : f32 to vector<16x64xf32>
    %299 = arith.mulf %298, %297 : vector<16x64xf32>
    %cst_155 = arith.constant 5.000000e-01 : f32
    %300 = vector.broadcast %cst_155 : f32 to vector<16x64xf32>
    %301 = arith.addf %299, %300 : vector<16x64xf32>
    %302 = vector.extract_strided_slice %293 {offsets = [0, 64], sizes = [16, 64], strides = [1, 1]} : vector<16x256xf32> to vector<16x64xf32>
    %cst_156 = arith.constant 5.000000e-01 : f32
    %303 = vector.broadcast %cst_156 : f32 to vector<16x64xf32>
    %304 = arith.mulf %303, %302 : vector<16x64xf32>
    %305 = math.tanh %304 : vector<16x64xf32>
    %cst_157 = arith.constant 5.000000e-01 : f32
    %306 = vector.broadcast %cst_157 : f32 to vector<16x64xf32>
    %307 = arith.mulf %306, %305 : vector<16x64xf32>
    %cst_158 = arith.constant 5.000000e-01 : f32
    %308 = vector.broadcast %cst_158 : f32 to vector<16x64xf32>
    %309 = arith.addf %307, %308 : vector<16x64xf32>
    %310 = vector.extract_strided_slice %293 {offsets = [0, 128], sizes = [16, 64], strides = [1, 1]} : vector<16x256xf32> to vector<16x64xf32>
    %311 = math.tanh %310 : vector<16x64xf32>
    %312 = vector.extract_strided_slice %293 {offsets = [0, 192], sizes = [16, 64], strides = [1, 1]} : vector<16x256xf32> to vector<16x64xf32>
    %cst_159 = arith.constant 5.000000e-01 : f32
    %313 = vector.broadcast %cst_159 : f32 to vector<16x64xf32>
    %314 = arith.mulf %313, %312 : vector<16x64xf32>
    %315 = math.tanh %314 : vector<16x64xf32>
    %cst_160 = arith.constant 5.000000e-01 : f32
    %316 = vector.broadcast %cst_160 : f32 to vector<16x64xf32>
    %317 = arith.mulf %316, %315 : vector<16x64xf32>
    %cst_161 = arith.constant 5.000000e-01 : f32
    %318 = vector.broadcast %cst_161 : f32 to vector<16x64xf32>
    %319 = arith.addf %317, %318 : vector<16x64xf32>
    %320 = arith.mulf %309, %284 : vector<16x64xf32>
    %321 = arith.mulf %301, %311 : vector<16x64xf32>
    %322 = arith.addf %320, %321 : vector<16x64xf32>
    %323 = math.tanh %322 : vector<16x64xf32>
    %324 = arith.mulf %319, %323 : vector<16x64xf32>
    %325 = arith.truncf %324 : vector<16x64xf32> to vector<16x64xbf16>
    %c96_162 = arith.constant 96 : index
    %c0_163 = arith.constant 0 : index
    %326 = vector.load %arg12[%c96_162, %c0_163] : memref<128x64xbf16, #tpu.memory_space<vmem>>, vector<16x64xbf16>
    tpu.vector_store %arg12[%c96_162, %c0_163], %325 {strides = array<i32>} : memref<128x64xbf16, #tpu.memory_space<vmem>>, vector<16x64xbf16>,
    %c112_164 = arith.constant 112 : index
    %c0_165 = arith.constant 0 : index
    %327 = vector.load %arg11[%c112_164, %c0_165] : memref<128x256xf32, #tpu.memory_space<vmem>>, vector<16x256xf32>
    %328 = arith.truncf %324 : vector<16x64xf32> to vector<16x64xbf16>
    %c0_166 = arith.constant 0 : index
    %c0_167 = arith.constant 0 : index
    %329 = vector.load %arg3[%c0_166, %c0_167] : memref<64x256xbf16, #tpu.memory_space<vmem>>, vector<64x256xbf16>
    %cst_168 = arith.constant dense<0.000000e+00> : vector<16x256xf32>
    %330 = tpu.matmul %328, %329, %cst_168 {dimension_numbers = #tpu.dot_dimension_numbers<[1], [0], [0], [1], [0, 0, 1, 1], [], []>} : vector<16x64xbf16>, vector<64x256xbf16>, vector<16x256xf32> -> vector<16x256xf32>
    %331 = arith.addf %327, %330 : vector<16x256xf32>
    %332 = vector.extract_strided_slice %331 {offsets = [0, 0], sizes = [16, 64], strides = [1, 1]} : vector<16x256xf32> to vector<16x64xf32>
    %cst_169 = arith.constant 5.000000e-01 : f32
    %333 = vector.broadcast %cst_169 : f32 to vector<16x64xf32>
    %334 = arith.mulf %333, %332 : vector<16x64xf32>
    %335 = math.tanh %334 : vector<16x64xf32>
    %cst_170 = arith.constant 5.000000e-01 : f32
    %336 = vector.broadcast %cst_170 : f32 to vector<16x64xf32>
    %337 = arith.mulf %336, %335 : vector<16x64xf32>
    %cst_171 = arith.constant 5.000000e-01 : f32
    %338 = vector.broadcast %cst_171 : f32 to vector<16x64xf32>
    %339 = arith.addf %337, %338 : vector<16x64xf32>
    %340 = vector.extract_strided_slice %331 {offsets = [0, 64], sizes = [16, 64], strides = [1, 1]} : vector<16x256xf32> to vector<16x64xf32>
    %cst_172 = arith.constant 5.000000e-01 : f32
    %341 = vector.broadcast %cst_172 : f32 to vector<16x64xf32>
    %342 = arith.mulf %341, %340 : vector<16x64xf32>
    %343 = math.tanh %342 : vector<16x64xf32>
    %cst_173 = arith.constant 5.000000e-01 : f32
    %344 = vector.broadcast %cst_173 : f32 to vector<16x64xf32>
    %345 = arith.mulf %344, %343 : vector<16x64xf32>
    %cst_174 = arith.constant 5.000000e-01 : f32
    %346 = vector.broadcast %cst_174 : f32 to vector<16x64xf32>
    %347 = arith.addf %345, %346 : vector<16x64xf32>
    %348 = vector.extract_strided_slice %331 {offsets = [0, 128], sizes = [16, 64], strides = [1, 1]} : vector<16x256xf32> to vector<16x64xf32>
    %349 = math.tanh %348 : vector<16x64xf32>
    %350 = vector.extract_strided_slice %331 {offsets = [0, 192], sizes = [16, 64], strides = [1, 1]} : vector<16x256xf32> to vector<16x64xf32>
    %cst_175 = arith.constant 5.000000e-01 : f32
    %351 = vector.broadcast %cst_175 : f32 to vector<16x64xf32>
    %352 = arith.mulf %351, %350 : vector<16x64xf32>
    %353 = math.tanh %352 : vector<16x64xf32>
    %cst_176 = arith.constant 5.000000e-01 : f32
    %354 = vector.broadcast %cst_176 : f32 to vector<16x64xf32>
    %355 = arith.mulf %354, %353 : vector<16x64xf32>
    %cst_177 = arith.constant 5.000000e-01 : f32
    %356 = vector.broadcast %cst_177 : f32 to vector<16x64xf32>
    %357 = arith.addf %355, %356 : vector<16x64xf32>
    %358 = arith.mulf %347, %322 : vector<16x64xf32>
    %359 = arith.mulf %339, %349 : vector<16x64xf32>
    %360 = arith.addf %358, %359 : vector<16x64xf32>
    %361 = math.tanh %360 : vector<16x64xf32>
    %362 = arith.mulf %357, %361 : vector<16x64xf32>
    %363 = arith.truncf %362 : vector<16x64xf32> to vector<16x64xbf16>
    %c112_178 = arith.constant 112 : index
    %c0_179 = arith.constant 0 : index
    %364 = vector.load %arg12[%c112_178, %c0_179] : memref<128x64xbf16, #tpu.memory_space<vmem>>, vector<16x64xbf16>
    tpu.vector_store %arg12[%c112_178, %c0_179], %363 {strides = array<i32>} : memref<128x64xbf16, #tpu.memory_space<vmem>>, vector<16x64xbf16>,
    %c0_180 = arith.constant 0 : index
    %c0_181 = arith.constant 0 : index
    %365 = vector.load %arg12[%c0_180, %c0_181] : memref<128x64xbf16, #tpu.memory_space<vmem>>, vector<128x64xbf16>
    %c0_182 = arith.constant 0 : index
    %c0_183 = arith.constant 0 : index
    %366 = vector.load %arg5[%c0_182, %c0_183] : memref<64x256xbf16, #tpu.memory_space<vmem>>, vector<64x256xbf16>
    %cst_184 = arith.constant dense<0.000000e+00> : vector<128x256xf32>
    %367 = tpu.matmul %365, %366, %cst_184 {dimension_numbers = #tpu.dot_dimension_numbers<[1], [0], [0], [1], [0, 0, 1, 1], [], []>} : vector<128x64xbf16>, vector<64x256xbf16>, vector<128x256xf32> -> vector<128x256xf32>
    %c0_185 = arith.constant 0 : index
    %c0_186 = arith.constant 0 : index
    %368 = vector.load %arg7[%c0_185, %c0_186] : memref<1x256xf32, #tpu.memory_space<vmem>>, vector<1x256xf32>
    %369 = vector.broadcast %368 : vector<1x256xf32> to vector<128x256xf32>
    %370 = arith.addf %367, %369 : vector<128x256xf32>
    %c0_187 = arith.constant 0 : index
    %c0_188 = arith.constant 0 : index
    %371 = vector.load %arg11[%c0_187, %c0_188] : memref<128x256xf32, #tpu.memory_space<vmem>>, vector<128x256xf32>
    tpu.vector_store %arg11[%c0_187, %c0_188], %370 {strides = array<i32>} : memref<128x256xf32, #tpu.memory_space<vmem>>, vector<128x256xf32>,
    %cst_189 = arith.constant 0.000000e+00 : f32
    %372 = vector.broadcast %cst_189 : f32 to vector<16x64xf32>
    %cst_190 = arith.constant 0.000000e+00 : f32
    %373 = vector.broadcast %cst_190 : f32 to vector<16x64xf32>
    %c0_191 = arith.constant 0 : index
    %c0_192 = arith.constant 0 : index
    %374 = vector.load %arg11[%c0_191, %c0_192] : memref<128x256xf32, #tpu.memory_space<vmem>>, vector<16x256xf32>
    %375 = arith.truncf %372 : vector<16x64xf32> to vector<16x64xbf16>
    %c0_193 = arith.constant 0 : index
    %c0_194 = arith.constant 0 : index
    %376 = vector.load %arg6[%c0_193, %c0_194] : memref<64x256xbf16, #tpu.memory_space<vmem>>, vector<64x256xbf16>
    %cst_195 = arith.constant dense<0.000000e+00> : vector<16x256xf32>
    %377 = tpu.matmul %375, %376, %cst_195 {dimension_numbers = #tpu.dot_dimension_numbers<[1], [0], [0], [1], [0, 0, 1, 1], [], []>} : vector<16x64xbf16>, vector<64x256xbf16>, vector<16x256xf32> -> vector<16x256xf32>
    %378 = arith.addf %374, %377 : vector<16x256xf32>
    %379 = vector.extract_strided_slice %378 {offsets = [0, 0], sizes = [16, 64], strides = [1, 1]} : vector<16x256xf32> to vector<16x64xf32>
    %cst_196 = arith.constant 5.000000e-01 : f32
    %380 = vector.broadcast %cst_196 : f32 to vector<16x64xf32>
    %381 = arith.mulf %380, %379 : vector<16x64xf32>
    %382 = math.tanh %381 : vector<16x64xf32>
    %cst_197 = arith.constant 5.000000e-01 : f32
    %383 = vector.broadcast %cst_197 : f32 to vector<16x64xf32>
    %384 = arith.mulf %383, %382 : vector<16x64xf32>
    %cst_198 = arith.constant 5.000000e-01 : f32
    %385 = vector.broadcast %cst_198 : f32 to vector<16x64xf32>
    %386 = arith.addf %384, %385 : vector<16x64xf32>
    %387 = vector.extract_strided_slice %378 {offsets = [0, 64], sizes = [16, 64], strides = [1, 1]} : vector<16x256xf32> to vector<16x64xf32>
    %cst_199 = arith.constant 5.000000e-01 : f32
    %388 = vector.broadcast %cst_199 : f32 to vector<16x64xf32>
    %389 = arith.mulf %388, %387 : vector<16x64xf32>
    %390 = math.tanh %389 : vector<16x64xf32>
    %cst_200 = arith.constant 5.000000e-01 : f32
    %391 = vector.broadcast %cst_200 : f32 to vector<16x64xf32>
    %392 = arith.mulf %391, %390 : vector<16x64xf32>
    %cst_201 = arith.constant 5.000000e-01 : f32
    %393 = vector.broadcast %cst_201 : f32 to vector<16x64xf32>
    %394 = arith.addf %392, %393 : vector<16x64xf32>
    %395 = vector.extract_strided_slice %378 {offsets = [0, 128], sizes = [16, 64], strides = [1, 1]} : vector<16x256xf32> to vector<16x64xf32>
    %396 = math.tanh %395 : vector<16x64xf32>
    %397 = vector.extract_strided_slice %378 {offsets = [0, 192], sizes = [16, 64], strides = [1, 1]} : vector<16x256xf32> to vector<16x64xf32>
    %cst_202 = arith.constant 5.000000e-01 : f32
    %398 = vector.broadcast %cst_202 : f32 to vector<16x64xf32>
    %399 = arith.mulf %398, %397 : vector<16x64xf32>
    %400 = math.tanh %399 : vector<16x64xf32>
    %cst_203 = arith.constant 5.000000e-01 : f32
    %401 = vector.broadcast %cst_203 : f32 to vector<16x64xf32>
    %402 = arith.mulf %401, %400 : vector<16x64xf32>
    %cst_204 = arith.constant 5.000000e-01 : f32
    %403 = vector.broadcast %cst_204 : f32 to vector<16x64xf32>
    %404 = arith.addf %402, %403 : vector<16x64xf32>
    %405 = arith.mulf %394, %373 : vector<16x64xf32>
    %406 = arith.mulf %386, %396 : vector<16x64xf32>
    %407 = arith.addf %405, %406 : vector<16x64xf32>
    %408 = math.tanh %407 : vector<16x64xf32>
    %409 = arith.mulf %404, %408 : vector<16x64xf32>
    %c16_205 = arith.constant 16 : index
    %c0_206 = arith.constant 0 : index
    %410 = vector.load %arg11[%c16_205, %c0_206] : memref<128x256xf32, #tpu.memory_space<vmem>>, vector<16x256xf32>
    %411 = arith.truncf %409 : vector<16x64xf32> to vector<16x64xbf16>
    %c0_207 = arith.constant 0 : index
    %c0_208 = arith.constant 0 : index
    %412 = vector.load %arg6[%c0_207, %c0_208] : memref<64x256xbf16, #tpu.memory_space<vmem>>, vector<64x256xbf16>
    %cst_209 = arith.constant dense<0.000000e+00> : vector<16x256xf32>
    %413 = tpu.matmul %411, %412, %cst_209 {dimension_numbers = #tpu.dot_dimension_numbers<[1], [0], [0], [1], [0, 0, 1, 1], [], []>} : vector<16x64xbf16>, vector<64x256xbf16>, vector<16x256xf32> -> vector<16x256xf32>
    %414 = arith.addf %410, %413 : vector<16x256xf32>
    %415 = vector.extract_strided_slice %414 {offsets = [0, 0], sizes = [16, 64], strides = [1, 1]} : vector<16x256xf32> to vector<16x64xf32>
    %cst_210 = arith.constant 5.000000e-01 : f32
    %416 = vector.broadcast %cst_210 : f32 to vector<16x64xf32>
    %417 = arith.mulf %416, %415 : vector<16x64xf32>
    %418 = math.tanh %417 : vector<16x64xf32>
    %cst_211 = arith.constant 5.000000e-01 : f32
    %419 = vector.broadcast %cst_211 : f32 to vector<16x64xf32>
    %420 = arith.mulf %419, %418 : vector<16x64xf32>
    %cst_212 = arith.constant 5.000000e-01 : f32
    %421 = vector.broadcast %cst_212 : f32 to vector<16x64xf32>
    %422 = arith.addf %420, %421 : vector<16x64xf32>
    %423 = vector.extract_strided_slice %414 {offsets = [0, 64], sizes = [16, 64], strides = [1, 1]} : vector<16x256xf32> to vector<16x64xf32>
    %cst_213 = arith.constant 5.000000e-01 : f32
    %424 = vector.broadcast %cst_213 : f32 to vector<16x64xf32>
    %425 = arith.mulf %424, %423 : vector<16x64xf32>
    %426 = math.tanh %425 : vector<16x64xf32>
    %cst_214 = arith.constant 5.000000e-01 : f32
    %427 = vector.broadcast %cst_214 : f32 to vector<16x64xf32>
    %428 = arith.mulf %427, %426 : vector<16x64xf32>
    %cst_215 = arith.constant 5.000000e-01 : f32
    %429 = vector.broadcast %cst_215 : f32 to vector<16x64xf32>
    %430 = arith.addf %428, %429 : vector<16x64xf32>
    %431 = vector.extract_strided_slice %414 {offsets = [0, 128], sizes = [16, 64], strides = [1, 1]} : vector<16x256xf32> to vector<16x64xf32>
    %432 = math.tanh %431 : vector<16x64xf32>
    %433 = vector.extract_strided_slice %414 {offsets = [0, 192], sizes = [16, 64], strides = [1, 1]} : vector<16x256xf32> to vector<16x64xf32>
    %cst_216 = arith.constant 5.000000e-01 : f32
    %434 = vector.broadcast %cst_216 : f32 to vector<16x64xf32>
    %435 = arith.mulf %434, %433 : vector<16x64xf32>
    %436 = math.tanh %435 : vector<16x64xf32>
    %cst_217 = arith.constant 5.000000e-01 : f32
    %437 = vector.broadcast %cst_217 : f32 to vector<16x64xf32>
    %438 = arith.mulf %437, %436 : vector<16x64xf32>
    %cst_218 = arith.constant 5.000000e-01 : f32
    %439 = vector.broadcast %cst_218 : f32 to vector<16x64xf32>
    %440 = arith.addf %438, %439 : vector<16x64xf32>
    %441 = arith.mulf %430, %407 : vector<16x64xf32>
    %442 = arith.mulf %422, %432 : vector<16x64xf32>
    %443 = arith.addf %441, %442 : vector<16x64xf32>
    %444 = math.tanh %443 : vector<16x64xf32>
    %445 = arith.mulf %440, %444 : vector<16x64xf32>
    %c32_219 = arith.constant 32 : index
    %c0_220 = arith.constant 0 : index
    %446 = vector.load %arg11[%c32_219, %c0_220] : memref<128x256xf32, #tpu.memory_space<vmem>>, vector<16x256xf32>
    %447 = arith.truncf %445 : vector<16x64xf32> to vector<16x64xbf16>
    %c0_221 = arith.constant 0 : index
    %c0_222 = arith.constant 0 : index
    %448 = vector.load %arg6[%c0_221, %c0_222] : memref<64x256xbf16, #tpu.memory_space<vmem>>, vector<64x256xbf16>
    %cst_223 = arith.constant dense<0.000000e+00> : vector<16x256xf32>
    %449 = tpu.matmul %447, %448, %cst_223 {dimension_numbers = #tpu.dot_dimension_numbers<[1], [0], [0], [1], [0, 0, 1, 1], [], []>} : vector<16x64xbf16>, vector<64x256xbf16>, vector<16x256xf32> -> vector<16x256xf32>
    %450 = arith.addf %446, %449 : vector<16x256xf32>
    %451 = vector.extract_strided_slice %450 {offsets = [0, 0], sizes = [16, 64], strides = [1, 1]} : vector<16x256xf32> to vector<16x64xf32>
    %cst_224 = arith.constant 5.000000e-01 : f32
    %452 = vector.broadcast %cst_224 : f32 to vector<16x64xf32>
    %453 = arith.mulf %452, %451 : vector<16x64xf32>
    %454 = math.tanh %453 : vector<16x64xf32>
    %cst_225 = arith.constant 5.000000e-01 : f32
    %455 = vector.broadcast %cst_225 : f32 to vector<16x64xf32>
    %456 = arith.mulf %455, %454 : vector<16x64xf32>
    %cst_226 = arith.constant 5.000000e-01 : f32
    %457 = vector.broadcast %cst_226 : f32 to vector<16x64xf32>
    %458 = arith.addf %456, %457 : vector<16x64xf32>
    %459 = vector.extract_strided_slice %450 {offsets = [0, 64], sizes = [16, 64], strides = [1, 1]} : vector<16x256xf32> to vector<16x64xf32>
    %cst_227 = arith.constant 5.000000e-01 : f32
    %460 = vector.broadcast %cst_227 : f32 to vector<16x64xf32>
    %461 = arith.mulf %460, %459 : vector<16x64xf32>
    %462 = math.tanh %461 : vector<16x64xf32>
    %cst_228 = arith.constant 5.000000e-01 : f32
    %463 = vector.broadcast %cst_228 : f32 to vector<16x64xf32>
    %464 = arith.mulf %463, %462 : vector<16x64xf32>
    %cst_229 = arith.constant 5.000000e-01 : f32
    %465 = vector.broadcast %cst_229 : f32 to vector<16x64xf32>
    %466 = arith.addf %464, %465 : vector<16x64xf32>
    %467 = vector.extract_strided_slice %450 {offsets = [0, 128], sizes = [16, 64], strides = [1, 1]} : vector<16x256xf32> to vector<16x64xf32>
    %468 = math.tanh %467 : vector<16x64xf32>
    %469 = vector.extract_strided_slice %450 {offsets = [0, 192], sizes = [16, 64], strides = [1, 1]} : vector<16x256xf32> to vector<16x64xf32>
    %cst_230 = arith.constant 5.000000e-01 : f32
    %470 = vector.broadcast %cst_230 : f32 to vector<16x64xf32>
    %471 = arith.mulf %470, %469 : vector<16x64xf32>
    %472 = math.tanh %471 : vector<16x64xf32>
    %cst_231 = arith.constant 5.000000e-01 : f32
    %473 = vector.broadcast %cst_231 : f32 to vector<16x64xf32>
    %474 = arith.mulf %473, %472 : vector<16x64xf32>
    %cst_232 = arith.constant 5.000000e-01 : f32
    %475 = vector.broadcast %cst_232 : f32 to vector<16x64xf32>
    %476 = arith.addf %474, %475 : vector<16x64xf32>
    %477 = arith.mulf %466, %443 : vector<16x64xf32>
    %478 = arith.mulf %458, %468 : vector<16x64xf32>
    %479 = arith.addf %477, %478 : vector<16x64xf32>
    %480 = math.tanh %479 : vector<16x64xf32>
    %481 = arith.mulf %476, %480 : vector<16x64xf32>
    %c48_233 = arith.constant 48 : index
    %c0_234 = arith.constant 0 : index
    %482 = vector.load %arg11[%c48_233, %c0_234] : memref<128x256xf32, #tpu.memory_space<vmem>>, vector<16x256xf32>
    %483 = arith.truncf %481 : vector<16x64xf32> to vector<16x64xbf16>
    %c0_235 = arith.constant 0 : index
    %c0_236 = arith.constant 0 : index
    %484 = vector.load %arg6[%c0_235, %c0_236] : memref<64x256xbf16, #tpu.memory_space<vmem>>, vector<64x256xbf16>
    %cst_237 = arith.constant dense<0.000000e+00> : vector<16x256xf32>
    %485 = tpu.matmul %483, %484, %cst_237 {dimension_numbers = #tpu.dot_dimension_numbers<[1], [0], [0], [1], [0, 0, 1, 1], [], []>} : vector<16x64xbf16>, vector<64x256xbf16>, vector<16x256xf32> -> vector<16x256xf32>
    %486 = arith.addf %482, %485 : vector<16x256xf32>
    %487 = vector.extract_strided_slice %486 {offsets = [0, 0], sizes = [16, 64], strides = [1, 1]} : vector<16x256xf32> to vector<16x64xf32>
    %cst_238 = arith.constant 5.000000e-01 : f32
    %488 = vector.broadcast %cst_238 : f32 to vector<16x64xf32>
    %489 = arith.mulf %488, %487 : vector<16x64xf32>
    %490 = math.tanh %489 : vector<16x64xf32>
    %cst_239 = arith.constant 5.000000e-01 : f32
    %491 = vector.broadcast %cst_239 : f32 to vector<16x64xf32>
    %492 = arith.mulf %491, %490 : vector<16x64xf32>
    %cst_240 = arith.constant 5.000000e-01 : f32
    %493 = vector.broadcast %cst_240 : f32 to vector<16x64xf32>
    %494 = arith.addf %492, %493 : vector<16x64xf32>
    %495 = vector.extract_strided_slice %486 {offsets = [0, 64], sizes = [16, 64], strides = [1, 1]} : vector<16x256xf32> to vector<16x64xf32>
    %cst_241 = arith.constant 5.000000e-01 : f32
    %496 = vector.broadcast %cst_241 : f32 to vector<16x64xf32>
    %497 = arith.mulf %496, %495 : vector<16x64xf32>
    %498 = math.tanh %497 : vector<16x64xf32>
    %cst_242 = arith.constant 5.000000e-01 : f32
    %499 = vector.broadcast %cst_242 : f32 to vector<16x64xf32>
    %500 = arith.mulf %499, %498 : vector<16x64xf32>
    %cst_243 = arith.constant 5.000000e-01 : f32
    %501 = vector.broadcast %cst_243 : f32 to vector<16x64xf32>
    %502 = arith.addf %500, %501 : vector<16x64xf32>
    %503 = vector.extract_strided_slice %486 {offsets = [0, 128], sizes = [16, 64], strides = [1, 1]} : vector<16x256xf32> to vector<16x64xf32>
    %504 = math.tanh %503 : vector<16x64xf32>
    %505 = vector.extract_strided_slice %486 {offsets = [0, 192], sizes = [16, 64], strides = [1, 1]} : vector<16x256xf32> to vector<16x64xf32>
    %cst_244 = arith.constant 5.000000e-01 : f32
    %506 = vector.broadcast %cst_244 : f32 to vector<16x64xf32>
    %507 = arith.mulf %506, %505 : vector<16x64xf32>
    %508 = math.tanh %507 : vector<16x64xf32>
    %cst_245 = arith.constant 5.000000e-01 : f32
    %509 = vector.broadcast %cst_245 : f32 to vector<16x64xf32>
    %510 = arith.mulf %509, %508 : vector<16x64xf32>
    %cst_246 = arith.constant 5.000000e-01 : f32
    %511 = vector.broadcast %cst_246 : f32 to vector<16x64xf32>
    %512 = arith.addf %510, %511 : vector<16x64xf32>
    %513 = arith.mulf %502, %479 : vector<16x64xf32>
    %514 = arith.mulf %494, %504 : vector<16x64xf32>
    %515 = arith.addf %513, %514 : vector<16x64xf32>
    %516 = math.tanh %515 : vector<16x64xf32>
    %517 = arith.mulf %512, %516 : vector<16x64xf32>
    %c64_247 = arith.constant 64 : index
    %c0_248 = arith.constant 0 : index
    %518 = vector.load %arg11[%c64_247, %c0_248] : memref<128x256xf32, #tpu.memory_space<vmem>>, vector<16x256xf32>
    %519 = arith.truncf %517 : vector<16x64xf32> to vector<16x64xbf16>
    %c0_249 = arith.constant 0 : index
    %c0_250 = arith.constant 0 : index
    %520 = vector.load %arg6[%c0_249, %c0_250] : memref<64x256xbf16, #tpu.memory_space<vmem>>, vector<64x256xbf16>
    %cst_251 = arith.constant dense<0.000000e+00> : vector<16x256xf32>
    %521 = tpu.matmul %519, %520, %cst_251 {dimension_numbers = #tpu.dot_dimension_numbers<[1], [0], [0], [1], [0, 0, 1, 1], [], []>} : vector<16x64xbf16>, vector<64x256xbf16>, vector<16x256xf32> -> vector<16x256xf32>
    %522 = arith.addf %518, %521 : vector<16x256xf32>
    %523 = vector.extract_strided_slice %522 {offsets = [0, 0], sizes = [16, 64], strides = [1, 1]} : vector<16x256xf32> to vector<16x64xf32>
    %cst_252 = arith.constant 5.000000e-01 : f32
    %524 = vector.broadcast %cst_252 : f32 to vector<16x64xf32>
    %525 = arith.mulf %524, %523 : vector<16x64xf32>
    %526 = math.tanh %525 : vector<16x64xf32>
    %cst_253 = arith.constant 5.000000e-01 : f32
    %527 = vector.broadcast %cst_253 : f32 to vector<16x64xf32>
    %528 = arith.mulf %527, %526 : vector<16x64xf32>
    %cst_254 = arith.constant 5.000000e-01 : f32
    %529 = vector.broadcast %cst_254 : f32 to vector<16x64xf32>
    %530 = arith.addf %528, %529 : vector<16x64xf32>
    %531 = vector.extract_strided_slice %522 {offsets = [0, 64], sizes = [16, 64], strides = [1, 1]} : vector<16x256xf32> to vector<16x64xf32>
    %cst_255 = arith.constant 5.000000e-01 : f32
    %532 = vector.broadcast %cst_255 : f32 to vector<16x64xf32>
    %533 = arith.mulf %532, %531 : vector<16x64xf32>
    %534 = math.tanh %533 : vector<16x64xf32>
    %cst_256 = arith.constant 5.000000e-01 : f32
    %535 = vector.broadcast %cst_256 : f32 to vector<16x64xf32>
    %536 = arith.mulf %535, %534 : vector<16x64xf32>
    %cst_257 = arith.constant 5.000000e-01 : f32
    %537 = vector.broadcast %cst_257 : f32 to vector<16x64xf32>
    %538 = arith.addf %536, %537 : vector<16x64xf32>
    %539 = vector.extract_strided_slice %522 {offsets = [0, 128], sizes = [16, 64], strides = [1, 1]} : vector<16x256xf32> to vector<16x64xf32>
    %540 = math.tanh %539 : vector<16x64xf32>
    %541 = vector.extract_strided_slice %522 {offsets = [0, 192], sizes = [16, 64], strides = [1, 1]} : vector<16x256xf32> to vector<16x64xf32>
    %cst_258 = arith.constant 5.000000e-01 : f32
    %542 = vector.broadcast %cst_258 : f32 to vector<16x64xf32>
    %543 = arith.mulf %542, %541 : vector<16x64xf32>
    %544 = math.tanh %543 : vector<16x64xf32>
    %cst_259 = arith.constant 5.000000e-01 : f32
    %545 = vector.broadcast %cst_259 : f32 to vector<16x64xf32>
    %546 = arith.mulf %545, %544 : vector<16x64xf32>
    %cst_260 = arith.constant 5.000000e-01 : f32
    %547 = vector.broadcast %cst_260 : f32 to vector<16x64xf32>
    %548 = arith.addf %546, %547 : vector<16x64xf32>
    %549 = arith.mulf %538, %515 : vector<16x64xf32>
    %550 = arith.mulf %530, %540 : vector<16x64xf32>
    %551 = arith.addf %549, %550 : vector<16x64xf32>
    %552 = math.tanh %551 : vector<16x64xf32>
    %553 = arith.mulf %548, %552 : vector<16x64xf32>
    %c80_261 = arith.constant 80 : index
    %c0_262 = arith.constant 0 : index
    %554 = vector.load %arg11[%c80_261, %c0_262] : memref<128x256xf32, #tpu.memory_space<vmem>>, vector<16x256xf32>
    %555 = arith.truncf %553 : vector<16x64xf32> to vector<16x64xbf16>
    %c0_263 = arith.constant 0 : index
    %c0_264 = arith.constant 0 : index
    %556 = vector.load %arg6[%c0_263, %c0_264] : memref<64x256xbf16, #tpu.memory_space<vmem>>, vector<64x256xbf16>
    %cst_265 = arith.constant dense<0.000000e+00> : vector<16x256xf32>
    %557 = tpu.matmul %555, %556, %cst_265 {dimension_numbers = #tpu.dot_dimension_numbers<[1], [0], [0], [1], [0, 0, 1, 1], [], []>} : vector<16x64xbf16>, vector<64x256xbf16>, vector<16x256xf32> -> vector<16x256xf32>
    %558 = arith.addf %554, %557 : vector<16x256xf32>
    %559 = vector.extract_strided_slice %558 {offsets = [0, 0], sizes = [16, 64], strides = [1, 1]} : vector<16x256xf32> to vector<16x64xf32>
    %cst_266 = arith.constant 5.000000e-01 : f32
    %560 = vector.broadcast %cst_266 : f32 to vector<16x64xf32>
    %561 = arith.mulf %560, %559 : vector<16x64xf32>
    %562 = math.tanh %561 : vector<16x64xf32>
    %cst_267 = arith.constant 5.000000e-01 : f32
    %563 = vector.broadcast %cst_267 : f32 to vector<16x64xf32>
    %564 = arith.mulf %563, %562 : vector<16x64xf32>
    %cst_268 = arith.constant 5.000000e-01 : f32
    %565 = vector.broadcast %cst_268 : f32 to vector<16x64xf32>
    %566 = arith.addf %564, %565 : vector<16x64xf32>
    %567 = vector.extract_strided_slice %558 {offsets = [0, 64], sizes = [16, 64], strides = [1, 1]} : vector<16x256xf32> to vector<16x64xf32>
    %cst_269 = arith.constant 5.000000e-01 : f32
    %568 = vector.broadcast %cst_269 : f32 to vector<16x64xf32>
    %569 = arith.mulf %568, %567 : vector<16x64xf32>
    %570 = math.tanh %569 : vector<16x64xf32>
    %cst_270 = arith.constant 5.000000e-01 : f32
    %571 = vector.broadcast %cst_270 : f32 to vector<16x64xf32>
    %572 = arith.mulf %571, %570 : vector<16x64xf32>
    %cst_271 = arith.constant 5.000000e-01 : f32
    %573 = vector.broadcast %cst_271 : f32 to vector<16x64xf32>
    %574 = arith.addf %572, %573 : vector<16x64xf32>
    %575 = vector.extract_strided_slice %558 {offsets = [0, 128], sizes = [16, 64], strides = [1, 1]} : vector<16x256xf32> to vector<16x64xf32>
    %576 = math.tanh %575 : vector<16x64xf32>
    %577 = vector.extract_strided_slice %558 {offsets = [0, 192], sizes = [16, 64], strides = [1, 1]} : vector<16x256xf32> to vector<16x64xf32>
    %cst_272 = arith.constant 5.000000e-01 : f32
    %578 = vector.broadcast %cst_272 : f32 to vector<16x64xf32>
    %579 = arith.mulf %578, %577 : vector<16x64xf32>
    %580 = math.tanh %579 : vector<16x64xf32>
    %cst_273 = arith.constant 5.000000e-01 : f32
    %581 = vector.broadcast %cst_273 : f32 to vector<16x64xf32>
    %582 = arith.mulf %581, %580 : vector<16x64xf32>
    %cst_274 = arith.constant 5.000000e-01 : f32
    %583 = vector.broadcast %cst_274 : f32 to vector<16x64xf32>
    %584 = arith.addf %582, %583 : vector<16x64xf32>
    %585 = arith.mulf %574, %551 : vector<16x64xf32>
    %586 = arith.mulf %566, %576 : vector<16x64xf32>
    %587 = arith.addf %585, %586 : vector<16x64xf32>
    %588 = math.tanh %587 : vector<16x64xf32>
    %589 = arith.mulf %584, %588 : vector<16x64xf32>
    %c96_275 = arith.constant 96 : index
    %c0_276 = arith.constant 0 : index
    %590 = vector.load %arg11[%c96_275, %c0_276] : memref<128x256xf32, #tpu.memory_space<vmem>>, vector<16x256xf32>
    %591 = arith.truncf %589 : vector<16x64xf32> to vector<16x64xbf16>
    %c0_277 = arith.constant 0 : index
    %c0_278 = arith.constant 0 : index
    %592 = vector.load %arg6[%c0_277, %c0_278] : memref<64x256xbf16, #tpu.memory_space<vmem>>, vector<64x256xbf16>
    %cst_279 = arith.constant dense<0.000000e+00> : vector<16x256xf32>
    %593 = tpu.matmul %591, %592, %cst_279 {dimension_numbers = #tpu.dot_dimension_numbers<[1], [0], [0], [1], [0, 0, 1, 1], [], []>} : vector<16x64xbf16>, vector<64x256xbf16>, vector<16x256xf32> -> vector<16x256xf32>
    %594 = arith.addf %590, %593 : vector<16x256xf32>
    %595 = vector.extract_strided_slice %594 {offsets = [0, 0], sizes = [16, 64], strides = [1, 1]} : vector<16x256xf32> to vector<16x64xf32>
    %cst_280 = arith.constant 5.000000e-01 : f32
    %596 = vector.broadcast %cst_280 : f32 to vector<16x64xf32>
    %597 = arith.mulf %596, %595 : vector<16x64xf32>
    %598 = math.tanh %597 : vector<16x64xf32>
    %cst_281 = arith.constant 5.000000e-01 : f32
    %599 = vector.broadcast %cst_281 : f32 to vector<16x64xf32>
    %600 = arith.mulf %599, %598 : vector<16x64xf32>
    %cst_282 = arith.constant 5.000000e-01 : f32
    %601 = vector.broadcast %cst_282 : f32 to vector<16x64xf32>
    %602 = arith.addf %600, %601 : vector<16x64xf32>
    %603 = vector.extract_strided_slice %594 {offsets = [0, 64], sizes = [16, 64], strides = [1, 1]} : vector<16x256xf32> to vector<16x64xf32>
    %cst_283 = arith.constant 5.000000e-01 : f32
    %604 = vector.broadcast %cst_283 : f32 to vector<16x64xf32>
    %605 = arith.mulf %604, %603 : vector<16x64xf32>
    %606 = math.tanh %605 : vector<16x64xf32>
    %cst_284 = arith.constant 5.000000e-01 : f32
    %607 = vector.broadcast %cst_284 : f32 to vector<16x64xf32>
    %608 = arith.mulf %607, %606 : vector<16x64xf32>
    %cst_285 = arith.constant 5.000000e-01 : f32
    %609 = vector.broadcast %cst_285 : f32 to vector<16x64xf32>
    %610 = arith.addf %608, %609 : vector<16x64xf32>
    %611 = vector.extract_strided_slice %594 {offsets = [0, 128], sizes = [16, 64], strides = [1, 1]} : vector<16x256xf32> to vector<16x64xf32>
    %612 = math.tanh %611 : vector<16x64xf32>
    %613 = vector.extract_strided_slice %594 {offsets = [0, 192], sizes = [16, 64], strides = [1, 1]} : vector<16x256xf32> to vector<16x64xf32>
    %cst_286 = arith.constant 5.000000e-01 : f32
    %614 = vector.broadcast %cst_286 : f32 to vector<16x64xf32>
    %615 = arith.mulf %614, %613 : vector<16x64xf32>
    %616 = math.tanh %615 : vector<16x64xf32>
    %cst_287 = arith.constant 5.000000e-01 : f32
    %617 = vector.broadcast %cst_287 : f32 to vector<16x64xf32>
    %618 = arith.mulf %617, %616 : vector<16x64xf32>
    %cst_288 = arith.constant 5.000000e-01 : f32
    %619 = vector.broadcast %cst_288 : f32 to vector<16x64xf32>
    %620 = arith.addf %618, %619 : vector<16x64xf32>
    %621 = arith.mulf %610, %587 : vector<16x64xf32>
    %622 = arith.mulf %602, %612 : vector<16x64xf32>
    %623 = arith.addf %621, %622 : vector<16x64xf32>
    %624 = math.tanh %623 : vector<16x64xf32>
    %625 = arith.mulf %620, %624 : vector<16x64xf32>
    %c112_289 = arith.constant 112 : index
    %c0_290 = arith.constant 0 : index
    %626 = vector.load %arg11[%c112_289, %c0_290] : memref<128x256xf32, #tpu.memory_space<vmem>>, vector<16x256xf32>
    %627 = arith.truncf %625 : vector<16x64xf32> to vector<16x64xbf16>
    %c0_291 = arith.constant 0 : index
    %c0_292 = arith.constant 0 : index
    %628 = vector.load %arg6[%c0_291, %c0_292] : memref<64x256xbf16, #tpu.memory_space<vmem>>, vector<64x256xbf16>
    %cst_293 = arith.constant dense<0.000000e+00> : vector<16x256xf32>
    %629 = tpu.matmul %627, %628, %cst_293 {dimension_numbers = #tpu.dot_dimension_numbers<[1], [0], [0], [1], [0, 0, 1, 1], [], []>} : vector<16x64xbf16>, vector<64x256xbf16>, vector<16x256xf32> -> vector<16x256xf32>
    %630 = arith.addf %626, %629 : vector<16x256xf32>
    %631 = vector.extract_strided_slice %630 {offsets = [0, 0], sizes = [16, 64], strides = [1, 1]} : vector<16x256xf32> to vector<16x64xf32>
    %cst_294 = arith.constant 5.000000e-01 : f32
    %632 = vector.broadcast %cst_294 : f32 to vector<16x64xf32>
    %633 = arith.mulf %632, %631 : vector<16x64xf32>
    %634 = math.tanh %633 : vector<16x64xf32>
    %cst_295 = arith.constant 5.000000e-01 : f32
    %635 = vector.broadcast %cst_295 : f32 to vector<16x64xf32>
    %636 = arith.mulf %635, %634 : vector<16x64xf32>
    %cst_296 = arith.constant 5.000000e-01 : f32
    %637 = vector.broadcast %cst_296 : f32 to vector<16x64xf32>
    %638 = arith.addf %636, %637 : vector<16x64xf32>
    %639 = vector.extract_strided_slice %630 {offsets = [0, 64], sizes = [16, 64], strides = [1, 1]} : vector<16x256xf32> to vector<16x64xf32>
    %cst_297 = arith.constant 5.000000e-01 : f32
    %640 = vector.broadcast %cst_297 : f32 to vector<16x64xf32>
    %641 = arith.mulf %640, %639 : vector<16x64xf32>
    %642 = math.tanh %641 : vector<16x64xf32>
    %cst_298 = arith.constant 5.000000e-01 : f32
    %643 = vector.broadcast %cst_298 : f32 to vector<16x64xf32>
    %644 = arith.mulf %643, %642 : vector<16x64xf32>
    %cst_299 = arith.constant 5.000000e-01 : f32
    %645 = vector.broadcast %cst_299 : f32 to vector<16x64xf32>
    %646 = arith.addf %644, %645 : vector<16x64xf32>
    %647 = vector.extract_strided_slice %630 {offsets = [0, 128], sizes = [16, 64], strides = [1, 1]} : vector<16x256xf32> to vector<16x64xf32>
    %648 = math.tanh %647 : vector<16x64xf32>
    %649 = vector.extract_strided_slice %630 {offsets = [0, 192], sizes = [16, 64], strides = [1, 1]} : vector<16x256xf32> to vector<16x64xf32>
    %cst_300 = arith.constant 5.000000e-01 : f32
    %650 = vector.broadcast %cst_300 : f32 to vector<16x64xf32>
    %651 = arith.mulf %650, %649 : vector<16x64xf32>
    %652 = math.tanh %651 : vector<16x64xf32>
    %cst_301 = arith.constant 5.000000e-01 : f32
    %653 = vector.broadcast %cst_301 : f32 to vector<16x64xf32>
    %654 = arith.mulf %653, %652 : vector<16x64xf32>
    %cst_302 = arith.constant 5.000000e-01 : f32
    %655 = vector.broadcast %cst_302 : f32 to vector<16x64xf32>
    %656 = arith.addf %654, %655 : vector<16x64xf32>
    %657 = arith.mulf %646, %623 : vector<16x64xf32>
    %658 = arith.mulf %638, %648 : vector<16x64xf32>
    %659 = arith.addf %657, %658 : vector<16x64xf32>
    %660 = math.tanh %659 : vector<16x64xf32>
    %661 = arith.mulf %656, %660 : vector<16x64xf32>
    %c0_303 = arith.constant 0 : index
    %c0_304 = arith.constant 0 : index
    %662 = vector.load %arg8[%c0_303, %c0_304] : memref<64x128xf32, #tpu.memory_space<vmem>>, vector<64x128xf32>
    %cst_305 = arith.constant dense<0.000000e+00> : vector<16x128xf32>
    %663 = tpu.matmul %661, %662, %cst_305 {dimension_numbers = #tpu.dot_dimension_numbers<[1], [0], [0], [1], [0, 0, 1, 1], [], []>} : vector<16x64xf32>, vector<64x128xf32>, vector<16x128xf32> -> vector<16x128xf32>
    %c0_306 = arith.constant 0 : index
    %c0_307 = arith.constant 0 : index
    %664 = vector.load %arg9[%c0_306, %c0_307] : memref<1x128xf32, #tpu.memory_space<vmem>>, vector<1x128xf32>
    %665 = vector.broadcast %664 : vector<1x128xf32> to vector<16x128xf32>
    %666 = arith.addf %663, %665 : vector<16x128xf32>
    %c0_308 = arith.constant 0 : index
    %c0_309 = arith.constant 0 : index
    %667 = vector.load %arg10[%c0_308, %c0_309] : memref<16x128xf32, #tpu.memory_space<vmem>>, vector<16x128xf32>
    tpu.vector_store %arg10[%c0_308, %c0_309], %666 {strides = array<i32>} : memref<16x128xf32, #tpu.memory_space<vmem>>, vector<16x128xf32>,
    return
  }
  func.func @transform_0(%arg0: i32) -> (i32, i32, i32) {
    %c0_i32 = arith.constant 0 : i32
    %c0_i32_0 = arith.constant 0 : i32
    %c0_i32_1 = arith.constant 0 : i32
    return %c0_i32, %arg0, %c0_i32_0 : i32, i32, i32
  }
  func.func @transform_1(%arg0: i32) -> (i32, i32) {
    %c0_i32 = arith.constant 0 : i32
    %c0_i32_0 = arith.constant 0 : i32
    %c0_i32_1 = arith.constant 0 : i32
    return %c0_i32, %c0_i32_0 : i32, i32
  }
  func.func @transform_2(%arg0: i32) -> (i32, i32) {
    %c0_i32 = arith.constant 0 : i32
    %c0_i32_0 = arith.constant 0 : i32
    %c0_i32_1 = arith.constant 0 : i32
    return %c0_i32, %c0_i32_0 : i32, i32
  }
  func.func @transform_3(%arg0: i32) -> (i32, i32) {
    %c0_i32 = arith.constant 0 : i32
    %c0_i32_0 = arith.constant 0 : i32
    %c0_i32_1 = arith.constant 0 : i32
    return %c0_i32, %c0_i32_0 : i32, i32
  }
  func.func @transform_4(%arg0: i32) -> (i32, i32) {
    %c0_i32 = arith.constant 0 : i32
    %c0_i32_0 = arith.constant 0 : i32
    %c0_i32_1 = arith.constant 0 : i32
    return %c0_i32, %c0_i32_0 : i32, i32
  }
  func.func @transform_5(%arg0: i32) -> (i32, i32) {
    %c0_i32 = arith.constant 0 : i32
    %c0_i32_0 = arith.constant 0 : i32
    %c0_i32_1 = arith.constant 0 : i32
    return %c0_i32, %c0_i32_0 : i32, i32
  }
  func.func @transform_6(%arg0: i32) -> (i32, i32) {
    %c0_i32 = arith.constant 0 : i32
    %c0_i32_0 = arith.constant 0 : i32
    %c0_i32_1 = arith.constant 0 : i32
    return %c0_i32, %c0_i32_0 : i32, i32
  }
  func.func @transform_7(%arg0: i32) -> (i32, i32) {
    %c0_i32 = arith.constant 0 : i32
    %c0_i32_0 = arith.constant 0 : i32
    %c0_i32_1 = arith.constant 0 : i32
    return %c0_i32, %c0_i32_0 : i32, i32
  }
  func.func @transform_8(%arg0: i32) -> (i32, i32) {
    %c0_i32 = arith.constant 0 : i32
    %c0_i32_0 = arith.constant 0 : i32
    %c0_i32_1 = arith.constant 0 : i32
    return %c0_i32, %c0_i32_0 : i32, i32
  }
  func.func @transform_9(%arg0: i32) -> (i32, i32) {
    %c0_i32 = arith.constant 0 : i32
    %c0_i32_0 = arith.constant 0 : i32
    return %arg0, %c0_i32 : i32, i32
  }
}

</mosaic_0001>

<bundles_post_ra>
// kernel: lstm_forward.1
= control target key start
LH: loop header
LB: loop body
LE: loop exit
PB: predicated region body
PF: predicated region fallthrough
CT: control target
= control target key end

     0   :  { %14 = vsyncpa [#allocation5], 0  ;;  %s4587_s0 = inlined_call_operand.vmem [shape: f32[8,16,6], index: 0, kind: input, shape index: {}]   ;;  %s4588_s1 = inlined_call_operand.vmem [shape: bf16[6,256], index: 1, kind: input, shape index: {}]   ;;  %s4589_s2 = inlined_call_operand.vmem [shape: bf16[64,256], index: 2, kind: input, shape index: {}]   ;;  %s4590_s3 = inlined_call_operand.vmem [shape: f32[1,256], index: 3, kind: input, shape index: {}]   ;;  %s4591_s4 = inlined_call_operand.vmem [shape: bf16[64,256], index: 4, kind: input, shape index: {}]   ;;  %s4592_s5 = inlined_call_operand.hbm [shape: bf16[64,256], index: 5, kind: input, shape index: {}]   ;;  %s4593_s6 = inlined_call_operand.vmem [shape: f32[1,256], index: 6, kind: input, shape index: {}]   ;;  %s4594_s7 = inlined_call_operand.hbm [shape: f32[64,128], index: 7, kind: input, shape index: {}]   ;;  %s4595_s8 = inlined_call_operand.vmem [shape: f32[1,128], index: 8, kind: input, shape index: {}]   ;;  %s4596_s9 = inlined_call_operand.vmem [shape: f32[16,128], index: 9, kind: output, shape index: {}]  }
   0x1   :  { %s30_s11 = sshll.u32 %s4592_s5, 4  ;;  %s31_s11 = int_to_ptr.hbm [resolvable:$true] %s30_s11 }
   0x2   :  { %15 = vsyncpa [#allocation7], 0  ;;  %s3426_s12 = smov [#allocation4]   ;;  %s45_s16 = sshll.u32 %s4594_s7, 4  ;;  %s46_s16 = int_to_ptr.hbm [resolvable:$true] %s45_s16 }
   0x3   :  { %s32_s13 = sshll.u32 %s3426_s12, 4  ;;  %s3427_s17 = smov 128   ;;  %s33_s13 = int_to_ptr.vmem [resolvable:$true] %s32_s13 }
   0x4   :  { %s3428_s18 = smov 8   ;;  %s3429_s19 = smov [#allocation6]  }
   0x5   :  { %38 = dma.hbm_to_vmem [thread:$0]  %s31_s11, 1024, %s33_s13, [#allocation5], %s3427_s17, %s3427_s17, %s3428_s18  }
   0x6   :  { %s47_s20 = sshll.u32 %s3429_s19, 4  ;;  %s48_s20 = int_to_ptr.vmem [resolvable:$true] %s47_s20 }
   0x7   :  { %53 = dma.hbm_to_vmem [thread:$0]  %s46_s16, 1024, %s48_s20, [#allocation7], %s3427_s17, %s3427_s17, %s3428_s18  }
   0x8   :  { %3422 = dma.done.wait [#allocation5], 1024  }
   0x9   :  { %3423 = vsyncadd [#allocation5], 4294966272 }
   0xa   :  { %3424 = dma.done.wait [#allocation7], 1024  }
   0xb   :  { %3425 = vsyncadd [#allocation7], 4294966272  ;;  %v74_v0 = vld [vmem:[%s4588_s1] sm:$0x77]  ;;  %v72_v4 = vld [vmem:[%s4587_s0 + $0x8] sm:$0xff]  ;;  %vm84_vm0 = vcmask 1042432  }
   0xc   :  { %v76_v1 = vunpack.c.l.b16 %v74_v0  ;;  %v77_v2 = vunpack.c.h.b16 %v74_v0  ;;  %v71_v3 = vld [vmem:[%s4587_s0] sm:$0xff]  ;;  %vm80_vm1 = vcmask 48128   ;;  %v2594_v28 = vld [vmem:[%s4587_s0 + $0x28] sm:$0xff]  ;;  %v2643_v36 = vld [vmem:[%s4589_s2 + $0x30] sm:$0xf]  ;;  %v3430_v0 = vmov 0  }
   0xd   :  { %v178_v5 = vld [vmem:[%s4588_s1] sm:$0x77]  ;;  %v73_v13 = vpack.c.bf16 %v72_v4, %v71_v3  ;;  %v2602_v35 = vld [vmem:[%s4587_s0 + $0x48] sm:$0xff]  ;;  %v3022_v37 = vld [vmem:[%s4589_s2 + $0x34] sm:$0xf0]  ;;  %vm532_vm2 = vcmask 523264  }
   0xe   :  { %v180_v6 = vunpack.c.l.b16 %v178_v5  ;;  %v181_v7 = vunpack.c.h.b16 %v178_v5  ;;  %v280_v8 = vld [vmem:[%s4588_s1] sm:$0x77]  ;;  %v78_v9 = vpack.c.b16 %v76_v1, %v76_v1  ;;  %v79_v10 = vpack.c.b16 %v77_v2, %v77_v2  ;;  %v3021_v38 = vld [vmem:[%s4589_s2 + $0x34] sm:$0xf]  ;;  %v2645_v39 = vld [vmem:[%s4589_s2 + $0x38] sm:$0xf0] }
   0xf   :  { %v282_v11 = vunpack.c.l.b16 %v280_v8  ;;  %v283_v12 = vunpack.c.h.b16 %v280_v8  ;;  %v382_v24 = vld [vmem:[%s4588_s1] sm:$0x77]  ;;  %v2644_v41 = vor.u32 %v3022_v37, %v2643_v36  ;;  %v2648_v42 = vor.u32 %v3021_v38, %v2645_v39  ;;  %v3020_v44 = vld [vmem:[%s4589_s2 + $0x24] sm:$0xf0]  ;;  %v2637_v46 = vld [vmem:[%s4589_s2 + $0x28] sm:$0xf0] }
  0x10   :  { %v182_v14 = vpack.c.b16 %v180_v6, %v180_v6  ;;  %v183_v15 = vpack.c.b16 %v181_v7, %v181_v7  ;;  %v86_v16 = vsel %vm84_vm0, %v78_v9, 0  ;;  %v89_v17 = vsel %vm84_vm0, %v79_v10, 0  ;;  %v2593_v27 = vld [vmem:[%s4587_s0 + $0x20] sm:$0xff]  ;;  %v2627_v49 = vld [vmem:[%s4589_s2 + $0x10] sm:$0xf]  ;;  %v2610_v60 = vld [vmem:[%s4587_s0 + $0x68] sm:$0xff] }
  0x11   :  { %v284_v18 = vpack.c.b16 %v282_v11, %v282_v11  ;;  %v285_v19 = vpack.c.b16 %v283_v12, %v283_v12  ;;  %98 = vmatpush.bf16.msra.mxu0 %v86_v16  ;;  %112 = vmatpush.bf16.msra.mxu1 %v89_v17  ;;  %v384_v25 = vunpack.c.l.b16 %v382_v24  ;;  %v385_v26 = vunpack.c.h.b16 %v382_v24  ;;  %v2601_v34 = vld [vmem:[%s4587_s0 + $0x40] sm:$0xff]  ;;  %v3018_v50 = vld [vmem:[%s4589_s2 + $0x14] sm:$0xf0]  ;;  %v3017_v51 = vld [vmem:[%s4589_s2 + $0x14] sm:$0xf] }
  0x12   :  { %v188_v20 = vsel %vm84_vm0, %v182_v14, 0  ;;  %v191_v21 = vsel %vm84_vm0, %v183_v15, 0  ;;  %v177_v31 = vpack.c.bf16 %v2594_v28, %v2593_v27  ;;  %v279_v40 = vpack.c.bf16 %v2602_v35, %v2601_v34  ;;  %v2635_v43 = vld [vmem:[%s4589_s2 + $0x20] sm:$0xf]  ;;  %v3019_v45 = vld [vmem:[%s4589_s2 + $0x24] sm:$0xf] }
  0x13   :  { %v290_v22 = vsel %vm84_vm0, %v284_v18, 0  ;;  %v293_v23 = vsel %vm84_vm0, %v285_v19, 0  ;;  %v386_v29 = vpack.c.b16 %v384_v25, %v384_v25  ;;  %v387_v30 = vpack.c.b16 %v385_v26, %v385_v26  ;;  %v2629_v52 = vld [vmem:[%s4589_s2 + $0x18] sm:$0xf0]  ;;  %v2619_v55 = vld [vmem:[%s4589_s2] sm:$0xf] }
  0x14   :  { %2587 = vmatmul.msk.bf16.vlgmr.msra.gmra.mxu0 %vm80_vm1, %v73_v13  ;;  %2588 = vmatmul.msk.bf16.vlgmr.msra.gmra.mxu1 %vm80_vm1, %v73_v13  ;;  %v2636_v47 = vor.u32 %v3020_v44, %v2635_v43  ;;  %v2640_v48 = vor.u32 %v3019_v45, %v2637_v46  ;;  %v2628_v53 = vor.u32 %v3018_v50, %v2627_v49  ;;  %v3016_v56 = vld [vmem:[%s4589_s2 + $0x4] sm:$0xf0]  ;;  %v3015_v57 = vld [vmem:[%s4589_s2 + $0x4] sm:$0xf]  ;;  %v2621_v58 = vld [vmem:[%s4589_s2 + $0x8] sm:$0xf0] }
  0x15   :  { %200 = vmatpush.bf16.msrb.mxu0 %v188_v20  ;;  %214 = vmatpush.bf16.msrb.mxu1 %v191_v21  ;;  %v392_v32 = vsel %vm84_vm0, %v386_v29, 0  ;;  %v395_v33 = vsel %vm84_vm0, %v387_v30, 0  ;;  %v2632_v54 = vor.u32 %v3017_v51, %v2629_v52  ;;  %v2609_v59 = vld [vmem:[%s4587_s0 + $0x60] sm:$0xff]  ;;  %v2620_v61 = vor.u32 %v3016_v56, %v2619_v55 }
  0x16   :  { %v2624_v62 = vor.u32 %v3015_v57, %v2621_v58  ;;  %v381_v63 = vpack.c.bf16 %v2610_v60, %v2609_v59  ;;  %v65_v15 = vld [vmem:[%s4590_s3] sm:$0x3]  ;;  %s3431_s3 = smov 64   ;;  %vm614_vm3 = vcmask 519168  }
  0x17   :  { %v3617_v18 = vperm.slane %v65_v15, 0  ;;  %v3620_v20 = vperm.slane %v65_v15, 1  ;;  %v127_v45 = vld [vmem:[%s4588_s1] sm:$0x77] }
  0x18   :  { %v129_v46 = vunpack.c.l.b16 %v127_v45  ;;  %v130_v49 = vunpack.c.h.b16 %v127_v45  ;;  %v229_v50 = vld [vmem:[%s4588_s1] sm:$0x77] }
  0x19   :  { %302 = vmatpush.bf16.msra.mxu0 %v290_v22  ;;  %316 = vmatpush.bf16.msra.mxu1 %v293_v23  ;;  %v231_v52 = vunpack.c.l.b16 %v229_v50 }
  0x1a   :  { %v131_v55 = vpack.c.b16 %v129_v46, %v129_v46  ;;  %v132_v56 = vpack.c.b16 %v130_v49, %v130_v49 }
  0x24   :  { %2595 = vmatmul.msk.bf16.vlgmr.msrb.gmra.mxu0 %vm80_vm1, %v177_v31  ;;  %2596 = vmatmul.msk.bf16.vlgmr.msrb.gmra.mxu1 %vm80_vm1, %v177_v31 }
  0x25   :  { %404 = vmatpush.bf16.msrb.mxu0 %v392_v32  ;;  %418 = vmatpush.bf16.msrb.mxu1 %v395_v33 }
  0x34   :  { %2603 = vmatmul.msk.bf16.vlgmr.msra.gmra.mxu0 %vm80_vm1, %v279_v40  ;;  %2604 = vmatmul.msk.bf16.vlgmr.msra.gmra.mxu1 %vm80_vm1, %v279_v40 }
  0x35   :  { %540 = vmatpush.bf16.msra.mxu0 %v2644_v41  ;;  %554 = vmatpush.bf16.msra.mxu1 %v2648_v42 }
  0x39   :  { %541 = vmatpush.bf16.msra.mxu0 %v2636_v47  ;;  %555 = vmatpush.bf16.msra.mxu1 %v2640_v48  ;;  %v2589_v47 = vld [vmem:[%s4587_s0 + $0x10] sm:$0xff]  ;;  %v2590_v48 = vld [vmem:[%s4587_s0 + $0x18] sm:$0xff] }
  0x3a   :  { %v126_v60 = vpack.c.bf16 %v2590_v48, %v2589_v47 }
  0x3d   :  { %542 = vmatpush.bf16.msra.mxu0 %v2628_v53  ;;  %556 = vmatpush.bf16.msra.mxu1 %v2632_v54  ;;  %v232_v53 = vunpack.c.h.b16 %v229_v50  ;;  %v331_v54 = vld [vmem:[%s4588_s1] sm:$0x77] }
  0x3e   :  { %v333_v57 = vunpack.c.l.b16 %v331_v54  ;;  %v334_v58 = vunpack.c.h.b16 %v331_v54  ;;  %v2675_v54 = vld [vmem:[%s4589_s2 + $0x30] sm:$0xf] }
  0x41   :  { %543 = vmatpush.bf16.msra.mxu0 %v2620_v61  ;;  %557 = vmatpush.bf16.msra.mxu1 %v2624_v62  ;;  %v233_v61 = vpack.c.b16 %v231_v52, %v231_v52  ;;  %v234_v62 = vpack.c.b16 %v232_v53, %v232_v53  ;;  %v2605_v52 = vld [vmem:[%s4587_s0 + $0x50] sm:$0xff]  ;;  %v2606_v53 = vld [vmem:[%s4587_s0 + $0x58] sm:$0xff] }
  0x43   :  { %v239_v15 = vsel %vm84_vm0, %v233_v61, 0  ;;  %v2667_v61 = vld [vmem:[%s4589_s2 + $0x20] sm:$0xf] }
  0x44   :  { %2611 = vmatmul.msk.bf16.vlgmr.msrb.gmra.mxu0 %vm80_vm1, %v381_v63  ;;  %2612 = vmatmul.msk.bf16.vlgmr.msrb.gmra.mxu1 %vm80_vm1, %v381_v63  ;;  %v137_v63 = vsel %vm84_vm0, %v131_v55, 0  ;;  %v3030_v55 = vld [vmem:[%s4589_s2 + $0x34] sm:$0xf0] }
  0x45   :  { %149 = vmatpush.bf16.msra.mxu2 %v137_v63  ;;  %v3027_v63 = vld [vmem:[%s4589_s2 + $0x24] sm:$0xf] }
  0x48   :  { %2591 = vmatmul.msk.bf16.vlgmr.msra.gmra.mxu2 %vm80_vm1, %v126_v60 }
  0x49   :  { %251 = vmatpush.bf16.msrb.mxu2 %v239_v15  ;;  %v3026_v15 = vld [vmem:[%s4589_s2 + $0x14] sm:$0xf0] }
  0x54   :  { %544 = vmatmul.bf16.vlgmr.msra.gmra.mxu0 %v3430_v0  ;;  %558 = vmatmul.bf16.vlgmr.msra.gmra.mxu1 %v3430_v0 }
  0x91   :  { %v100_v1 = vpop.f32.mrf.mxu0  ;;  %v114_v2 = vpop.f32.mrf.mxu1 }
  0x92   :  { %v101_v19 = vadd.f32 %v100_v1, %v3617_v18  ;;  %v115_v24 = vadd.f32 %v114_v2, %v3620_v20  ;;  %v140_v1 = vsel %vm84_vm0, %v132_v56, 0  ;;  %v335_v2 = vpack.c.b16 %v333_v57, %v333_v57  ;;  %v3029_v56 = vld [vmem:[%s4589_s2 + $0x34] sm:$0xf]  ;;  %v2677_v57 = vld [vmem:[%s4589_s2 + $0x38] sm:$0xf0] }
  0x93   :  { %163 = vmatpush.bf16.msra.mxu3 %v140_v1  ;;  %v2669_v1 = vld [vmem:[%s4589_s2 + $0x28] sm:$0xf0] }
  0x96   :  { %2592 = vmatmul.msk.bf16.vlgmr.msra.gmra.mxu3 %vm80_vm1, %v126_v60  ;;  %v2680_v60 = vor.u32 %v3029_v56, %v2677_v57 }
  0x99   :  { %v102_v3 = vpop.f32.mrf.mxu0  ;;  %v116_v4 = vpop.f32.mrf.mxu1 }
  0x9a   :  { %v103_v27 = vadd.f32 %v102_v3, %v3617_v18  ;;  %v117_v32 = vadd.f32 %v116_v4, %v3620_v20  ;;  %v336_v3 = vpack.c.b16 %v334_v58, %v334_v58  ;;  %v330_v58 = vpack.c.bf16 %v2606_v53, %v2605_v52 }
  0xa1   :  { %v3590_v5 = vpop.f32.mrf.mxu0  ;;  %v3592_v6 = vpop.f32.mrf.mxu1 }
  0xa9   :  { %v3594_v7 = vpop.f32.mrf.mxu0  ;;  %v3596_v8 = vpop.f32.mrf.mxu1 }
  0xb1   :  { %v3598_v9 = vpop.f32.mrf.mxu0  ;;  %v3600_v10 = vpop.f32.mrf.mxu1 }
  0xb9   :  { %v3602_v11 = vpop.f32.mrf.mxu0  ;;  %v3604_v12 = vpop.f32.mrf.mxu1 }
  0xc1   :  { %v3606_v13 = vpop.f32.mrf.mxu0  ;;  %v3608_v14 = vpop.f32.mrf.mxu1 }
  0xc9   :  { %v3613_v16 = vpop.f32.mrf.mxu0  ;;  %v3615_v17 = vpop.f32.mrf.mxu1 }
  0xd1   :  { %v545_v21 = vpop.f32.mrf.mxu0  ;;  %v559_v22 = vpop.f32.mrf.mxu1 }
  0xd2   :  { %v564_v23 = vadd.f32 %v545_v21, %v101_v19  ;;  %v565_v26 = vadd.f32 %v559_v22, %v115_v24  ;;  %v242_v19 = vsel %vm84_vm0, %v234_v62, 0  ;;  %v341_v22 = vsel %vm84_vm0, %v335_v2, 0  ;;  %v3028_v62 = vld [vmem:[%s4589_s2 + $0x24] sm:$0xf0] }
  0xd3   :  { %265 = vmatpush.bf16.msrb.mxu3 %v242_v19  ;;  %353 = vmatpush.bf16.msra.mxu2 %v341_v22  ;;  %v2668_v2 = vor.u32 %v3028_v62, %v2667_v61  ;;  %v3025_v19 = vld [vmem:[%s4589_s2 + $0x14] sm:$0xf]  ;;  %v2661_v22 = vld [vmem:[%s4589_s2 + $0x18] sm:$0xf0] }
  0xd4   :  { %v568_v25 = vmul.f32 0.5, %v564_v23  ;;  %v578_v44 = vmul.f32 0.5, %v565_v26  ;;  %v344_v23 = vsel %vm84_vm0, %v336_v3, 0  ;;  %v2672_v3 = vor.u32 %v3027_v63, %v2669_v1 }
  0xd6   :  { %3118 = vtanh.f32 %v568_v25  ;;  %v433_v25 = vld [vmem:[%s4588_s1] sm:$0x77] }
  0xd7   :  { %3120 = vtanh.f32 %v565_v26  ;;  %367 = vmatpush.bf16.msra.mxu3 %v344_v23 }
  0xd9   :  { %v547_v28 = vpop.f32.mrf.mxu0  ;;  %v561_v30 = vpop.f32.mrf.mxu1 }
  0xda   :  { %v566_v29 = vadd.f32 %v547_v28, %v103_v27  ;;  %v567_v35 = vadd.f32 %v561_v30, %v117_v32  ;;  %v436_v32 = vunpack.c.h.b16 %v433_v25 }
  0xdc   :  { %v3119_v31 = vpop.eup %3118  ;;  %v569_v33 = vmul.f32 0.5, %v566_v29  ;;  %v579_v51 = vmul.f32 0.5, %v567_v35 }
  0xdd   :  { %v572_v34 = vmul.f32 0.5, %v3119_v31  ;;  %v3121_v37 = vpop.eup %3120  ;;  %v435_v31 = vunpack.c.l.b16 %v433_v25  ;;  %v2651_v25 = vld [vmem:[%s4589_s2] sm:$0xf] }
  0xde   :  { %3122 = vtanh.f32 %v569_v33 }
  0xdf   :  { %v574_v36 = vadd.f32 0.5, %v572_v34  ;;  %3124 = vtanh.f32 %v567_v35 }
  0xe0   :  { %3126 = vtanh.f32 %v578_v44 }
  0xe1   :  { %v588_v38 = vmul.f32 %v3121_v37, %v574_v36  ;;  %v586_v59 = vmul.f32 0.0, %v574_v36  ;;  %3128 = vtanh.f32 %v579_v51  ;;  %v2597_v36 = vld [vmem:[%s4587_s0 + $0x30] sm:$0xff]  ;;  %v2598_v37 = vld [vmem:[%s4587_s0 + $0x38] sm:$0xff] }
  0xe3   :  { %592 = vrot.lane.b32.xlu0 %v588_v38, %s3431_s3  ;;  %v437_v38 = vpack.c.b16 %v435_v31, %v435_v31  ;;  %v2614_v31 = vld [vmem:[%s4587_s0 + $0x78] sm:$0xff] }
  0xe4   :  { %v3123_v39 = vpop.eup %3122 }
  0xe5   :  { %v573_v40 = vmul.f32 0.5, %v3123_v39  ;;  %v3125_v42 = vpop.eup %3124  ;;  %v438_v39 = vpack.c.b16 %v436_v32, %v436_v32  ;;  %v443_v44 = vsel %vm84_vm0, %v437_v38, 0 }
  0xe6   :  { %v3127_v24 = vpop.eup %3126 }
  0xe7   :  { %v575_v41 = vadd.f32 0.5, %v573_v40  ;;  %v582_v27 = vmul.f32 0.5, %v3127_v24  ;;  %v3129_v29 = vpop.eup %3128  ;;  %v446_v45 = vsel %vm84_vm0, %v438_v39, 0  ;;  %v2664_v24 = vor.u32 %v3025_v19, %v2661_v22 }
  0xe8   :  { %v583_v35 = vmul.f32 0.5, %v3129_v29  ;;  %v2613_v29 = vld [vmem:[%s4587_s0 + $0x70] sm:$0xff] }
  0xe9   :  { %v589_v43 = vmul.f32 %v3125_v42, %v575_v41  ;;  %v587_v26 = vmul.f32 0.0, %v575_v41  ;;  %v584_v34 = vadd.f32 0.5, %v582_v27  ;;  %v228_v41 = vpack.c.bf16 %v2598_v37, %v2597_v36  ;;  %v3023_v27 = vld [vmem:[%s4589_s2 + $0x4] sm:$0xf]  ;;  %v151_v36 = vpop.f32.mrf.mxu2 }
  0xea   :  { %v585_v42 = vadd.f32 0.5, %v583_v35 }
  0xeb   :  { %594 = vrot.lane.b32.xlu0 %v589_v43, %s3431_s3  ;;  %2599 = vmatmul.msk.bf16.vlgmr.msrb.gmra.mxu2 %vm80_vm1, %v228_v41 }
  0xec   :  { %2600 = vmatmul.msk.bf16.vlgmr.msrb.gmra.mxu3 %vm80_vm1, %v228_v41  ;;  %455 = vmatpush.bf16.msrb.mxu2 %v443_v44 }
  0xed   :  { %469 = vmatpush.bf16.msrb.mxu3 %v446_v45 }
  0xf1   :  { %v153_v38 = vpop.f32.mrf.mxu2 }
  0xf2   :  { %v154_v61 = vadd.f32 %v153_v38, %v3617_v18  ;;  %v3036_v38 = vld [vmem:[%s4589_s2 + $0x24] sm:$0xf0] }
  0xfb   :  { %2607 = vmatmul.msk.bf16.vlgmr.msra.gmra.mxu2 %vm80_vm1, %v330_v58 }
  0xfc   :  { %2608 = vmatmul.msk.bf16.vlgmr.msra.gmra.mxu3 %vm80_vm1, %v330_v58 }
  0xfd   :  { %695 = vmatpush.bf16.msra.mxu3 %v2680_v60 }
 0x101   :  { %696 = vmatpush.bf16.msra.mxu3 %v2672_v3 }
 0x105   :  { %697 = vmatpush.bf16.msra.mxu3 %v2664_v24 }
 0x119   :  { %v165_v37 = vpop.f32.mrf.mxu3 }
 0x11a   :  { %v166_v58 = vadd.f32 %v165_v37, %v3620_v20  ;;  %v2701_v37 = vld [vmem:[%s4589_s2 + $0x20] sm:$0xf] }
 0x121   :  { %v167_v39 = vpop.f32.mrf.mxu3 }
 0x122   :  { %v168_v3 = vadd.f32 %v167_v39, %v3620_v20 }
 0x155   :  { %v593_v4 = vpop.permute.xlu0 %592 }
 0x156   :  { %v3646_v21 = vadd.f32 %v593_v4, %v586_v59  ;;  %v2676_v59 = vor.u32 %v3030_v55, %v2675_v54  ;;  %v2659_v4 = vld [vmem:[%s4589_s2 + $0x10] sm:$0xf]  ;;  %v152_v54 = vadd.f32 %v151_v36, %v3617_v18  ;;  %v2711_v36 = vld [vmem:[%s4589_s2 + $0x38] sm:$0xf0] }
 0x157   :  { %v2660_v23 = vor.u32 %v3026_v15, %v2659_v4 }
 0x158   :  { %3130 = vtanh.f32 %v3646_v21  ;;  %681 = vmatpush.bf16.msra.mxu2 %v2676_v59 }
 0x15c   :  { %682 = vmatpush.bf16.msra.mxu2 %v2668_v2 }
 0x15d   :  { %v595_v28 = vpop.permute.xlu0 %594 }
 0x15e   :  { %v3656_v30 = vadd.f32 %v595_v28, %v587_v26  ;;  %v3131_v33 = vpop.eup %3130  ;;  %v3024_v26 = vld [vmem:[%s4589_s2 + $0x4] sm:$0xf0]  ;;  %v2653_v28 = vld [vmem:[%s4589_s2 + $0x8] sm:$0xf0] }
 0x15f   :  { %v602_v40 = vmul.f32 %v3131_v33, %v584_v34  ;;  %v2652_v32 = vor.u32 %v3024_v26, %v2651_v25  ;;  %v2656_v33 = vor.u32 %v3023_v27, %v2653_v28  ;;  %v432_v34 = vpack.c.bf16 %v2614_v31, %v2613_v29 }
 0x160   :  { %3132 = vtanh.f32 %v3656_v30  ;;  %683 = vmatpush.bf16.msra.mxu2 %v2660_v23 }
 0x161   :  { %v3667_v47 = vpack.c.bf16 %v602_v40, %v602_v40  ;;  %698 = vmatpush.bf16.msra.mxu3 %v2656_v33  ;;  %2615 = vmatmul.msk.bf16.vlgmr.msrb.gmra.mxu2 %vm80_vm1, %v432_v34  ;;  %v3038_v33 = vld [vmem:[%s4589_s2 + $0x34] sm:$0xf0] }
 0x162   :  { %2616 = vmatmul.msk.bf16.vlgmr.msrb.gmra.mxu3 %vm80_vm1, %v432_v34  ;;  %v3037_v34 = vld [vmem:[%s4589_s2 + $0x34] sm:$0xf] }
 0x163   :  { %v629_v49 = vunpack.c.l.b16 %v3667_v47  ;;  %v2714_v39 = vor.u32 %v3037_v34, %v2711_v36 }
 0x164   :  { %684 = vmatpush.bf16.msra.mxu2 %v2652_v32  ;;  %v2709_v32 = vld [vmem:[%s4589_s2 + $0x30] sm:$0xf] }
 0x165   :  { %835 = vmatpush.bf16.msrb.mxu1 %v2714_v39 }
 0x166   :  { %v3133_v43 = vpop.eup %3132 }
 0x167   :  { %v603_v46 = vmul.f32 %v3133_v43, %v585_v42 }
 0x169   :  { %v3671_v48 = vpack.c.bf16 %v603_v46, %v603_v46 }
 0x16b   :  { %v630_v50 = vunpack.c.l.b16 %v3671_v48 }
 0x16d   :  { %v631_v51 = vpack.c.b16 %v630_v50, %v629_v49 }
 0x16e   :  { %v3742_v40 = vpop.f32.mrf.mxu2 }
 0x16f   :  { %632 = vrot.lane.b32.xlu1 %v631_v51, %s3431_s3  ;;  %v3744_v41 = vpop.f32.mrf.mxu3 }
 0x176   :  { %v3746_v42 = vpop.f32.mrf.mxu2 }
 0x177   :  { %v3748_v43 = vpop.f32.mrf.mxu3 }
 0x17e   :  { %v3750_v44 = vpop.f32.mrf.mxu2 }
 0x17f   :  { %v3752_v45 = vpop.f32.mrf.mxu3 }
 0x186   :  { %v3754_v46 = vpop.f32.mrf.mxu2 }
 0x187   :  { %v3756_v49 = vpop.f32.mrf.mxu3 }
 0x1e1   :  { %v633_v35 = vpop.permute.xlu1 %632 }
 0x1e2   :  { %2681 = vmatmul.msk.bf16.vlgmr.msra.gmra.mxu2 %vm532_vm2, %v633_v35  ;;  %2682 = vmatmul.msk.bf16.vlgmr.msra.gmra.mxu3 %vm532_vm2, %v633_v35  ;;  %v2710_v35 = vor.u32 %v3038_v33, %v2709_v32 }
 0x1e4   :  { %v3758_v50 = vpop.f32.mrf.mxu2  ;;  %821 = vmatpush.bf16.msrb.mxu0 %v2710_v35 }
 0x1e5   :  { %v3760_v51 = vpop.f32.mrf.mxu3 }
 0x1ec   :  { %v3762_v52 = vpop.f32.mrf.mxu2 }
 0x1ed   :  { %v3764_v53 = vpop.f32.mrf.mxu3 }
 0x265   :  { %v686_v55 = vpop.f32.mrf.mxu2  ;;  %v700_v56 = vpop.f32.mrf.mxu3 }
 0x266   :  { %v705_v57 = vadd.f32 %v686_v55, %v152_v54  ;;  %v706_v60 = vadd.f32 %v700_v56, %v166_v58  ;;  %v3035_v54 = vld [vmem:[%s4589_s2 + $0x24] sm:$0xf]  ;;  %v2703_v55 = vld [vmem:[%s4589_s2 + $0x28] sm:$0xf0]  ;;  %v2702_v56 = vor.u32 %v3036_v38, %v2701_v37 }
 0x267   :  { %v2706_v58 = vor.u32 %v3035_v54, %v2703_v55 }
 0x268   :  { %v709_v59 = vmul.f32 0.5, %v705_v57  ;;  %822 = vmatpush.bf16.msrb.mxu0 %v2702_v56 }
 0x269   :  { %836 = vmatpush.bf16.msrb.mxu1 %v2706_v58  ;;  %v203_v58 = vadd.f32 %v3590_v5, %v3617_v18  ;;  %v219_v5 = vadd.f32 %v3596_v8, %v3620_v20  ;;  %v2743_v8 = vld [vmem:[%s4589_s2 + $0x30] sm:$0xf] }
 0x26a   :  { %3134 = vtanh.f32 %v709_v59  ;;  %v2693_v59 = vld [vmem:[%s4589_s2 + $0x10] sm:$0xf] }
 0x26b   :  { %3136 = vtanh.f32 %v706_v60 }
 0x26d   :  { %v688_v62 = vpop.f32.mrf.mxu2  ;;  %v702_v1 = vpop.f32.mrf.mxu3 }
 0x26e   :  { %v707_v63 = vadd.f32 %v688_v62, %v154_v61  ;;  %v708_v19 = vadd.f32 %v702_v1, %v168_v3  ;;  %v3034_v61 = vld [vmem:[%s4589_s2 + $0x14] sm:$0xf0]  ;;  %v719_v62 = vmul.f32 0.5, %v706_v60  ;;  %v3033_v1 = vld [vmem:[%s4589_s2 + $0x14] sm:$0xf] }
 0x26f   :  { %v2685_v60 = vld [vmem:[%s4589_s2] sm:$0xf] }
 0x270   :  { %v3135_v2 = vpop.eup %3134  ;;  %v710_v4 = vmul.f32 0.5, %v707_v63  ;;  %v720_v31 = vmul.f32 0.5, %v708_v19 }
 0x271   :  { %v713_v15 = vmul.f32 0.5, %v3135_v2  ;;  %v3137_v23 = vpop.eup %3136  ;;  %v2695_v2 = vld [vmem:[%s4589_s2 + $0x18] sm:$0xf0] }
 0x272   :  { %3138 = vtanh.f32 %v710_v4  ;;  %v2694_v4 = vor.u32 %v3034_v61, %v2693_v59 }
 0x273   :  { %v715_v22 = vadd.f32 0.5, %v713_v15  ;;  %3140 = vtanh.f32 %v708_v19  ;;  %v2698_v15 = vor.u32 %v3033_v1, %v2695_v2  ;;  %v3031_v19 = vld [vmem:[%s4589_s2 + $0x4] sm:$0xf] }
 0x274   :  { %3142 = vtanh.f32 %v720_v31  ;;  %823 = vmatpush.bf16.msrb.mxu0 %v2694_v4  ;;  %v205_v4 = vadd.f32 %v3594_v7, %v3617_v18 }
 0x275   :  { %v729_v24 = vmul.f32 %v3137_v23, %v715_v22  ;;  %3144 = vtanh.f32 %v719_v62  ;;  %v2687_v23 = vld [vmem:[%s4589_s2 + $0x8] sm:$0xf0]  ;;  %837 = vmatpush.bf16.msrb.mxu1 %v2698_v15 }
 0x277   :  { %733 = vrot.lane.b32.xlu1 %v729_v24, %s3431_s3 }
 0x278   :  { %v3139_v25 = vpop.eup %3138 }
 0x279   :  { %v714_v26 = vmul.f32 0.5, %v3139_v25  ;;  %v3141_v28 = vpop.eup %3140 }
 0x27a   :  { %v3143_v24 = vpop.eup %3142 }
 0x27b   :  { %v716_v27 = vadd.f32 0.5, %v714_v26  ;;  %v2690_v26 = vor.u32 %v3031_v19, %v2687_v23  ;;  %v3145_v31 = vpop.eup %3144 }
 0x27c   :  { %v723_v34 = vmul.f32 0.5, %v3145_v31 }
 0x27d   :  { %v730_v29 = vmul.f32 %v3141_v28, %v716_v27  ;;  %v728_v63 = vmul.f32 %v716_v27, %v3656_v30  ;;  %v3032_v30 = vld [vmem:[%s4589_s2 + $0x4] sm:$0xf0]  ;;  %v727_v27 = vmul.f32 %v715_v22, %v3646_v21  ;;  %v724_v28 = vmul.f32 0.5, %v3143_v24  ;;  %838 = vmatpush.bf16.msrb.mxu1 %v2690_v26 }
 0x27e   :  { %v2686_v25 = vor.u32 %v3032_v30, %v2685_v60  ;;  %v725_v37 = vadd.f32 0.5, %v723_v34 }
 0x27f   :  { %735 = vrot.lane.b32.xlu2 %v730_v29, %s3431_s3  ;;  %v726_v35 = vadd.f32 0.5, %v724_v28 }
 0x280   :  { %824 = vmatpush.bf16.msrb.mxu0 %v2686_v25 }
 0x2d9   :  { %v736_v57 = vpop.permute.xlu2 %735 }
 0x2da   :  { %v3809_v3 = vadd.f32 %v736_v57, %v728_v63  ;;  %v217_v63 = vadd.f32 %v3592_v6, %v3620_v20 }
 0x2dc   :  { %3146 = vtanh.f32 %v3809_v3 }
 0x2e2   :  { %v3147_v33 = vpop.eup %3146 }
 0x2e3   :  { %v744_v36 = vmul.f32 %v3147_v33, %v726_v35  ;;  %v3046_v35 = vld [vmem:[%s4589_s2 + $0x34] sm:$0xf0] }
 0x2e5   :  { %v3828_v54 = vpack.c.bf16 %v744_v36, %v744_v36  ;;  %v3045_v36 = vld [vmem:[%s4589_s2 + $0x34] sm:$0xf] }
 0x2e7   :  { %v770_v22 = vunpack.c.l.b16 %v3828_v54 }
 0x2e9   :  { %v734_v29 = vpop.permute.xlu1 %733 }
 0x2ea   :  { %v3825_v32 = vadd.f32 %v734_v29, %v727_v27 }
 0x2ec   :  { %3148 = vtanh.f32 %v3825_v32 }
 0x2f2   :  { %v3149_v38 = vpop.eup %3148 }
 0x2f3   :  { %v743_v39 = vmul.f32 %v3149_v38, %v725_v37  ;;  %v2744_v37 = vor.u32 %v3046_v35, %v2743_v8  ;;  %v2745_v38 = vld [vmem:[%s4589_s2 + $0x38] sm:$0xf0] }
 0x2f5   :  { %v3830_v55 = vpack.c.bf16 %v743_v39, %v743_v39  ;;  %v2735_v39 = vld [vmem:[%s4589_s2 + $0x20] sm:$0xf]  ;;  %961 = vmatpush.bf16.msrb.mxu2 %v2744_v37 }
 0x2f7   :  { %v769_v21 = vunpack.c.l.b16 %v3830_v55 }
 0x2f9   :  { %v771_v56 = vpack.c.b16 %v770_v22, %v769_v21  ;;  %v3044_v21 = vld [vmem:[%s4589_s2 + $0x24] sm:$0xf0]  ;;  %v2748_v22 = vor.u32 %v3045_v36, %v2745_v38 }
 0x2fb   :  { %772 = vrot.lane.b32.xlu2 %v771_v56, %s3431_s3  ;;  %v3043_v56 = vld [vmem:[%s4589_s2 + $0x24] sm:$0xf]  ;;  %975 = vmatpush.bf16.msrb.mxu3 %v2748_v22 }
 0x355   :  { %v773_v57 = vpop.permute.xlu2 %772 }
 0x356   :  { %2715 = vmatmul.msk.bf16.vlgmr.msrb.gmra.mxu0 %vm532_vm2, %v773_v57  ;;  %2716 = vmatmul.msk.bf16.vlgmr.msrb.gmra.mxu1 %vm532_vm2, %v773_v57  ;;  %v2737_v57 = vld [vmem:[%s4589_s2 + $0x28] sm:$0xf0] }
 0x3d3   :  { %v826_v59 = vpop.f32.mrf.mxu0  ;;  %v840_v61 = vpop.f32.mrf.mxu1 }
 0x3d4   :  { %v845_v62 = vadd.f32 %v826_v59, %v203_v58  ;;  %v846_v2 = vadd.f32 %v840_v61, %v217_v63  ;;  %v2736_v58 = vor.u32 %v3044_v21, %v2735_v39  ;;  %v2740_v59 = vor.u32 %v3043_v56, %v2737_v57  ;;  %v2727_v61 = vld [vmem:[%s4589_s2 + $0x10] sm:$0xf] }
 0x3d6   :  { %v849_v1 = vmul.f32 0.5, %v845_v62  ;;  %v859_v34 = vmul.f32 0.5, %v846_v2  ;;  %v3042_v62 = vld [vmem:[%s4589_s2 + $0x14] sm:$0xf0]  ;;  %962 = vmatpush.bf16.msrb.mxu2 %v2736_v58  ;;  %976 = vmatpush.bf16.msrb.mxu3 %v2740_v59  ;;  %v254_v58 = vadd.f32 %v3742_v40, %v3617_v18  ;;  %v270_v40 = vadd.f32 %v3748_v43, %v3620_v20  ;;  %v2777_v43 = vld [vmem:[%s4589_s2 + $0x30] sm:$0xf] }
 0x3d8   :  { %3150 = vtanh.f32 %v849_v1 }
 0x3d9   :  { %3152 = vtanh.f32 %v846_v2  ;;  %v3041_v2 = vld [vmem:[%s4589_s2 + $0x14] sm:$0xf] }
 0x3db   :  { %v828_v15 = vpop.f32.mrf.mxu0  ;;  %v842_v30 = vpop.f32.mrf.mxu1 }
 0x3dc   :  { %v847_v60 = vadd.f32 %v828_v15, %v205_v4  ;;  %v848_v25 = vadd.f32 %v842_v30, %v219_v5  ;;  %v2729_v4 = vld [vmem:[%s4589_s2 + $0x18] sm:$0xf0]  ;;  %v2728_v30 = vor.u32 %v3042_v62, %v2727_v61  ;;  %v2719_v5 = vld [vmem:[%s4589_s2] sm:$0xf] }
 0x3de   :  { %v3151_v19 = vpop.eup %3150  ;;  %v850_v23 = vmul.f32 0.5, %v847_v60  ;;  %v860_v63 = vmul.f32 0.5, %v848_v25  ;;  %963 = vmatpush.bf16.msrb.mxu2 %v2728_v30 }
 0x3df   :  { %v853_v24 = vmul.f32 0.5, %v3151_v19  ;;  %v3153_v6 = vpop.eup %3152  ;;  %v2732_v19 = vor.u32 %v3041_v2, %v2729_v4  ;;  %v256_v4 = vadd.f32 %v3746_v42, %v3617_v18 }
 0x3e0   :  { %3154 = vtanh.f32 %v850_v23  ;;  %v3039_v23 = vld [vmem:[%s4589_s2 + $0x4] sm:$0xf] }
 0x3e1   :  { %v855_v26 = vadd.f32 0.5, %v853_v24  ;;  %3156 = vtanh.f32 %v848_v25  ;;  %v2721_v24 = vld [vmem:[%s4589_s2 + $0x8] sm:$0xf0]  ;;  %977 = vmatpush.bf16.msrb.mxu3 %v2732_v19 }
 0x3e2   :  { %3158 = vtanh.f32 %v859_v34 }
 0x3e3   :  { %v869_v27 = vmul.f32 %v3153_v6, %v855_v26  ;;  %v867_v1 = vmul.f32 %v855_v26, %v3825_v32  ;;  %v3040_v32 = vld [vmem:[%s4589_s2 + $0x4] sm:$0xf0]  ;;  %3160 = vtanh.f32 %v860_v63  ;;  %v2724_v6 = vor.u32 %v3039_v23, %v2721_v24 }
 0x3e4   :  { %v2720_v26 = vor.u32 %v3040_v32, %v2719_v5  ;;  %v268_v63 = vadd.f32 %v3744_v41, %v3620_v20 }
 0x3e5   :  { %873 = vrot.lane.b32.xlu0 %v869_v27, %s3431_s3  ;;  %978 = vmatpush.bf16.msrb.mxu3 %v2724_v6 }
 0x3e6   :  { %v3155_v28 = vpop.eup %3154  ;;  %964 = vmatpush.bf16.msrb.mxu2 %v2720_v26 }
 0x3e7   :  { %v854_v7 = vmul.f32 0.5, %v3155_v28  ;;  %v3157_v31 = vpop.eup %3156 }
 0x3e8   :  { %v3159_v25 = vpop.eup %3158 }
 0x3e9   :  { %v856_v29 = vadd.f32 0.5, %v854_v7  ;;  %v863_v28 = vmul.f32 0.5, %v3159_v25 }
 0x3eb   :  { %v870_v33 = vmul.f32 %v3157_v31, %v856_v29  ;;  %v868_v27 = vmul.f32 %v856_v29, %v3809_v3  ;;  %v3161_v31 = vpop.eup %3160  ;;  %v865_v8 = vadd.f32 0.5, %v863_v28 }
 0x3ec   :  { %v864_v35 = vmul.f32 0.5, %v3161_v31 }
 0x3ed   :  { %875 = vrot.lane.b32.xlu1 %v870_v33, %s3431_s3 }
 0x3ee   :  { %v866_v37 = vadd.f32 0.5, %v864_v35 }
 0x457   :  { %v874_v15 = vpop.permute.xlu0 %873 }
 0x458   :  { %v3884_v60 = vadd.f32 %v874_v15, %v867_v1 }
 0x45a   :  { %3162 = vtanh.f32 %v3884_v60 }
 0x45f   :  { %v876_v7 = vpop.permute.xlu1 %875 }
 0x460   :  { %v3900_v33 = vadd.f32 %v876_v7, %v868_v27  ;;  %v3163_v34 = vpop.eup %3162 }
 0x461   :  { %v883_v36 = vmul.f32 %v3163_v34, %v865_v8  ;;  %v3054_v34 = vld [vmem:[%s4589_s2 + $0x34] sm:$0xf0]  ;;  %v3053_v8 = vld [vmem:[%s4589_s2 + $0x34] sm:$0xf] }
 0x462   :  { %3164 = vtanh.f32 %v3900_v33  ;;  %v2778_v35 = vor.u32 %v3054_v34, %v2777_v43 }
 0x463   :  { %v3903_v21 = vpack.c.bf16 %v883_v36, %v883_v36  ;;  %v2779_v36 = vld [vmem:[%s4589_s2 + $0x38] sm:$0xf0] }
 0x464   :  { %1101 = vmatpush.bf16.msra.mxu0 %v2778_v35 }
 0x465   :  { %v909_v3 = vunpack.c.l.b16 %v3903_v21 }
 0x468   :  { %v3165_v38 = vpop.eup %3164 }
 0x469   :  { %v884_v39 = vmul.f32 %v3165_v38, %v866_v37  ;;  %v2769_v37 = vld [vmem:[%s4589_s2 + $0x20] sm:$0xf]  ;;  %v3052_v38 = vld [vmem:[%s4589_s2 + $0x24] sm:$0xf0] }
 0x46b   :  { %v3905_v22 = vpack.c.bf16 %v884_v39, %v884_v39  ;;  %v2782_v39 = vor.u32 %v3053_v8, %v2779_v36 }
 0x46d   :  { %v910_v29 = vunpack.c.l.b16 %v3905_v22  ;;  %1115 = vmatpush.bf16.msra.mxu1 %v2782_v39 }
 0x46f   :  { %v911_v56 = vpack.c.b16 %v910_v29, %v909_v3  ;;  %v3051_v3 = vld [vmem:[%s4589_s2 + $0x24] sm:$0xf]  ;;  %v2771_v29 = vld [vmem:[%s4589_s2 + $0x28] sm:$0xf0] }
 0x471   :  { %912 = vrot.lane.b32.xlu2 %v911_v56, %s3431_s3  ;;  %v2770_v56 = vor.u32 %v3052_v38, %v2769_v37 }
 0x473   :  { %1102 = vmatpush.bf16.msra.mxu0 %v2770_v56 }
 0x4cb   :  { %v913_v57 = vpop.permute.xlu2 %912 }
 0x4cc   :  { %2749 = vmatmul.msk.bf16.vlgmr.msrb.gmra.mxu2 %vm532_vm2, %v913_v57  ;;  %2750 = vmatmul.msk.bf16.vlgmr.msrb.gmra.mxu3 %vm532_vm2, %v913_v57  ;;  %v2774_v57 = vor.u32 %v3051_v3, %v2771_v29  ;;  %v305_v3 = vadd.f32 %v3598_v9, %v3617_v18  ;;  %v321_v9 = vadd.f32 %v3604_v12, %v3620_v20  ;;  %v2811_v12 = vld [vmem:[%s4589_s2 + $0x30] sm:$0xf] }
 0x4ce   :  { %1116 = vmatpush.bf16.msra.mxu1 %v2774_v57 }
 0x54f   :  { %v966_v59 = vpop.f32.mrf.mxu2  ;;  %v980_v61 = vpop.f32.mrf.mxu3 }
 0x550   :  { %v985_v62 = vadd.f32 %v966_v59, %v254_v58  ;;  %v986_v2 = vadd.f32 %v980_v61, %v268_v63  ;;  %v2761_v58 = vld [vmem:[%s4589_s2 + $0x10] sm:$0xf]  ;;  %v3050_v59 = vld [vmem:[%s4589_s2 + $0x14] sm:$0xf0]  ;;  %v3049_v63 = vld [vmem:[%s4589_s2 + $0x14] sm:$0xf] }
 0x552   :  { %v989_v1 = vmul.f32 0.5, %v985_v62  ;;  %v999_v31 = vmul.f32 0.5, %v986_v2 }
 0x554   :  { %3166 = vtanh.f32 %v989_v1  ;;  %v2763_v1 = vld [vmem:[%s4589_s2 + $0x18] sm:$0xf0] }
 0x555   :  { %3168 = vtanh.f32 %v986_v2 }
 0x557   :  { %v968_v15 = vpop.f32.mrf.mxu2  ;;  %v982_v19 = vpop.f32.mrf.mxu3 }
 0x558   :  { %v987_v30 = vadd.f32 %v968_v15, %v256_v4  ;;  %v988_v24 = vadd.f32 %v982_v19, %v270_v40  ;;  %v2762_v15 = vor.u32 %v3050_v59, %v2761_v58  ;;  %v2753_v19 = vld [vmem:[%s4589_s2] sm:$0xf]  ;;  %v2755_v40 = vld [vmem:[%s4589_s2 + $0x8] sm:$0xf0]  ;;  %v319_v58 = vadd.f32 %v3600_v10, %v3620_v20 }
 0x55a   :  { %v3167_v5 = vpop.eup %3166  ;;  %v990_v32 = vmul.f32 0.5, %v987_v30  ;;  %v1000_v61 = vmul.f32 0.5, %v988_v24  ;;  %v2766_v30 = vor.u32 %v3049_v63, %v2763_v1  ;;  %1103 = vmatpush.bf16.msra.mxu0 %v2762_v15 }
 0x55b   :  { %v993_v23 = vmul.f32 0.5, %v3167_v5  ;;  %v3169_v41 = vpop.eup %3168  ;;  %v3047_v5 = vld [vmem:[%s4589_s2 + $0x4] sm:$0xf] }
 0x55c   :  { %3170 = vtanh.f32 %v990_v32  ;;  %1117 = vmatpush.bf16.msra.mxu1 %v2766_v30 }
 0x55d   :  { %v995_v25 = vadd.f32 0.5, %v993_v23  ;;  %3172 = vtanh.f32 %v988_v24  ;;  %v2758_v24 = vor.u32 %v3047_v5, %v2755_v40 }
 0x55e   :  { %3174 = vtanh.f32 %v999_v31 }
 0x55f   :  { %v1009_v26 = vmul.f32 %v3169_v41, %v995_v25  ;;  %v1007_v62 = vmul.f32 %v995_v25, %v3884_v60  ;;  %v3048_v60 = vld [vmem:[%s4589_s2 + $0x4] sm:$0xf0]  ;;  %3176 = vtanh.f32 %v1000_v61 }
 0x560   :  { %v2754_v23 = vor.u32 %v3048_v60, %v2753_v19  ;;  %1118 = vmatpush.bf16.msra.mxu1 %v2758_v24 }
 0x561   :  { %1013 = vrot.lane.b32.xlu0 %v1009_v26, %s3431_s3 }
 0x562   :  { %v3171_v6 = vpop.eup %3170  ;;  %1104 = vmatpush.bf16.msra.mxu0 %v2754_v23 }
 0x563   :  { %v994_v42 = vmul.f32 0.5, %v3171_v6  ;;  %v3173_v28 = vpop.eup %3172 }
 0x564   :  { %v3175_v32 = vpop.eup %3174 }
 0x565   :  { %v996_v27 = vadd.f32 0.5, %v994_v42  ;;  %v1003_v41 = vmul.f32 0.5, %v3175_v32  ;;  %v3177_v6 = vpop.eup %3176 }
 0x566   :  { %v1004_v31 = vmul.f32 0.5, %v3177_v6  ;;  %v3061_v6 = vld [vmem:[%s4589_s2 + $0x34] sm:$0xf] }
 0x567   :  { %v1010_v7 = vmul.f32 %v3173_v28, %v996_v27  ;;  %v1008_v25 = vmul.f32 %v996_v27, %v3900_v33 }
 0x568   :  { %v1006_v34 = vadd.f32 0.5, %v1004_v31  ;;  %v2803_v31 = vld [vmem:[%s4589_s2 + $0x20] sm:$0xf] }
 0x569   :  { %1015 = vrot.lane.b32.xlu1 %v1010_v7, %s3431_s3  ;;  %v1005_v7 = vadd.f32 0.5, %v1003_v41 }
 0x5d3   :  { %v1014_v2 = vpop.permute.xlu0 %1013 }
 0x5d4   :  { %v3959_v4 = vadd.f32 %v1014_v2, %v1007_v62  ;;  %v307_v62 = vadd.f32 %v3602_v11, %v3617_v18 }
 0x5d6   :  { %3178 = vtanh.f32 %v3959_v4 }
 0x5db   :  { %v1016_v26 = vpop.permute.xlu1 %1015 }
 0x5dc   :  { %v3975_v42 = vadd.f32 %v1016_v26, %v1008_v25  ;;  %v3179_v28 = vpop.eup %3178  ;;  %v3062_v26 = vld [vmem:[%s4589_s2 + $0x34] sm:$0xf0] }
 0x5dd   :  { %v1023_v43 = vmul.f32 %v3179_v28, %v1005_v7  ;;  %v2812_v28 = vor.u32 %v3062_v26, %v2811_v12  ;;  %v2813_v7 = vld [vmem:[%s4589_s2 + $0x38] sm:$0xf0] }
 0x5de   :  { %3180 = vtanh.f32 %v3975_v42 }
 0x5df   :  { %v3978_v36 = vpack.c.bf16 %v1023_v43, %v1023_v43  ;;  %v3060_v43 = vld [vmem:[%s4589_s2 + $0x24] sm:$0xf0]  ;;  %1241 = vmatpush.bf16.msra.mxu2 %v2812_v28 }
 0x5e1   :  { %v1049_v33 = vunpack.c.l.b16 %v3978_v36 }
 0x5e4   :  { %v3181_v8 = vpop.eup %3180 }
 0x5e5   :  { %v1024_v35 = vmul.f32 %v3181_v8, %v1006_v34  ;;  %v2816_v34 = vor.u32 %v3061_v6, %v2813_v7  ;;  %v3059_v8 = vld [vmem:[%s4589_s2 + $0x24] sm:$0xf] }
 0x5e7   :  { %v3980_v37 = vpack.c.bf16 %v1024_v35, %v1024_v35  ;;  %v2805_v35 = vld [vmem:[%s4589_s2 + $0x28] sm:$0xf0]  ;;  %1255 = vmatpush.bf16.msra.mxu3 %v2816_v34 }
 0x5e9   :  { %v1050_v27 = vunpack.c.l.b16 %v3980_v37 }
 0x5eb   :  { %v1051_v38 = vpack.c.b16 %v1050_v27, %v1049_v33  ;;  %v2804_v33 = vor.u32 %v3060_v43, %v2803_v31  ;;  %v2808_v27 = vor.u32 %v3059_v8, %v2805_v35  ;;  %v356_v43 = vadd.f32 %v3750_v44, %v3617_v18 }
 0x5ec   :  { %v372_v44 = vadd.f32 %v3756_v49, %v3620_v20  ;;  %v2845_v49 = vld [vmem:[%s4589_s2 + $0x30] sm:$0xf] }
 0x5ed   :  { %1052 = vrot.lane.b32.xlu2 %v1051_v38, %s3431_s3  ;;  %v2795_v38 = vld [vmem:[%s4589_s2 + $0x10] sm:$0xf]  ;;  %1242 = vmatpush.bf16.msra.mxu2 %v2804_v33  ;;  %v370_v33 = vadd.f32 %v3752_v45, %v3620_v20 }
 0x5ee   :  { %1256 = vmatpush.bf16.msra.mxu3 %v2808_v27 }
 0x647   :  { %v1053_v39 = vpop.permute.xlu2 %1052 }
 0x648   :  { %2783 = vmatmul.msk.bf16.vlgmr.msra.gmra.mxu0 %vm532_vm2, %v1053_v39  ;;  %2784 = vmatmul.msk.bf16.vlgmr.msra.gmra.mxu1 %vm532_vm2, %v1053_v39  ;;  %v3058_v39 = vld [vmem:[%s4589_s2 + $0x14] sm:$0xf0] }
 0x6c5   :  { %v1106_v29 = vpop.f32.mrf.mxu0  ;;  %v1120_v56 = vpop.f32.mrf.mxu1 }
 0x6c6   :  { %v1125_v57 = vadd.f32 %v1106_v29, %v305_v3  ;;  %v1126_v61 = vadd.f32 %v1120_v56, %v319_v58  ;;  %v3057_v56 = vld [vmem:[%s4589_s2 + $0x14] sm:$0xf] }
 0x6c8   :  { %v1129_v59 = vmul.f32 0.5, %v1125_v57  ;;  %v1139_v41 = vmul.f32 0.5, %v1126_v61  ;;  %v2797_v57 = vld [vmem:[%s4589_s2 + $0x18] sm:$0xf0] }
 0x6ca   :  { %3182 = vtanh.f32 %v1129_v59 }
 0x6cb   :  { %3184 = vtanh.f32 %v1126_v61  ;;  %v2796_v61 = vor.u32 %v3058_v39, %v2795_v38  ;;  %v358_v39 = vadd.f32 %v3754_v46, %v3617_v18 }
 0x6cd   :  { %v1108_v63 = vpop.f32.mrf.mxu0  ;;  %v1122_v2 = vpop.f32.mrf.mxu1  ;;  %1243 = vmatpush.bf16.msra.mxu2 %v2796_v61 }
 0x6ce   :  { %v1127_v1 = vadd.f32 %v1108_v63, %v307_v62  ;;  %v1128_v60 = vadd.f32 %v1122_v2, %v321_v9  ;;  %v2800_v62 = vor.u32 %v3057_v56, %v2797_v57  ;;  %v2787_v63 = vld [vmem:[%s4589_s2] sm:$0xf]  ;;  %v2789_v2 = vld [vmem:[%s4589_s2 + $0x8] sm:$0xf0] }
 0x6d0   :  { %v3183_v15 = vpop.eup %3182  ;;  %v1130_v30 = vmul.f32 0.5, %v1127_v1  ;;  %v1140_v3 = vmul.f32 0.5, %v1128_v60  ;;  %v3055_v1 = vld [vmem:[%s4589_s2 + $0x4] sm:$0xf]  ;;  %1257 = vmatpush.bf16.msra.mxu3 %v2800_v62 }
 0x6d1   :  { %v1133_v19 = vmul.f32 0.5, %v3183_v15  ;;  %v3185_v10 = vpop.eup %3184 }
 0x6d2   :  { %3186 = vtanh.f32 %v1130_v30  ;;  %v2792_v30 = vor.u32 %v3055_v1, %v2789_v2 }
 0x6d3   :  { %v1135_v5 = vadd.f32 0.5, %v1133_v19  ;;  %3188 = vtanh.f32 %v1128_v60 }
 0x6d4   :  { %3190 = vtanh.f32 %v1139_v41  ;;  %1258 = vmatpush.bf16.msra.mxu3 %v2792_v30 }
 0x6d5   :  { %v1149_v40 = vmul.f32 %v3185_v10, %v1135_v5  ;;  %v1147_v29 = vmul.f32 %v1135_v5, %v3959_v4  ;;  %v3056_v4 = vld [vmem:[%s4589_s2 + $0x4] sm:$0xf0]  ;;  %3192 = vtanh.f32 %v1140_v3 }
 0x6d6   :  { %v2788_v9 = vor.u32 %v3056_v4, %v2787_v63 }
 0x6d7   :  { %1153 = vrot.lane.b32.xlu0 %v1149_v40, %s3431_s3 }
 0x6d8   :  { %v3187_v32 = vpop.eup %3186  ;;  %1244 = vmatpush.bf16.msra.mxu2 %v2788_v9 }
 0x6d9   :  { %v1134_v11 = vmul.f32 0.5, %v3187_v32  ;;  %v3189_v24 = vpop.eup %3188 }
 0x6da   :  { %v3191_v15 = vpop.eup %3190 }
 0x6db   :  { %v1136_v23 = vadd.f32 0.5, %v1134_v11  ;;  %v1143_v60 = vmul.f32 0.5, %v3191_v15  ;;  %v3193_v10 = vpop.eup %3192 }
 0x6dd   :  { %v1150_v25 = vmul.f32 %v3189_v24, %v1136_v23  ;;  %v1148_v19 = vmul.f32 %v1136_v23, %v3975_v42  ;;  %v1145_v11 = vadd.f32 0.5, %v1143_v60  ;;  %v1144_v24 = vmul.f32 0.5, %v3193_v10  ;;  %v3069_v60 = vld [vmem:[%s4589_s2 + $0x34] sm:$0xf]  ;;  %v2847_v10 = vld [vmem:[%s4589_s2 + $0x38] sm:$0xf0] }
 0x6df   :  { %1155 = vrot.lane.b32.xlu1 %v1150_v25, %s3431_s3  ;;  %v1146_v41 = vadd.f32 0.5, %v1144_v24  ;;  %v2850_v24 = vor.u32 %v3069_v60, %v2847_v10  ;;  %v407_v10 = vadd.f32 %v3606_v13, %v3617_v18  ;;  %v423_v13 = vadd.f32 %v3615_v17, %v3620_v20  ;;  %v2945_v17 = vld [vmem:[%s4591_s4 + $0x30] sm:$0xf] }
 0x6e1   :  { %1395 = vmatpush.bf16.msrb.mxu1 %v2850_v24 }
 0x749   :  { %v1154_v58 = vpop.permute.xlu0 %1153 }
 0x74a   :  { %v4034_v59 = vadd.f32 %v1154_v58, %v1147_v29 }
 0x74c   :  { %3194 = vtanh.f32 %v4034_v59 }
 0x751   :  { %v1156_v5 = vpop.permute.xlu1 %1155 }
 0x752   :  { %v4050_v40 = vadd.f32 %v1156_v5, %v1148_v19  ;;  %v3195_v32 = vpop.eup %3194  ;;  %v3070_v19 = vld [vmem:[%s4589_s2 + $0x34] sm:$0xf0] }
 0x753   :  { %v1163_v25 = vmul.f32 %v3195_v32, %v1145_v11  ;;  %v2846_v5 = vor.u32 %v3070_v19, %v2845_v49  ;;  %v2837_v32 = vld [vmem:[%s4589_s2 + $0x20] sm:$0xf]  ;;  %v3068_v11 = vld [vmem:[%s4589_s2 + $0x24] sm:$0xf0] }
 0x754   :  { %3196 = vtanh.f32 %v4050_v40 }
 0x755   :  { %v4053_v6 = vpack.c.bf16 %v1163_v25, %v1163_v25  ;;  %v3067_v25 = vld [vmem:[%s4589_s2 + $0x24] sm:$0xf]  ;;  %1381 = vmatpush.bf16.msrb.mxu0 %v2846_v5 }
 0x757   :  { %v1189_v42 = vunpack.c.l.b16 %v4053_v6 }
 0x75a   :  { %v3197_v12 = vpop.eup %3196 }
 0x75b   :  { %v1164_v26 = vmul.f32 %v3197_v12, %v1146_v41  ;;  %v2839_v41 = vld [vmem:[%s4589_s2 + $0x28] sm:$0xf0]  ;;  %v2838_v12 = vor.u32 %v3068_v11, %v2837_v32 }
 0x75d   :  { %v4055_v28 = vpack.c.bf16 %v1164_v26, %v1164_v26  ;;  %v2842_v26 = vor.u32 %v3067_v25, %v2839_v41  ;;  %1382 = vmatpush.bf16.msrb.mxu0 %v2838_v12  ;;  %v421_v25 = vadd.f32 %v3608_v14, %v3620_v20 }
 0x75f   :  { %v1190_v23 = vunpack.c.l.b16 %v4055_v28  ;;  %1396 = vmatpush.bf16.msrb.mxu1 %v2842_v26  ;;  %v409_v26 = vadd.f32 %v3613_v16, %v3617_v18 }
 0x761   :  { %v1191_v7 = vpack.c.b16 %v1190_v23, %v1189_v42  ;;  %v2829_v42 = vld [vmem:[%s4589_s2 + $0x10] sm:$0xf]  ;;  %v3066_v23 = vld [vmem:[%s4589_s2 + $0x14] sm:$0xf0] }
 0x763   :  { %1192 = vrot.lane.b32.xlu2 %v1191_v7, %s3431_s3 }
 0x7bd   :  { %v1193_v31 = vpop.permute.xlu2 %1192 }
 0x7be   :  { %2817 = vmatmul.msk.bf16.vlgmr.msra.gmra.mxu2 %vm532_vm2, %v1193_v31  ;;  %2818 = vmatmul.msk.bf16.vlgmr.msra.gmra.mxu3 %vm532_vm2, %v1193_v31 }
 0x841   :  { %v1246_v34 = vpop.f32.mrf.mxu2  ;;  %v1260_v8 = vpop.f32.mrf.mxu3 }
 0x842   :  { %v1265_v35 = vadd.f32 %v1246_v34, %v356_v43  ;;  %v1266_v38 = vadd.f32 %v1260_v8, %v370_v33  ;;  %v3065_v43 = vld [vmem:[%s4589_s2 + $0x14] sm:$0xf]  ;;  %v2831_v34 = vld [vmem:[%s4589_s2 + $0x18] sm:$0xf0]  ;;  %v2830_v33 = vor.u32 %v3066_v23, %v2829_v42 }
 0x844   :  { %v1269_v27 = vmul.f32 0.5, %v1265_v35  ;;  %v1279_v30 = vmul.f32 0.5, %v1266_v38  ;;  %1383 = vmatpush.bf16.msrb.mxu0 %v2830_v33 }
 0x846   :  { %3198 = vtanh.f32 %v1269_v27  ;;  %v2834_v27 = vor.u32 %v3065_v43, %v2831_v34 }
 0x847   :  { %3200 = vtanh.f32 %v1266_v38  ;;  %v2821_v38 = vld [vmem:[%s4589_s2] sm:$0xf] }
 0x848   :  { %1397 = vmatpush.bf16.msrb.mxu1 %v2834_v27 }
 0x849   :  { %v1248_v3 = vpop.f32.mrf.mxu2  ;;  %v1262_v56 = vpop.f32.mrf.mxu3 }
 0x84a   :  { %v1267_v29 = vadd.f32 %v1248_v3, %v358_v39  ;;  %v1268_v62 = vadd.f32 %v1262_v56, %v372_v44  ;;  %v3063_v39 = vld [vmem:[%s4589_s2 + $0x4] sm:$0xf]  ;;  %v2823_v3 = vld [vmem:[%s4589_s2 + $0x8] sm:$0xf0] }
 0x84c   :  { %v3199_v57 = vpop.eup %3198  ;;  %v1270_v58 = vmul.f32 0.5, %v1267_v29  ;;  %v1280_v7 = vmul.f32 0.5, %v1268_v62 }
 0x84d   :  { %v1273_v61 = vmul.f32 0.5, %v3199_v57  ;;  %v3201_v45 = vpop.eup %3200  ;;  %v2826_v57 = vor.u32 %v3063_v39, %v2823_v3 }
 0x84e   :  { %3202 = vtanh.f32 %v1270_v58 }
 0x84f   :  { %v1275_v63 = vadd.f32 0.5, %v1273_v61  ;;  %3204 = vtanh.f32 %v1268_v62  ;;  %1398 = vmatpush.bf16.msrb.mxu1 %v2826_v57 }
 0x850   :  { %3206 = vtanh.f32 %v1279_v30 }
 0x851   :  { %v1289_v4 = vmul.f32 %v3201_v45, %v1275_v63  ;;  %v1287_v31 = vmul.f32 %v1275_v63, %v4034_v59  ;;  %v3064_v59 = vld [vmem:[%s4589_s2 + $0x4] sm:$0xf0]  ;;  %3208 = vtanh.f32 %v1280_v7 }
 0x852   :  { %v2822_v56 = vor.u32 %v3064_v59, %v2821_v38 }
 0x853   :  { %1293 = vrot.lane.b32.xlu0 %v1289_v4, %s3431_s3 }
 0x854   :  { %v3203_v1 = vpop.eup %3202  ;;  %1384 = vmatpush.bf16.msrb.mxu0 %v2822_v56 }
 0x855   :  { %v1274_v46 = vmul.f32 0.5, %v3203_v1  ;;  %v3205_v15 = vpop.eup %3204 }
 0x856   :  { %v3207_v29 = vpop.eup %3206 }
 0x857   :  { %v1276_v2 = vadd.f32 0.5, %v1274_v46  ;;  %v1283_v58 = vmul.f32 0.5, %v3207_v29  ;;  %v3209_v62 = vpop.eup %3208  ;;  %v3094_v29 = vld [vmem:[%s4591_s4 + $0x34] sm:$0xf0] }
 0x858   :  { %v1284_v1 = vmul.f32 0.5, %v3209_v62  ;;  %v2946_v56 = vor.u32 %v3094_v29, %v2945_v17  ;;  %v2939_v62 = vld [vmem:[%s4591_s4 + $0x28] sm:$0xf0]  ;;  %v2855_v29 = vld [vmem:[%s4589_s2] sm:$0xf] }
 0x859   :  { %v1290_v9 = vmul.f32 %v3205_v15, %v1276_v2  ;;  %v1288_v44 = vmul.f32 %v1276_v2, %v4050_v40  ;;  %v1285_v4 = vadd.f32 0.5, %v1283_v58  ;;  %v3091_v58 = vld [vmem:[%s4591_s4 + $0x24] sm:$0xf] }
 0x85a   :  { %v1286_v15 = vadd.f32 0.5, %v1284_v1  ;;  %1735 = vmatpush.bf16.msra.mxu0 %v2946_v56  ;;  %v3090_v1 = vld [vmem:[%s4591_s4 + $0x14] sm:$0xf0]  ;;  %v3071_v56 = vld [vmem:[%s4589_s2 + $0x4] sm:$0xf] }
 0x85b   :  { %1295 = vrot.lane.b32.xlu1 %v1290_v9, %s3431_s3 }
 0x8c5   :  { %v1294_v8 = vpop.permute.xlu0 %1293 }
 0x8c6   :  { %v4109_v35 = vadd.f32 %v1294_v8, %v1287_v31 }
 0x8c8   :  { %3210 = vtanh.f32 %v4109_v35 }
 0x8cd   :  { %v1296_v61 = vpop.permute.xlu1 %1295 }
 0x8ce   :  { %v4125_v63 = vadd.f32 %v1296_v61, %v1288_v44  ;;  %v3211_v45 = vpop.eup %3210  ;;  %v3092_v44 = vld [vmem:[%s4591_s4 + $0x24] sm:$0xf0] }
 0x8cf   :  { %v1303_v46 = vmul.f32 %v3211_v45, %v1285_v4  ;;  %v2942_v45 = vor.u32 %v3091_v58, %v2939_v62  ;;  %v2929_v4 = vld [vmem:[%s4591_s4 + $0x10] sm:$0xf] }
 0x8d0   :  { %3212 = vtanh.f32 %v4125_v63 }
 0x8d1   :  { %v4128_v49 = vpack.c.bf16 %v1303_v46, %v1303_v46  ;;  %v3089_v46 = vld [vmem:[%s4591_s4 + $0x14] sm:$0xf] }
 0x8d3   :  { %v1329_v40 = vunpack.c.l.b16 %v4128_v49 }
 0x8d6   :  { %v3213_v9 = vpop.eup %3212 }
 0x8d7   :  { %v1304_v30 = vmul.f32 %v3213_v9, %v1286_v15  ;;  %v2930_v15 = vor.u32 %v3090_v1, %v2929_v4  ;;  %v2931_v9 = vld [vmem:[%s4591_s4 + $0x18] sm:$0xf0] }
 0x8d9   :  { %v4130_v19 = vpack.c.bf16 %v1304_v30, %v1304_v30  ;;  %v2921_v30 = vld [vmem:[%s4591_s4] sm:$0xf] }
 0x8db   :  { %v1330_v2 = vunpack.c.l.b16 %v4130_v19 }
 0x8dd   :  { %v1331_v60 = vpack.c.b16 %v1330_v2, %v1329_v40  ;;  %v3088_v40 = vld [vmem:[%s4591_s4 + $0x4] sm:$0xf0]  ;;  %v2934_v2 = vor.u32 %v3089_v46, %v2931_v9 }
 0x8df   :  { %1332 = vrot.lane.b32.xlu2 %v1331_v60, %s3431_s3  ;;  %v3087_v60 = vld [vmem:[%s4591_s4 + $0x4] sm:$0xf] }
 0x939   :  { %v1333_v5 = vpop.permute.xlu2 %1332 }
 0x93a   :  { %2851 = vmatmul.msk.bf16.vlgmr.msrb.gmra.mxu0 %vm532_vm2, %v1333_v5  ;;  %2852 = vmatmul.msk.bf16.vlgmr.msrb.gmra.mxu1 %vm532_vm2, %v1333_v5  ;;  %v2923_v5 = vld [vmem:[%s4591_s4 + $0x8] sm:$0xf0] }
 0x9b7   :  { %v1386_v32 = vpop.f32.mrf.mxu0  ;;  %v1400_v11 = vpop.f32.mrf.mxu1 }
 0x9b8   :  { %v1405_v24 = vadd.f32 %v1386_v32, %v407_v10  ;;  %v1406_v12 = vadd.f32 %v1400_v11, %v421_v25  ;;  %v2922_v10 = vor.u32 %v3088_v40, %v2921_v30  ;;  %v2926_v32 = vor.u32 %v3087_v60, %v2923_v5  ;;  %v3078_v25 = vld [vmem:[%s4589_s2 + $0x34] sm:$0xf0] }
 0x9ba   :  { %v1409_v41 = vmul.f32 0.5, %v1405_v24  ;;  %v1419_v11 = vmul.f32 0.5, %v1406_v12  ;;  %v2879_v24 = vld [vmem:[%s4589_s2 + $0x30] sm:$0xf] }
 0x9bc   :  { %3214 = vtanh.f32 %v1409_v41  ;;  %v3077_v41 = vld [vmem:[%s4589_s2 + $0x34] sm:$0xf] }
 0x9bd   :  { %3216 = vtanh.f32 %v1406_v12  ;;  %v2871_v12 = vld [vmem:[%s4589_s2 + $0x20] sm:$0xf] }
 0x9bf   :  { %v1388_v42 = vpop.f32.mrf.mxu0  ;;  %v1402_v7 = vpop.f32.mrf.mxu1 }
 0x9c0   :  { %v1407_v23 = vadd.f32 %v1388_v42, %v409_v26  ;;  %v1408_v8 = vadd.f32 %v1402_v7, %v423_v13  ;;  %v2880_v26 = vor.u32 %v3078_v25, %v2879_v24  ;;  %v2881_v42 = vld [vmem:[%s4589_s2 + $0x38] sm:$0xf0]  ;;  %v2873_v13 = vld [vmem:[%s4589_s2 + $0x28] sm:$0xf0] }
 0x9c1   :  { %v2884_v7 = vor.u32 %v3077_v41, %v2881_v42  ;;  %v2993_v41 = vld [vmem:[#allocation4 + $0x30] sm:$0xf]  ;;  %v3101_v42 = vld [vmem:[#allocation4 + $0x34] sm:$0xf] }
 0x9c2   :  { %v3215_v31 = vpop.eup %3214  ;;  %v1410_v43 = vmul.f32 0.5, %v1407_v23  ;;  %v3076_v23 = vld [vmem:[%s4589_s2 + $0x24] sm:$0xf0]  ;;  %1521 = vmatpush.bf16.msrb.mxu2 %v2880_v26  ;;  %v3102_v26 = vld [vmem:[#allocation4 + $0x34] sm:$0xf0] }
 0x9c3   :  { %v1413_v34 = vmul.f32 0.5, %v3215_v31  ;;  %v3217_v14 = vpop.eup %3216  ;;  %v3075_v31 = vld [vmem:[%s4589_s2 + $0x24] sm:$0xf]  ;;  %1535 = vmatpush.bf16.msrb.mxu3 %v2884_v7  ;;  %v2985_v7 = vld [vmem:[#allocation4 + $0x20] sm:$0xf] }
 0x9c4   :  { %3218 = vtanh.f32 %v1410_v43  ;;  %v2872_v43 = vor.u32 %v3076_v23, %v2871_v12  ;;  %v4273_v12 = vor.u32 %v3102_v26, %v2993_v41  ;;  %v2995_v23 = vld [vmem:[#allocation4 + $0x38] sm:$0xf0] }
 0x9c5   :  { %v1415_v33 = vadd.f32 0.5, %v1413_v34  ;;  %3220 = vtanh.f32 %v1408_v8  ;;  %v1420_v34 = vmul.f32 0.5, %v1408_v8  ;;  %v2865_v8 = vld [vmem:[%s4589_s2 + $0x18] sm:$0xf0] }
 0x9c6   :  { %3222 = vtanh.f32 %v1419_v11  ;;  %1522 = vmatpush.bf16.msrb.mxu2 %v2872_v43  ;;  %v3099_v43 = vld [vmem:[#allocation4 + $0x24] sm:$0xf] }
 0x9c7   :  { %v1429_v27 = vmul.f32 %v3217_v14, %v1415_v33  ;;  %v1427_v14 = vmul.f32 %v1415_v33, %v4109_v35  ;;  %3224 = vtanh.f32 %v1420_v34  ;;  %v2987_v34 = vld [vmem:[#allocation4 + $0x28] sm:$0xf0] }
 0x9c9   :  { %1433 = vrot.lane.b32.xlu0 %v1429_v27, %s3431_s3  ;;  %v2876_v27 = vor.u32 %v3075_v31, %v2873_v13  ;;  %v3100_v31 = vld [vmem:[#allocation4 + $0x24] sm:$0xf0]  ;;  %v4275_v13 = vor.u32 %v3101_v42, %v2995_v23 }
 0x9ca   :  { %v3219_v38 = vpop.eup %3218 }
 0x9cb   :  { %v1414_v16 = vmul.f32 0.5, %v3219_v38  ;;  %v3221_v39 = vpop.eup %3220  ;;  %v2863_v38 = vld [vmem:[%s4589_s2 + $0x10] sm:$0xf]  ;;  %1536 = vmatpush.bf16.msrb.mxu3 %v2876_v27  ;;  %v4281_v27 = vor.u32 %v3099_v43, %v2987_v34 }
 0x9cd   :  { %v4146_v59 = vadd.f32 0.5, %v1414_v16  ;;  %v3074_v16 = vld [vmem:[%s4589_s2 + $0x14] sm:$0xf0] }
 0x9ce   :  { %v2864_v33 = vor.u32 %v3074_v16, %v2863_v38  ;;  %v2977_v38 = vld [vmem:[#allocation4 + $0x10] sm:$0xf]  ;;  %v3098_v16 = vld [vmem:[#allocation4 + $0x14] sm:$0xf0] }
 0x9cf   :  { %v1430_v3 = vmul.f32 %v3221_v39, %v4146_v59 }
 0x9d0   :  { %1523 = vmatpush.bf16.msrb.mxu2 %v2864_v33 }
 0x9d1   :  { %608 = vrot.lane.b32.xlu0 %v3667_v47, %s3431_s3  ;;  %1435 = vrot.lane.b32.xlu1 %v1430_v3, %s3431_s3  ;;  %v3093_v47 = vld [vmem:[%s4591_s4 + $0x34] sm:$0xf] }
 0x9d2   :  { %v3073_v3 = vld [vmem:[%s4589_s2 + $0x14] sm:$0xf] }
 0x9d3   :  { %v2868_v17 = vor.u32 %v3073_v3, %v2865_v8  ;;  %v2979_v3 = vld [vmem:[#allocation4 + $0x18] sm:$0xf0]  ;;  %v4284_v8 = vor.u32 %v3098_v16, %v2977_v38 }
 0x9d5   :  { %1537 = vmatpush.bf16.msrb.mxu3 %v2868_v17  ;;  %v2969_v17 = vld [vmem:[#allocation4] sm:$0xf] }
 0x9d9   :  { %610 = vrot.lane.b32.xlu1 %v3671_v48, %s3431_s3  ;;  %v2947_v48 = vld [vmem:[%s4591_s4 + $0x38] sm:$0xf0] }
 0x9da   :  { %v2950_v57 = vor.u32 %v3093_v47, %v2947_v48  ;;  %v3072_v47 = vld [vmem:[%s4589_s2 + $0x4] sm:$0xf0]  ;;  %v2857_v48 = vld [vmem:[%s4589_s2 + $0x8] sm:$0xf0] }
 0x9db   :  { %v2860_v58 = vor.u32 %v3071_v56, %v2857_v48  ;;  %v2971_v56 = vld [vmem:[#allocation4 + $0x8] sm:$0xf0] }
 0x9dc   :  { %1784 = vmatpush.bf16.msra.mxu1 %v2950_v57  ;;  %v3223_v57 = vpop.eup %3222 }
 0x9dd   :  { %v3225_v4 = vpop.eup %3224  ;;  %1538 = vmatpush.bf16.msrb.mxu3 %v2860_v58 }
 0x9de   :  { %v1424_v9 = vmul.f32 0.5, %v3225_v4 }
 0x9e0   :  { %1785 = vmatpush.bf16.msra.mxu1 %v2942_v45  ;;  %v1426_v40 = vadd.f32 0.5, %v1424_v9 }
 0x9e1   :  { %749 = vrot.lane.b32.xlu1 %v3830_v55, %s3431_s3  ;;  %v2937_v55 = vld [vmem:[%s4591_s4 + $0x20] sm:$0xf]  ;;  %1931 = vmatpush.bf16.msra.mxu3 %v4275_v13 }
 0x9e2   :  { %v2938_v61 = vor.u32 %v3092_v44, %v2937_v55  ;;  %v2856_v55 = vor.u32 %v3072_v47, %v2855_v29  ;;  %v1428_v44 = vmul.f32 %v4146_v59, %v4125_v63  ;;  %v3096_v29 = vld [vmem:[#allocation4 + $0x4] sm:$0xf0]  ;;  %v3095_v47 = vld [vmem:[#allocation4 + $0x4] sm:$0xf] }
 0x9e3   :  { %v4290_v48 = vor.u32 %v3096_v29, %v2969_v17 }
 0x9e4   :  { %1736 = vmatpush.bf16.msra.mxu0 %v2938_v61  ;;  %1786 = vmatpush.bf16.msra.mxu1 %v2934_v2  ;;  %v1423_v61 = vmul.f32 0.5, %v3223_v57  ;;  %v4293_v57 = vor.u32 %v3095_v47, %v2971_v56 }
 0x9e5   :  { %1524 = vmatpush.bf16.msrb.mxu2 %v2856_v55  ;;  %1932 = vmatpush.bf16.msra.mxu3 %v4281_v27 }
 0x9e8   :  { %1737 = vmatpush.bf16.msra.mxu0 %v2930_v15  ;;  %1787 = vmatpush.bf16.msra.mxu1 %v2926_v32  ;;  %v1425_v15 = vadd.f32 0.5, %v1423_v61 }
 0x9e9   :  { %1917 = vmatpush.bf16.msra.mxu2 %v4273_v12 }
 0x9ec   :  { %1738 = vmatpush.bf16.msra.mxu0 %v2922_v10 }
 0xa3b   :  { %v1434_v39 = vpop.permute.xlu0 %1433 }
 0xa3c   :  { %v4241_v35 = vadd.f32 %v1434_v39, %v1427_v14  ;;  %v4278_v14 = vor.u32 %v3100_v31, %v2985_v7  ;;  %v3097_v39 = vld [vmem:[#allocation4 + $0x14] sm:$0xf] }
 0xa3d   :  { %v4287_v33 = vor.u32 %v3097_v39, %v2979_v3 }
 0xa3e   :  { %3226 = vtanh.f32 %v4241_v35  ;;  %1918 = vmatpush.bf16.msra.mxu2 %v4278_v14 }
 0xa3f   :  { %1933 = vmatpush.bf16.msra.mxu3 %v4287_v33 }
 0xa42   :  { %1919 = vmatpush.bf16.msra.mxu2 %v4284_v8 }
 0xa43   :  { %v609_v62 = vpop.permute.xlu0 %608  ;;  %v1436_v45 = vpop.permute.xlu1 %1435  ;;  %1934 = vmatpush.bf16.msra.mxu3 %v4293_v57 }
 0xa44   :  { %615 = vst.msk [vmem:[#allocation3] sm:$0xf] %vm614_vm3, %v609_v62  ;;  %v4259_v1 = vadd.f32 %v1436_v45, %v1428_v44  ;;  %v3227_v46 = vpop.eup %3226  ;;  %v458_v44 = vadd.f32 %v3758_v50, %v3617_v18 }
 0xa45   :  { %v1443_v30 = vmul.f32 %v3227_v46, %v1425_v15  ;;  %v460_v46 = vadd.f32 %v3762_v52, %v3617_v18  ;;  %v1621_v15 = vld [vmem:[%s4593_s6] sm:$0x3] }
 0xa46   :  { %3228 = vtanh.f32 %v4259_v1  ;;  %1920 = vmatpush.bf16.msra.mxu2 %v4290_v48 }
 0xa47   :  { %v4263_v60 = vpack.c.bf16 %v1443_v30, %v1443_v30 }
 0xa49   :  { %v1469_v10 = vunpack.c.l.b16 %v4263_v60 }
 0xa4b   :  { %v611_v63 = vpop.permute.xlu1 %610 }
 0xa4c   :  { %v3229_v59 = vpop.eup %3228  ;;  %616 = vst.msk [vmem:[#allocation3 + $0x4] sm:$0xf] %vm614_vm3, %v611_v63  ;;  %v474_v63 = vadd.f32 %v3764_v53, %v3620_v20 }
 0xa4d   :  { %v1444_v2 = vmul.f32 %v3229_v59, %v1426_v40  ;;  %v4331_v59 = vperm.slane %v1621_v15, 0 }
 0xa4f   :  { %v4265_v5 = vpack.c.bf16 %v1444_v2, %v1444_v2 }
 0xa51   :  { %v1470_v32 = vunpack.c.l.b16 %v4265_v5 }
 0xa53   :  { %v750_v11 = vpop.permute.xlu1 %749  ;;  %v1471_v24 = vpack.c.b16 %v1470_v32, %v1469_v10  ;;  %v3079_v25 = vld [vmem:[#allocation3] sm:$0xff] }
 0xa54   :  { %755 = vst.msk [vmem:[#allocation3 + $0x8] sm:$0xf] %vm614_vm3, %v750_v11  ;;  %2951 = vmatmul.msk.bf16.vlgmr.msra.gmra.mxu0 %vm532_vm2, %v3079_v25  ;;  %2959 = vmatmul.msk.bf16.vlgmr.msra.gmra.mxu1 %vm532_vm2, %v3079_v25  ;;  %v4338_v25 = vperm.slane %v1621_v15, 1 }
 0xa55   :  { %1472 = vrot.lane.b32.xlu2 %v1471_v24, %s3431_s3 }
 0xaaf   :  { %v1473_v55 = vpop.permute.xlu2 %1472 }
 0xab0   :  { %2885 = vmatmul.msk.bf16.vlgmr.msrb.gmra.mxu2 %vm532_vm2, %v1473_v55  ;;  %2886 = vmatmul.msk.bf16.vlgmr.msrb.gmra.mxu3 %vm532_vm2, %v1473_v55 }
 0xab1   :  { %1996 = vmatpush.bf16.msrb.mxu2 %v4273_v12  ;;  %2010 = vmatpush.bf16.msrb.mxu3 %v4275_v13 }
 0xab5   :  { %1997 = vmatpush.bf16.msrb.mxu2 %v4278_v14  ;;  %2011 = vmatpush.bf16.msrb.mxu3 %v4281_v27 }
 0xab9   :  { %1998 = vmatpush.bf16.msrb.mxu2 %v4284_v8  ;;  %2012 = vmatpush.bf16.msrb.mxu3 %v4287_v33 }
 0xabd   :  { %1999 = vmatpush.bf16.msrb.mxu2 %v4290_v48  ;;  %2013 = vmatpush.bf16.msrb.mxu3 %v4293_v57 }
 0xac0   :  { %1921 = vmatmul.bf16.vlgmr.msra.gmra.mxu2 %v3430_v0  ;;  %1935 = vmatmul.bf16.vlgmr.msra.gmra.mxu3 %v3430_v0  ;;  %v472_v0 = vadd.f32 %v3760_v51, %v3620_v20 }
 0xac1   :  { %2075 = vmatpush.bf16.msra.mxu2 %v4273_v12  ;;  %2089 = vmatpush.bf16.msra.mxu3 %v4275_v13 }
 0xac5   :  { %2076 = vmatpush.bf16.msra.mxu2 %v4278_v14  ;;  %2090 = vmatpush.bf16.msra.mxu3 %v4281_v27 }
 0xac9   :  { %2077 = vmatpush.bf16.msra.mxu2 %v4284_v8  ;;  %2091 = vmatpush.bf16.msra.mxu3 %v4287_v33 }
 0xacd   :  { %2078 = vmatpush.bf16.msra.mxu2 %v4290_v48  ;;  %2092 = vmatpush.bf16.msra.mxu3 %v4293_v57 }
 0xad1   :  { %v1740_v51 = vpop.f32.mrf.mxu0  ;;  %v1789_v52 = vpop.f32.mrf.mxu1 }
 0xad2   :  { %v1741_v24 = vadd.f32 %v1740_v51, %v4331_v59  ;;  %v1790_v23 = vadd.f32 %v1789_v52, %v4338_v25 }
 0xad9   :  { %v1742_v31 = vpop.f32.mrf.mxu0  ;;  %v1791_v3 = vpop.f32.mrf.mxu1 }
 0xada   :  { %v1743_v39 = vadd.f32 %v1742_v31, %v4331_v59 }
 0xb33   :  { %v1526_v58 = vpop.f32.mrf.mxu2  ;;  %v1540_v61 = vpop.f32.mrf.mxu3 }
 0xb34   :  { %v1545_v62 = vadd.f32 %v1526_v58, %v458_v44  ;;  %v4321_v45 = vadd.f32 %v1540_v61, %v472_v0  ;;  %v1792_v44 = vadd.f32 %v1791_v3, %v4338_v25 }
 0xb36   :  { %v1549_v4 = vmul.f32 0.5, %v1545_v62 }
 0xb38   :  { %3230 = vtanh.f32 %v1549_v4 }
 0xb39   :  { %3232 = vtanh.f32 %v4321_v45 }
 0xb3b   :  { %v1528_v9 = vpop.f32.mrf.mxu2  ;;  %v1542_v30 = vpop.f32.mrf.mxu3 }
 0xb3c   :  { %v1547_v50 = vadd.f32 %v1528_v9, %v460_v46  ;;  %v4333_v18 = vadd.f32 %v1542_v30, %v474_v63 }
 0xb3e   :  { %v3231_v40 = vpop.eup %3230  ;;  %v1550_v2 = vmul.f32 0.5, %v1547_v50 }
 0xb3f   :  { %v1553_v10 = vmul.f32 0.5, %v3231_v40  ;;  %v3233_v11 = vpop.eup %3232 }
 0xb40   :  { %3234 = vtanh.f32 %v1550_v2 }
 0xb41   :  { %v4335_v32 = vadd.f32 0.5, %v1553_v10  ;;  %3236 = vtanh.f32 %v4333_v18 }
 0xb43   :  { %v1922_v41 = vpop.f32.mrf.mxu2  ;;  %v1936_v26 = vpop.f32.mrf.mxu3  ;;  %v4341_v42 = vmul.f32 %v3233_v11, %v4335_v32 }
 0xb44   :  { %v1941_v20 = vadd.f32 %v1922_v41, %v1741_v24  ;;  %v1942_v34 = vadd.f32 %v1936_v26, %v1790_v23 }
 0xb46   :  { %v3235_v53 = vpop.eup %3234  ;;  %v1945_v7 = vmul.f32 0.5, %v1941_v20  ;;  %v1955_v10 = vmul.f32 0.5, %v1942_v34 }
 0xb47   :  { %v1554_v43 = vmul.f32 0.5, %v3235_v53  ;;  %v3237_v16 = vpop.eup %3236 }
 0xb48   :  { %3238 = vtanh.f32 %v1945_v7 }
 0xb49   :  { %v4345_v38 = vadd.f32 0.5, %v1554_v43  ;;  %3240 = vtanh.f32 %v1942_v34 }
 0xb4b   :  { %v1924_v17 = vpop.f32.mrf.mxu2  ;;  %v4349_v29 = vmul.f32 %v3237_v16, %v4345_v38  ;;  %v1938_v56 = vpop.f32.mrf.mxu3 }
 0xb4c   :  { %v1943_v47 = vadd.f32 %v1924_v17, %v1743_v39  ;;  %v1944_v61 = vadd.f32 %v1938_v56, %v1792_v44 }
 0xb4e   :  { %v3239_v55 = vpop.eup %3238  ;;  %v1946_v0 = vmul.f32 0.5, %v1943_v47  ;;  %v1956_v52 = vmul.f32 0.5, %v1944_v61 }
 0xb4f   :  { %v1949_v58 = vmul.f32 0.5, %v3239_v55  ;;  %v3241_v4 = vpop.eup %3240 }
 0xb50   :  { %3242 = vtanh.f32 %v1946_v0 }
 0xb51   :  { %v1951_v62 = vadd.f32 0.5, %v1949_v58  ;;  %3244 = vtanh.f32 %v1944_v61 }
 0xb52   :  { %3246 = vtanh.f32 %v1955_v10 }
 0xb53   :  { %v1965_v46 = vmul.f32 %v3241_v4, %v1951_v62  ;;  %3248 = vtanh.f32 %v1956_v52  ;;  %v1963_v11 = vmul.f32 0.0, %v1951_v62 }
 0xb55   :  { %1969 = vrot.lane.b32.xlu2 %v1965_v46, %s3431_s3 }
 0xb56   :  { %v3243_v15 = vpop.eup %3242 }
 0xb57   :  { %v1950_v9 = vmul.f32 0.5, %v3243_v15  ;;  %v3245_v50 = vpop.eup %3244 }
 0xb59   :  { %v1952_v30 = vadd.f32 0.5, %v1950_v9 }
 0xb5b   :  { %v1966_v51 = vmul.f32 %v3245_v50, %v1952_v30  ;;  %v1964_v41 = vmul.f32 0.0, %v1952_v30 }
 0xb5d   :  { %751 = vrot.lane.b32.xlu2 %v3828_v54, %s3431_s3  ;;  %1971 = vrot.lane.b32.xlu0 %v1966_v51, %s3431_s3  ;;  %v3247_v54 = vpop.eup %3246 }
 0xb5e   :  { %v3249_v20 = vpop.eup %3248  ;;  %v1959_v23 = vmul.f32 0.5, %v3247_v54 }
 0xb5f   :  { %v1960_v7 = vmul.f32 0.5, %v3249_v20 }
 0xb60   :  { %v1961_v43 = vadd.f32 0.5, %v1959_v23 }
 0xb61   :  { %v1962_v34 = vadd.f32 0.5, %v1960_v7 }
 0xbaf   :  { %v1970_v40 = vpop.permute.xlu2 %1969 }
 0xbb0   :  { %v4359_v24 = vadd.f32 %v1970_v40, %v1963_v11 }
 0xbb2   :  { %3250 = vtanh.f32 %v4359_v24 }
 0xbb7   :  { %v752_v63 = vpop.permute.xlu2 %751 }
 0xbb8   :  { %756 = vst.msk [vmem:[#allocation3 + $0xc] sm:$0xf] %vm614_vm3, %v752_v63  ;;  %v3251_v31 = vpop.eup %3250 }
 0xbb9   :  { %v1979_v39 = vmul.f32 %v3251_v31, %v1961_v43 }
 0xbbf   :  { %v3080_v2 = vld [vmem:[#allocation3 + $0x8] sm:$0xff] }
 0xbc0   :  { %2952 = vmatmul.msk.bf16.gmra.mxu0 %vm532_vm2, %v3080_v2  ;;  %2960 = vmatmul.msk.bf16.gmra.mxu1 %vm532_vm2, %v3080_v2 }
 0xbcf   :  { %v1972_v26 = vpop.permute.xlu0 %1971 }
 0xbd0   :  { %v4362_v53 = vadd.f32 %v1972_v26, %v1964_v41 }
 0xbd2   :  { %3252 = vtanh.f32 %v4362_v53 }
 0xbd8   :  { %v3253_v16 = vpop.eup %3252 }
 0xbd9   :  { %v1980_v3 = vmul.f32 %v3253_v16, %v1962_v34 }
 0xbdb   :  { %v1985_v17 = vpack.c.bf16 %v1980_v3, %v1979_v39 }
 0xbdd   :  { %1987 = vrot.lane.b32.xlu0 %v1985_v17, %s3431_s3 }
 0xbe5   :  { %889 = vrot.lane.b32.xlu0 %v3903_v21, %s3431_s3 }
 0xc3d   :  { %v1745_v21 = vpop.f32.mrf.mxu0  ;;  %v1794_v55 = vpop.f32.mrf.mxu1 }
 0xc3e   :  { %v1746_v44 = vadd.f32 %v1745_v21, %v4331_v59  ;;  %v1795_v62 = vadd.f32 %v1794_v55, %v4338_v25 }
 0xc45   :  { %v1747_v46 = vpop.f32.mrf.mxu0  ;;  %v1796_v30 = vpop.f32.mrf.mxu1 }
 0xc46   :  { %v1748_v9 = vadd.f32 %v1747_v46, %v4331_v59  ;;  %v1797_v2 = vadd.f32 %v1796_v30, %v4338_v25 }
 0xc4f   :  { %v1988_v47 = vpop.permute.xlu0 %1987 }
 0xc50   :  { %2999 = vmatmul.msk.bf16.vlgmr.msrb.gmra.mxu2 %vm532_vm2, %v1988_v47  ;;  %3000 = vmatmul.msk.bf16.vlgmr.msrb.gmra.mxu3 %vm532_vm2, %v1988_v47 }
 0xc51   :  { %2154 = vmatpush.bf16.msrb.mxu2 %v4273_v12  ;;  %2168 = vmatpush.bf16.msrb.mxu3 %v4275_v13 }
 0xc55   :  { %2155 = vmatpush.bf16.msrb.mxu2 %v4278_v14  ;;  %2169 = vmatpush.bf16.msrb.mxu3 %v4281_v27 }
 0xc57   :  { %v890_v56 = vpop.permute.xlu0 %889 }
 0xc58   :  { %895 = vst.msk [vmem:[#allocation3 + $0x10] sm:$0xf] %vm614_vm3, %v890_v56 }
 0xc59   :  { %2156 = vmatpush.bf16.msrb.mxu2 %v4284_v8  ;;  %2170 = vmatpush.bf16.msrb.mxu3 %v4287_v33 }
 0xc5d   :  { %2157 = vmatpush.bf16.msrb.mxu2 %v4290_v48  ;;  %2171 = vmatpush.bf16.msrb.mxu3 %v4293_v57 }
 0xcd3   :  { %v2001_v0 = vpop.f32.mrf.mxu2  ;;  %v2015_v58 = vpop.f32.mrf.mxu3 }
 0xcd4   :  { %v2020_v61 = vadd.f32 %v2001_v0, %v1746_v44  ;;  %v2021_v15 = vadd.f32 %v2015_v58, %v1795_v62 }
 0xcd6   :  { %v2024_v4 = vmul.f32 0.5, %v2020_v61  ;;  %v2034_v34 = vmul.f32 0.5, %v2021_v15 }
 0xcd8   :  { %3254 = vtanh.f32 %v2024_v4 }
 0xcd9   :  { %3256 = vtanh.f32 %v2021_v15 }
 0xcdb   :  { %v2003_v50 = vpop.f32.mrf.mxu2  ;;  %v2017_v40 = vpop.f32.mrf.mxu3 }
 0xcdc   :  { %v2022_v51 = vadd.f32 %v2003_v50, %v1748_v9  ;;  %v2023_v11 = vadd.f32 %v2017_v40, %v1797_v2 }
 0xcde   :  { %v3255_v63 = vpop.eup %3254  ;;  %v2025_v10 = vmul.f32 0.5, %v2022_v51  ;;  %v2035_v16 = vmul.f32 0.5, %v2023_v11 }
 0xcdf   :  { %v2028_v52 = vmul.f32 0.5, %v3255_v63  ;;  %v3257_v54 = vpop.eup %3256 }
 0xce0   :  { %3258 = vtanh.f32 %v2025_v10 }
 0xce1   :  { %v2030_v41 = vadd.f32 0.5, %v2028_v52  ;;  %3260 = vtanh.f32 %v2023_v11 }
 0xce2   :  { %3262 = vtanh.f32 %v2034_v34 }
 0xce3   :  { %v2044_v26 = vmul.f32 %v3257_v54, %v2030_v41  ;;  %3264 = vtanh.f32 %v2035_v16  ;;  %v2042_v47 = vmul.f32 %v2030_v41, %v4359_v24 }
 0xce5   :  { %2048 = vrot.lane.b32.xlu1 %v2044_v26, %s3431_s3 }
 0xce6   :  { %v3259_v20 = vpop.eup %3258 }
 0xce7   :  { %v2029_v23 = vmul.f32 0.5, %v3259_v20  ;;  %v3261_v31 = vpop.eup %3260 }
 0xce8   :  { %v3263_v56 = vpop.eup %3262 }
 0xce9   :  { %v2031_v7 = vadd.f32 0.5, %v2029_v23  ;;  %v3265_v55 = vpop.eup %3264 }
 0xcea   :  { %v2039_v0 = vmul.f32 0.5, %v3265_v55 }
 0xceb   :  { %v2045_v43 = vmul.f32 %v3261_v31, %v2031_v7  ;;  %v2043_v3 = vmul.f32 %v2031_v7, %v4362_v53 }
 0xcec   :  { %v2041_v62 = vadd.f32 0.5, %v2039_v0 }
 0xced   :  { %891 = vrot.lane.b32.xlu1 %v3905_v22, %s3431_s3  ;;  %2050 = vrot.lane.b32.xlu2 %v2045_v43, %s3431_s3  ;;  %v2038_v22 = vmul.f32 0.5, %v3263_v56 }
 0xcef   :  { %v2040_v61 = vadd.f32 0.5, %v2038_v22 }
 0xd47   :  { %v2051_v39 = vpop.permute.xlu2 %2050 }
 0xd48   :  { %v4388_v17 = vadd.f32 %v2051_v39, %v2043_v3 }
 0xd4a   :  { %3266 = vtanh.f32 %v4388_v17 }
 0xd50   :  { %v3267_v58 = vpop.eup %3266 }
 0xd51   :  { %v2059_v24 = vmul.f32 %v3267_v58, %v2041_v62 }
 0xd57   :  { %v2049_v21 = vpop.permute.xlu1 %2048 }
 0xd58   :  { %v4392_v44 = vadd.f32 %v2049_v21, %v2042_v47 }
 0xd5a   :  { %3268 = vtanh.f32 %v4392_v44 }
 0xd5f   :  { %v892_v4 = vpop.permute.xlu1 %891 }
 0xd60   :  { %v3269_v53 = vpop.eup %3268  ;;  %896 = vst.msk [vmem:[#allocation3 + $0x14] sm:$0xf] %vm614_vm3, %v892_v4 }
 0xd61   :  { %v2058_v46 = vmul.f32 %v3269_v53, %v2040_v61 }
 0xd63   :  { %v2064_v15 = vpack.c.bf16 %v2059_v24, %v2058_v46 }
 0xd65   :  { %2066 = vrot.lane.b32.xlu2 %v2064_v15, %s3431_s3 }
 0xd67   :  { %v3081_v9 = vld [vmem:[#allocation3 + $0x10] sm:$0xff] }
 0xd68   :  { %2953 = vmatmul.msk.bf16.gmra.mxu0 %vm532_vm2, %v3081_v9  ;;  %2961 = vmatmul.msk.bf16.gmra.mxu1 %vm532_vm2, %v3081_v9 }
 0xd6d   :  { %1029 = vrot.lane.b32.xlu2 %v3978_v36, %s3431_s3 }
 0xdbf   :  { %v2067_v30 = vpop.permute.xlu2 %2066 }
 0xdc0   :  { %3001 = vmatmul.msk.bf16.vlgmr.msra.gmra.mxu2 %vm532_vm2, %v2067_v30  ;;  %3002 = vmatmul.msk.bf16.vlgmr.msra.gmra.mxu3 %vm532_vm2, %v2067_v30 }
 0xdc1   :  { %2233 = vmatpush.bf16.msra.mxu2 %v4273_v12  ;;  %2247 = vmatpush.bf16.msra.mxu3 %v4275_v13 }
 0xdc5   :  { %2234 = vmatpush.bf16.msra.mxu2 %v4278_v14  ;;  %2248 = vmatpush.bf16.msra.mxu3 %v4281_v27 }
 0xdc7   :  { %v1030_v50 = vpop.permute.xlu2 %1029 }
 0xdc8   :  { %1035 = vst.msk [vmem:[#allocation3 + $0x18] sm:$0xf] %vm614_vm3, %v1030_v50 }
 0xdc9   :  { %2235 = vmatpush.bf16.msra.mxu2 %v4284_v8  ;;  %2249 = vmatpush.bf16.msra.mxu3 %v4287_v33 }
 0xdcd   :  { %2236 = vmatpush.bf16.msra.mxu2 %v4290_v48  ;;  %2250 = vmatpush.bf16.msra.mxu3 %v4293_v57 }
 0xde5   :  { %v1750_v36 = vpop.f32.mrf.mxu0  ;;  %v1799_v51 = vpop.f32.mrf.mxu1 }
 0xde6   :  { %v1751_v40 = vadd.f32 %v1750_v36, %v4331_v59  ;;  %v1800_v52 = vadd.f32 %v1799_v51, %v4338_v25 }
 0xded   :  { %v1752_v41 = vpop.f32.mrf.mxu0  ;;  %v1801_v20 = vpop.f32.mrf.mxu1 }
 0xdee   :  { %v1753_v26 = vadd.f32 %v1752_v41, %v4331_v59  ;;  %v1802_v34 = vadd.f32 %v1801_v20, %v4338_v25 }
 0xe43   :  { %v2080_v63 = vpop.f32.mrf.mxu2  ;;  %v2094_v2 = vpop.f32.mrf.mxu3 }
 0xe44   :  { %v2099_v10 = vadd.f32 %v2080_v63, %v1751_v40  ;;  %v2100_v54 = vadd.f32 %v2094_v2, %v1800_v52 }
 0xe46   :  { %v2103_v11 = vmul.f32 0.5, %v2099_v10  ;;  %v2113_v62 = vmul.f32 0.5, %v2100_v54 }
 0xe48   :  { %3270 = vtanh.f32 %v2103_v11 }
 0xe49   :  { %3272 = vtanh.f32 %v2100_v54 }
 0xe4b   :  { %v2082_v23 = vpop.f32.mrf.mxu2  ;;  %v2096_v31 = vpop.f32.mrf.mxu3 }
 0xe4c   :  { %v2101_v7 = vadd.f32 %v2082_v23, %v1753_v26  ;;  %v2102_v3 = vadd.f32 %v2096_v31, %v1802_v34 }
 0xe4e   :  { %v3271_v43 = vpop.eup %3270  ;;  %v2104_v16 = vmul.f32 0.5, %v2101_v7  ;;  %v2114_v4 = vmul.f32 0.5, %v2102_v3 }
 0xe4f   :  { %v2107_v39 = vmul.f32 0.5, %v3271_v43  ;;  %v3273_v56 = vpop.eup %3272 }
 0xe50   :  { %3274 = vtanh.f32 %v2104_v16 }
 0xe51   :  { %v2109_v47 = vadd.f32 0.5, %v2107_v39  ;;  %3276 = vtanh.f32 %v2102_v3 }
 0xe52   :  { %3278 = vtanh.f32 %v2113_v62 }
 0xe53   :  { %v2123_v21 = vmul.f32 %v3273_v56, %v2109_v47  ;;  %3280 = vtanh.f32 %v2114_v4  ;;  %v2121_v46 = vmul.f32 %v2109_v47, %v4392_v44 }
 0xe55   :  { %2127 = vrot.lane.b32.xlu0 %v2123_v21, %s3431_s3 }
 0xe56   :  { %v3275_v55 = vpop.eup %3274 }
 0xe57   :  { %v2108_v22 = vmul.f32 0.5, %v3275_v55  ;;  %v3277_v58 = vpop.eup %3276 }
 0xe58   :  { %v3279_v9 = vpop.eup %3278 }
 0xe59   :  { %v2110_v0 = vadd.f32 0.5, %v2108_v22  ;;  %v3281_v36 = vpop.eup %3280 }
 0xe5a   :  { %v2118_v40 = vmul.f32 0.5, %v3281_v36 }
 0xe5b   :  { %v2124_v61 = vmul.f32 %v3277_v58, %v2110_v0  ;;  %v2122_v15 = vmul.f32 %v2110_v0, %v4388_v17 }
 0xe5c   :  { %v2120_v2 = vadd.f32 0.5, %v2118_v40 }
 0xe5d   :  { %2129 = vrot.lane.b32.xlu1 %v2124_v61, %s3431_s3  ;;  %1031 = vrot.lane.b32.xlu0 %v3980_v37, %s3431_s3  ;;  %v2117_v37 = vmul.f32 0.5, %v3279_v9 }
 0xe5f   :  { %v2119_v44 = vadd.f32 0.5, %v2117_v37 }
 0xec7   :  { %v2128_v53 = vpop.permute.xlu0 %2127 }
 0xec8   :  { %v4421_v24 = vadd.f32 %v2128_v53, %v2121_v46 }
 0xeca   :  { %3282 = vtanh.f32 %v4421_v24 }
 0xecf   :  { %v2130_v30 = vpop.permute.xlu1 %2129  ;;  %v1032_v50 = vpop.permute.xlu0 %1031 }
 0xed0   :  { %v4425_v51 = vadd.f32 %v2130_v30, %v2122_v15  ;;  %1036 = vst.msk [vmem:[#allocation3 + $0x1c] sm:$0xf] %vm614_vm3, %v1032_v50  ;;  %v3283_v63 = vpop.eup %3282 }
 0xed1   :  { %v2137_v17 = vmul.f32 %v3283_v63, %v2119_v44 }
 0xed2   :  { %3284 = vtanh.f32 %v4425_v51 }
 0xed7   :  { %v3082_v10 = vld [vmem:[#allocation3 + $0x18] sm:$0xff] }
 0xed8   :  { %v3285_v52 = vpop.eup %3284  ;;  %2954 = vmatmul.msk.bf16.gmra.mxu0 %vm532_vm2, %v3082_v10  ;;  %2962 = vmatmul.msk.bf16.gmra.mxu1 %vm532_vm2, %v3082_v10 }
 0xed9   :  { %v2138_v11 = vmul.f32 %v3285_v52, %v2120_v2 }
 0xedb   :  { %v2143_v41 = vpack.c.bf16 %v2138_v11, %v2137_v17 }
 0xedd   :  { %2145 = vrot.lane.b32.xlu1 %v2143_v41, %s3431_s3 }
 0xee5   :  { %1169 = vrot.lane.b32.xlu1 %v4053_v6, %s3431_s3 }
 0xf4f   :  { %v2146_v54 = vpop.permute.xlu1 %2145 }
 0xf50   :  { %3003 = vmatmul.msk.bf16.vlgmr.msrb.gmra.mxu2 %vm532_vm2, %v2146_v54  ;;  %3004 = vmatmul.msk.bf16.vlgmr.msrb.gmra.mxu3 %vm532_vm2, %v2146_v54 }
 0xf51   :  { %2312 = vmatpush.bf16.msrb.mxu2 %v4273_v12  ;;  %2326 = vmatpush.bf16.msrb.mxu3 %v4275_v13 }
 0xf55   :  { %2313 = vmatpush.bf16.msrb.mxu2 %v4278_v14  ;;  %2327 = vmatpush.bf16.msrb.mxu3 %v4281_v27  ;;  %v1755_v6 = vpop.f32.mrf.mxu0  ;;  %v1804_v20 = vpop.f32.mrf.mxu1 }
 0xf56   :  { %v1756_v23 = vadd.f32 %v1755_v6, %v4331_v59  ;;  %v1805_v34 = vadd.f32 %v1804_v20, %v4338_v25 }
 0xf57   :  { %v1170_v26 = vpop.permute.xlu1 %1169 }
 0xf58   :  { %1175 = vst.msk [vmem:[#allocation3 + $0x20] sm:$0xf] %vm614_vm3, %v1170_v26 }
 0xf59   :  { %2314 = vmatpush.bf16.msrb.mxu2 %v4284_v8  ;;  %2328 = vmatpush.bf16.msrb.mxu3 %v4287_v33 }
 0xf5d   :  { %2315 = vmatpush.bf16.msrb.mxu2 %v4290_v48  ;;  %2329 = vmatpush.bf16.msrb.mxu3 %v4293_v57  ;;  %v1757_v39 = vpop.f32.mrf.mxu0  ;;  %v1806_v56 = vpop.f32.mrf.mxu1 }
 0xf5e   :  { %v1758_v47 = vadd.f32 %v1757_v39, %v4331_v59  ;;  %v1807_v58 = vadd.f32 %v1806_v56, %v4338_v25 }
 0xfd3   :  { %v2159_v7 = vpop.f32.mrf.mxu2  ;;  %v2173_v31 = vpop.f32.mrf.mxu3 }
 0xfd4   :  { %v2178_v43 = vadd.f32 %v2159_v7, %v1756_v23  ;;  %v2179_v3 = vadd.f32 %v2173_v31, %v1805_v34 }
 0xfd6   :  { %v2182_v16 = vmul.f32 0.5, %v2178_v43  ;;  %v2192_v2 = vmul.f32 0.5, %v2179_v3 }
 0xfd8   :  { %3286 = vtanh.f32 %v2182_v16 }
 0xfd9   :  { %3288 = vtanh.f32 %v2179_v3 }
 0xfdb   :  { %v2161_v21 = vpop.f32.mrf.mxu2  ;;  %v2175_v22 = vpop.f32.mrf.mxu3 }
 0xfdc   :  { %v2180_v55 = vadd.f32 %v2161_v21, %v1758_v47  ;;  %v2181_v4 = vadd.f32 %v2175_v22, %v1807_v58 }
 0xfde   :  { %v3287_v0 = vpop.eup %3286  ;;  %v2183_v61 = vmul.f32 0.5, %v2180_v55  ;;  %v2193_v10 = vmul.f32 0.5, %v2181_v4 }
 0xfdf   :  { %v2186_v62 = vmul.f32 0.5, %v3287_v0  ;;  %v3289_v46 = vpop.eup %3288 }
 0xfe0   :  { %3290 = vtanh.f32 %v2183_v61 }
 0xfe1   :  { %v2188_v53 = vadd.f32 0.5, %v2186_v62  ;;  %3292 = vtanh.f32 %v2181_v4 }
 0xfe2   :  { %3294 = vtanh.f32 %v2192_v2 }
 0xfe3   :  { %v2202_v15 = vmul.f32 %v3289_v46, %v2188_v53  ;;  %3296 = vtanh.f32 %v2193_v10  ;;  %v2200_v52 = vmul.f32 %v2188_v53, %v4421_v24 }
 0xfe5   :  { %2206 = vrot.lane.b32.xlu2 %v2202_v15, %s3431_s3 }
 0xfe6   :  { %v3291_v9 = vpop.eup %3290 }
 0xfe7   :  { %v2187_v30 = vmul.f32 0.5, %v3291_v9  ;;  %v3293_v36 = vpop.eup %3292 }
 0xfe8   :  { %v3295_v11 = vpop.eup %3294 }
 0xfe9   :  { %v2189_v50 = vadd.f32 0.5, %v2187_v30  ;;  %v3297_v54 = vpop.eup %3296  ;;  %v2196_v6 = vmul.f32 0.5, %v3295_v11 }
 0xfea   :  { %v2197_v20 = vmul.f32 0.5, %v3297_v54 }
 0xfeb   :  { %v2203_v37 = vmul.f32 %v3293_v36, %v2189_v50  ;;  %v2198_v7 = vadd.f32 0.5, %v2196_v6 }
 0xfec   :  { %v2199_v31 = vadd.f32 0.5, %v2197_v20 }
 0xfed   :  { %1171 = vrot.lane.b32.xlu2 %v4055_v28, %s3431_s3  ;;  %2208 = vrot.lane.b32.xlu0 %v2203_v37, %s3431_s3  ;;  %v2201_v28 = vmul.f32 %v2189_v50, %v4425_v51 }
0x103f   :  { %v2207_v40 = vpop.permute.xlu2 %2206 }
0x1040   :  { %v4457_v17 = vadd.f32 %v2207_v40, %v2200_v52 }
0x1042   :  { %3298 = vtanh.f32 %v4457_v17 }
0x1047   :  { %v1172_v63 = vpop.permute.xlu2 %1171 }
0x1048   :  { %1176 = vst.msk [vmem:[#allocation3 + $0x24] sm:$0xf] %vm614_vm3, %v1172_v63  ;;  %v3299_v23 = vpop.eup %3298 }
0x1049   :  { %v2216_v24 = vmul.f32 %v3299_v23, %v2198_v7 }
0x104f   :  { %v3083_v44 = vld [vmem:[#allocation3 + $0x20] sm:$0xff] }
0x1050   :  { %2955 = vmatmul.msk.bf16.gmra.mxu0 %vm532_vm2, %v3083_v44  ;;  %2963 = vmatmul.msk.bf16.gmra.mxu1 %vm532_vm2, %v3083_v44 }
0x105f   :  { %v2209_v41 = vpop.permute.xlu0 %2208 }
0x1060   :  { %v4461_v26 = vadd.f32 %v2209_v41, %v2201_v28 }
0x1062   :  { %3300 = vtanh.f32 %v4461_v26 }
0x1068   :  { %v3301_v43 = vpop.eup %3300 }
0x1069   :  { %v2217_v34 = vmul.f32 %v3301_v43, %v2199_v31 }
0x106b   :  { %v2222_v16 = vpack.c.bf16 %v2217_v34, %v2216_v24 }
0x106d   :  { %2224 = vrot.lane.b32.xlu0 %v2222_v16, %s3431_s3 }
0x1075   :  { %1309 = vrot.lane.b32.xlu0 %v4128_v49, %s3431_s3 }
0x10cd   :  { %v1760_v49 = vpop.f32.mrf.mxu0  ;;  %v1809_v3 = vpop.f32.mrf.mxu1 }
0x10ce   :  { %v1761_v47 = vadd.f32 %v1760_v49, %v4331_v59  ;;  %v1810_v22 = vadd.f32 %v1809_v3, %v4338_v25 }
0x10d5   :  { %v1762_v58 = vpop.f32.mrf.mxu0  ;;  %v1811_v4 = vpop.f32.mrf.mxu1 }
0x10d6   :  { %v1763_v62 = vadd.f32 %v1762_v58, %v4331_v59  ;;  %v1812_v30 = vadd.f32 %v1811_v4, %v4338_v25 }
0x10df   :  { %v2225_v51 = vpop.permute.xlu0 %2224 }
0x10e0   :  { %3005 = vmatmul.msk.bf16.vlgmr.msra.gmra.mxu2 %vm532_vm2, %v2225_v51  ;;  %3006 = vmatmul.msk.bf16.vlgmr.msra.gmra.mxu3 %vm532_vm2, %v2225_v51 }
0x10e1   :  { %2391 = vmatpush.bf16.msra.mxu2 %v4273_v12  ;;  %2405 = vmatpush.bf16.msra.mxu3 %v4275_v13 }
0x10e5   :  { %2392 = vmatpush.bf16.msra.mxu2 %v4278_v14  ;;  %2406 = vmatpush.bf16.msra.mxu3 %v4281_v27 }
0x10e7   :  { %v1310_v39 = vpop.permute.xlu0 %1309 }
0x10e8   :  { %1315 = vst.msk [vmem:[#allocation3 + $0x28] sm:$0xf] %vm614_vm3, %v1310_v39 }
0x10e9   :  { %2393 = vmatpush.bf16.msra.mxu2 %v4284_v8  ;;  %2407 = vmatpush.bf16.msra.mxu3 %v4287_v33 }
0x10ed   :  { %2394 = vmatpush.bf16.msra.mxu2 %v4290_v48  ;;  %2408 = vmatpush.bf16.msra.mxu3 %v4293_v57 }
0x1163   :  { %v2238_v56 = vpop.f32.mrf.mxu2  ;;  %v2252_v21 = vpop.f32.mrf.mxu3 }
0x1164   :  { %v2257_v55 = vadd.f32 %v2238_v56, %v1761_v47  ;;  %v2258_v61 = vadd.f32 %v2252_v21, %v1810_v22  ;;  %v1559_v22 = vmul.f32 0.5, %v4321_v45 }
0x1166   :  { %v2261_v0 = vmul.f32 0.5, %v2257_v55  ;;  %v2271_v41 = vmul.f32 0.5, %v2258_v61 }
0x1168   :  { %3302 = vtanh.f32 %v2261_v0 }
0x1169   :  { %3304 = vtanh.f32 %v2258_v61 }
0x116b   :  { %v2240_v53 = vpop.f32.mrf.mxu2  ;;  %v2254_v15 = vpop.f32.mrf.mxu3 }
0x116c   :  { %v2259_v46 = vadd.f32 %v2240_v53, %v1763_v62  ;;  %v2260_v37 = vadd.f32 %v2254_v15, %v1812_v30 }
0x116e   :  { %v3303_v9 = vpop.eup %3302  ;;  %v2262_v50 = vmul.f32 0.5, %v2259_v46  ;;  %v2272_v54 = vmul.f32 0.5, %v2260_v37 }
0x116f   :  { %v2265_v36 = vmul.f32 0.5, %v3303_v9  ;;  %v3305_v63 = vpop.eup %3304 }
0x1170   :  { %3306 = vtanh.f32 %v2262_v50 }
0x1171   :  { %v2267_v40 = vadd.f32 0.5, %v2265_v36  ;;  %3308 = vtanh.f32 %v2260_v37 }
0x1172   :  { %3310 = vtanh.f32 %v2271_v41 }
0x1173   :  { %v2281_v44 = vmul.f32 %v3305_v63, %v2267_v40  ;;  %3312 = vtanh.f32 %v2272_v54  ;;  %v2279_v7 = vmul.f32 %v2267_v40, %v4457_v17 }
0x1175   :  { %2285 = vrot.lane.b32.xlu1 %v2281_v44, %s3431_s3 }
0x1176   :  { %v3307_v2 = vpop.eup %3306 }
0x1177   :  { %v2266_v10 = vmul.f32 0.5, %v3307_v2  ;;  %v3309_v28 = vpop.eup %3308 }
0x1178   :  { %v3311_v31 = vpop.eup %3310 }
0x1179   :  { %v2268_v52 = vadd.f32 0.5, %v2266_v10  ;;  %v3313_v24 = vpop.eup %3312 }
0x117a   :  { %v2276_v16 = vmul.f32 0.5, %v3313_v24 }
0x117b   :  { %v2282_v11 = vmul.f32 %v3309_v28, %v2268_v52  ;;  %v2280_v20 = vmul.f32 %v2268_v52, %v4461_v26 }
0x117c   :  { %v2278_v49 = vadd.f32 0.5, %v2276_v16  ;;  %v1560_v16 = vmul.f32 0.5, %v4333_v18  ;;  %v1568_v18 = vmul.f32 %v4345_v38, %v4259_v1 }
0x117d   :  { %2287 = vrot.lane.b32.xlu2 %v2282_v11, %s3431_s3  ;;  %1311 = vrot.lane.b32.xlu1 %v4130_v19, %s3431_s3  ;;  %v2275_v19 = vmul.f32 0.5, %v3311_v31 }
0x117f   :  { %v2277_v39 = vadd.f32 0.5, %v2275_v19 }
0x11d7   :  { %v2288_v6 = vpop.permute.xlu2 %2287 }
0x11d8   :  { %v4487_v23 = vadd.f32 %v2288_v6, %v2280_v20 }
0x11da   :  { %3314 = vtanh.f32 %v4487_v23 }
0x11e0   :  { %v3315_v51 = vpop.eup %3314 }
0x11e1   :  { %v2296_v17 = vmul.f32 %v3315_v51, %v2278_v49 }
0x11e7   :  { %v2286_v43 = vpop.permute.xlu1 %2285 }
0x11e8   :  { %v4491_v34 = vadd.f32 %v2286_v43, %v2279_v7 }
0x11ea   :  { %3316 = vtanh.f32 %v4491_v34 }
0x11eb   :  { %3318 = vtanh.f32 %v1559_v22 }
0x11ef   :  { %v1312_v3 = vpop.permute.xlu1 %1311 }
0x11f0   :  { %v3317_v26 = vpop.eup %3316  ;;  %1316 = vst.msk [vmem:[#allocation3 + $0x2c] sm:$0xf] %vm614_vm3, %v1312_v3 }
0x11f1   :  { %v2295_v47 = vmul.f32 %v3317_v26, %v2277_v39 }
0x11f3   :  { %v2301_v56 = vpack.c.bf16 %v2296_v17, %v2295_v47 }
0x11f5   :  { %2303 = vrot.lane.b32.xlu2 %v2301_v56, %s3431_s3 }
0x11f7   :  { %v3084_v21 = vld [vmem:[#allocation3 + $0x28] sm:$0xff] }
0x11f8   :  { %2956 = vmatmul.msk.bf16.gmra.mxu0 %vm532_vm2, %v3084_v21  ;;  %2964 = vmatmul.msk.bf16.gmra.mxu1 %vm532_vm2, %v3084_v21 }
0x11fd   :  { %1449 = vrot.lane.b32.xlu2 %v4263_v60, %s3431_s3  ;;  %v1567_v60 = vmul.f32 %v4335_v32, %v4241_v35 }
0x1205   :  { %1573 = vrot.lane.b32.xlu2 %v4341_v42, %s3431_s3 }
0x124f   :  { %v2304_v55 = vpop.permute.xlu2 %2303 }
0x1250   :  { %3007 = vmatmul.msk.bf16.vlgmr.msrb.gmra.mxu2 %vm532_vm2, %v2304_v55  ;;  %3008 = vmatmul.msk.bf16.vlgmr.msrb.gmra.mxu3 %vm532_vm2, %v2304_v55 }
0x1251   :  { %2470 = vmatpush.bf16.msrb.mxu2 %v4273_v12  ;;  %2484 = vmatpush.bf16.msrb.mxu3 %v4275_v13  ;;  %v3319_v13 = vpop.eup %3318 }
0x1255   :  { %2471 = vmatpush.bf16.msrb.mxu2 %v4278_v14  ;;  %2485 = vmatpush.bf16.msrb.mxu3 %v4281_v27  ;;  %v1563_v27 = vmul.f32 0.5, %v3319_v13 }
0x1257   :  { %v1450_v0 = vpop.permute.xlu2 %1449  ;;  %v1565_v45 = vadd.f32 0.5, %v1563_v27 }
0x1258   :  { %1455 = vst.msk [vmem:[#allocation3 + $0x30] sm:$0xf] %vm614_vm3, %v1450_v0 }
0x1259   :  { %2472 = vmatpush.bf16.msrb.mxu2 %v4284_v8  ;;  %2486 = vmatpush.bf16.msrb.mxu3 %v4287_v33 }
0x125d   :  { %2473 = vmatpush.bf16.msrb.mxu2 %v4290_v48  ;;  %2487 = vmatpush.bf16.msrb.mxu3 %v4293_v57 }
0x125f   :  { %v1574_v12 = vpop.permute.xlu2 %1573 }
0x1260   :  { %v1579_v14 = vadd.f32 %v1574_v12, %v1567_v60 }
0x1262   :  { %3320 = vtanh.f32 %v1579_v14 }
0x1268   :  { %v3321_v42 = vpop.eup %3320 }
0x1269   :  { %v1583_v58 = vmul.f32 %v3321_v42, %v1565_v45 }
0x126b   :  { %v1585_v20 = vpack.c.bf16 %v1583_v58, %v1583_v58 }
0x1275   :  { %v1765_v61 = vpop.f32.mrf.mxu0  ;;  %v1814_v8 = vpop.f32.mrf.mxu1 }
0x1276   :  { %v1766_v33 = vadd.f32 %v1765_v61, %v4331_v59  ;;  %v1815_v57 = vadd.f32 %v1814_v8, %v4338_v25 }
0x127d   :  { %v1767_v46 = vpop.f32.mrf.mxu0  ;;  %v1816_v15 = vpop.f32.mrf.mxu1 }
0x127e   :  { %v1768_v32 = vadd.f32 %v1767_v46, %v4331_v59  ;;  %v1817_v37 = vadd.f32 %v1816_v15, %v4338_v25 }
0x12d3   :  { %v2317_v62 = vpop.f32.mrf.mxu2  ;;  %v2331_v4 = vpop.f32.mrf.mxu3 }
0x12d4   :  { %v2336_v48 = vadd.f32 %v2317_v62, %v1766_v33  ;;  %v2337_v35 = vadd.f32 %v2331_v4, %v1815_v57 }
0x12d6   :  { %v2340_v53 = vmul.f32 0.5, %v2336_v48  ;;  %v2350_v7 = vmul.f32 0.5, %v2337_v35 }
0x12d8   :  { %3322 = vtanh.f32 %v2340_v53 }
0x12d9   :  { %3324 = vtanh.f32 %v2337_v35 }
0x12db   :  { %v2319_v9 = vpop.f32.mrf.mxu2  ;;  %v2333_v50 = vpop.f32.mrf.mxu3 }
0x12dc   :  { %v2338_v30 = vadd.f32 %v2319_v9, %v1768_v32  ;;  %v2339_v44 = vadd.f32 %v2333_v50, %v1817_v37 }
0x12de   :  { %v3323_v36 = vpop.eup %3322  ;;  %v2341_v40 = vmul.f32 0.5, %v2338_v30  ;;  %v2351_v31 = vmul.f32 0.5, %v2339_v44 }
0x12df   :  { %v2344_v63 = vmul.f32 0.5, %v3323_v36  ;;  %v3325_v10 = vpop.eup %3324 }
0x12e0   :  { %3326 = vtanh.f32 %v2341_v40 }
0x12e1   :  { %v2346_v2 = vadd.f32 0.5, %v2344_v63  ;;  %3328 = vtanh.f32 %v2339_v44 }
0x12e2   :  { %3330 = vtanh.f32 %v2350_v7 }
0x12e3   :  { %v2360_v52 = vmul.f32 %v3325_v10, %v2346_v2  ;;  %3332 = vtanh.f32 %v2351_v31  ;;  %v2358_v24 = vmul.f32 %v2346_v2, %v4491_v34 }
0x12e5   :  { %2364 = vrot.lane.b32.xlu0 %v2360_v52, %s3431_s3 }
0x12e6   :  { %v3327_v28 = vpop.eup %3326 }
0x12e7   :  { %v2345_v11 = vmul.f32 0.5, %v3327_v28  ;;  %v3329_v54 = vpop.eup %3328 }
0x12e8   :  { %v3331_v51 = vpop.eup %3330 }
0x12e9   :  { %v2347_v41 = vadd.f32 0.5, %v2345_v11  ;;  %v2354_v34 = vmul.f32 0.5, %v3331_v51 }
0x12eb   :  { %v2361_v6 = vmul.f32 %v3329_v54, %v2347_v41  ;;  %v2356_v17 = vadd.f32 0.5, %v2354_v34 }
0x12ed   :  { %1451 = vrot.lane.b32.xlu0 %v4265_v5, %s3431_s3  ;;  %2366 = vrot.lane.b32.xlu1 %v2361_v6, %s3431_s3  ;;  %v2359_v5 = vmul.f32 %v2347_v41, %v4487_v23 }
0x12f5   :  { %1575 = vrot.lane.b32.xlu0 %v4349_v29, %s3431_s3  ;;  %v3333_v29 = vpop.eup %3332 }
0x12f6   :  { %v2355_v26 = vmul.f32 0.5, %v3333_v29 }
0x12f8   :  { %v2357_v56 = vadd.f32 0.5, %v2355_v26 }
0x12fd   :  { %1589 = vrot.lane.b32.xlu0 %v1585_v20, %s3431_s3 }
0x1357   :  { %v2365_v43 = vpop.permute.xlu0 %2364 }
0x1358   :  { %v4528_v19 = vadd.f32 %v2365_v43, %v2358_v24 }
0x135a   :  { %3334 = vtanh.f32 %v4528_v19 }
0x135b   :  { %3336 = vtanh.f32 %v1560_v16 }
0x135f   :  { %v1452_v39 = vpop.permute.xlu0 %1451  ;;  %v2367_v49 = vpop.permute.xlu1 %2366 }
0x1360   :  { %1456 = vst.msk [vmem:[#allocation3 + $0x34] sm:$0xf] %vm614_vm3, %v1452_v39  ;;  %v4534_v3 = vadd.f32 %v2367_v49, %v2359_v5  ;;  %v3335_v47 = vpop.eup %3334 }
0x1361   :  { %v3337_v23 = vpop.eup %3336  ;;  %v2374_v60 = vmul.f32 %v3335_v47, %v2356_v17 }
0x1362   :  { %3338 = vtanh.f32 %v4534_v3  ;;  %v1564_v13 = vmul.f32 0.5, %v3337_v23 }
0x1364   :  { %v1566_v27 = vadd.f32 0.5, %v1564_v13 }
0x1367   :  { %v1576_v21 = vpop.permute.xlu0 %1575  ;;  %v3085_v55 = vld [vmem:[#allocation3 + $0x30] sm:$0xff] }
0x1368   :  { %v3339_v22 = vpop.eup %3338  ;;  %v1580_v0 = vadd.f32 %v1576_v21, %v1568_v18  ;;  %2957 = vmatmul.msk.bf16.gmra.mxu0 %vm532_vm2, %v3085_v55  ;;  %2965 = vmatmul.msk.bf16.gmra.mxu1 %vm532_vm2, %v3085_v55 }
0x1369   :  { %v2375_v12 = vmul.f32 %v3339_v22, %v2357_v56 }
0x136a   :  { %3340 = vtanh.f32 %v1580_v0 }
0x136b   :  { %v2380_v14 = vpack.c.bf16 %v2375_v12, %v2374_v60 }
0x136d   :  { %2382 = vrot.lane.b32.xlu1 %v2380_v14, %s3431_s3 }
0x136f   :  { %v1590_v1 = vpop.permute.xlu0 %1589 }
0x1370   :  { %v3341_v38 = vpop.eup %3340  ;;  %1595 = vst.msk [vmem:[#allocation3 + $0x38] sm:$0xf] %vm614_vm3, %v1590_v1 }
0x1371   :  { %v1584_v45 = vmul.f32 %v3341_v38, %v1566_v27 }
0x1373   :  { %v1586_v6 = vpack.c.bf16 %v1584_v45, %v1584_v45 }
0x13df   :  { %v2383_v42 = vpop.permute.xlu1 %2382 }
0x13e0   :  { %3009 = vmatmul.msk.bf16.vlgmr.msra.gmra.mxu2 %vm532_vm2, %v2383_v42  ;;  %3010 = vmatmul.msk.bf16.vlgmr.msra.gmra.mxu3 %vm532_vm2, %v2383_v42 }
0x13e5   :  { %v1770_v58 = vpop.f32.mrf.mxu0  ;;  %v1819_v61 = vpop.f32.mrf.mxu1 }
0x13e6   :  { %v1771_v8 = vadd.f32 %v1770_v58, %v4331_v59  ;;  %v1820_v48 = vadd.f32 %v1819_v61, %v4338_v25 }
0x13ed   :  { %v1772_v53 = vpop.f32.mrf.mxu0  ;;  %v1821_v32 = vpop.f32.mrf.mxu1 }
0x13ee   :  { %v1773_v35 = vadd.f32 %v1772_v53, %v4331_v59  ;;  %v1822_v36 = vadd.f32 %v1821_v32, %v4338_v25 }
0x1463   :  { %v2396_v33 = vpop.f32.mrf.mxu2  ;;  %v2410_v62 = vpop.f32.mrf.mxu3 }
0x1464   :  { %v2415_v4 = vadd.f32 %v2396_v33, %v1771_v8  ;;  %v2416_v46 = vadd.f32 %v2410_v62, %v1820_v48 }
0x1466   :  { %v2419_v57 = vmul.f32 0.5, %v2415_v4  ;;  %v2429_v20 = vmul.f32 0.5, %v2416_v46 }
0x1468   :  { %3342 = vtanh.f32 %v2419_v57 }
0x1469   :  { %3344 = vtanh.f32 %v2416_v46 }
0x146b   :  { %v2398_v15 = vpop.f32.mrf.mxu2  ;;  %v2412_v30 = vpop.f32.mrf.mxu3 }
0x146c   :  { %v2417_v9 = vadd.f32 %v2398_v15, %v1773_v35  ;;  %v2418_v63 = vadd.f32 %v2412_v30, %v1822_v36  ;;  %v2541_v36 = vld [vmem:[#allocation6 + $0x38] sm:$0xff] }
0x146d   :  { %2564 = vmatpush.msrb.mxu0 %v2541_v36  ;;  %3103 = vmatpush.msrb.mxu1 %v2541_v36 }
0x146e   :  { %v3343_v50 = vpop.eup %3342  ;;  %v2420_v37 = vmul.f32 0.5, %v2417_v9  ;;  %v2430_v7 = vmul.f32 0.5, %v2418_v63 }
0x146f   :  { %v2423_v40 = vmul.f32 0.5, %v3343_v50  ;;  %v3345_v2 = vpop.eup %3344 }
0x1470   :  { %3346 = vtanh.f32 %v2420_v37  ;;  %v2539_v37 = vld [vmem:[#allocation6 + $0x28] sm:$0xff] }
0x1471   :  { %v2425_v44 = vadd.f32 0.5, %v2423_v40  ;;  %3348 = vtanh.f32 %v2418_v63  ;;  %v2538_v40 = vld [vmem:[#allocation6 + $0x20] sm:$0xff] }
0x1472   :  { %3350 = vtanh.f32 %v2429_v20 }
0x1473   :  { %v2439_v10 = vmul.f32 %v3345_v2, %v2425_v44  ;;  %3352 = vtanh.f32 %v2430_v7  ;;  %v2437_v16 = vmul.f32 %v2425_v44, %v4528_v19  ;;  %v2537_v44 = vld [vmem:[#allocation6 + $0x18] sm:$0xff]  ;;  %v2536_v2 = vld [vmem:[#allocation6 + $0x10] sm:$0xff] }
0x1475   :  { %2443 = vrot.lane.b32.xlu1 %v2439_v10, %s3431_s3  ;;  %v2535_v10 = vld [vmem:[#allocation6 + $0x8] sm:$0xff] }
0x1476   :  { %v3347_v52 = vpop.eup %3346 }
0x1477   :  { %v2424_v28 = vmul.f32 0.5, %v3347_v52  ;;  %v3349_v41 = vpop.eup %3348 }
0x1478   :  { %v3351_v5 = vpop.eup %3350 }
0x1479   :  { %v2426_v11 = vadd.f32 0.5, %v2424_v28  ;;  %v3353_v39 = vpop.eup %3352  ;;  %v2433_v29 = vmul.f32 0.5, %v3351_v5  ;;  %v2534_v28 = vld [vmem:[#allocation6] sm:$0xff] }
0x147a   :  { %v2434_v34 = vmul.f32 0.5, %v3353_v39 }
0x147b   :  { %v2440_v54 = vmul.f32 %v3349_v41, %v2426_v11  ;;  %v2438_v43 = vmul.f32 %v2426_v11, %v4534_v3  ;;  %v2435_v47 = vadd.f32 0.5, %v2433_v29 }
0x147c   :  { %v2436_v18 = vadd.f32 0.5, %v2434_v34 }
0x147d   :  { %2445 = vrot.lane.b32.xlu2 %v2440_v54, %s3431_s3  ;;  %1591 = vrot.lane.b32.xlu1 %v1586_v6, %s3431_s3 }
0x14d7   :  { %v2446_v31 = vpop.permute.xlu2 %2445 }
0x14d8   :  { %v4553_v24 = vadd.f32 %v2446_v31, %v2438_v43 }
0x14da   :  { %3354 = vtanh.f32 %v4553_v24 }
0x14e0   :  { %v3355_v26 = vpop.eup %3354 }
0x14e1   :  { %v2454_v19 = vmul.f32 %v3355_v26, %v2436_v18 }
0x14e7   :  { %v2444_v51 = vpop.permute.xlu1 %2443 }
0x14e8   :  { %v4557_v49 = vadd.f32 %v2444_v51, %v2437_v16 }
0x14ea   :  { %3356 = vtanh.f32 %v4557_v49 }
0x14ef   :  { %v1592_v23 = vpop.permute.xlu1 %1591 }
0x14f0   :  { %v3357_v3 = vpop.eup %3356  ;;  %1596 = vst.msk [vmem:[#allocation3 + $0x3c] sm:$0xf] %vm614_vm3, %v1592_v23 }
0x14f1   :  { %v2453_v17 = vmul.f32 %v3357_v3, %v2435_v47 }
0x14f3   :  { %v2459_v56 = vpack.c.bf16 %v2454_v19, %v2453_v17 }
0x14f5   :  { %2461 = vrot.lane.b32.xlu2 %v2459_v56, %s3431_s3 }
0x14f7   :  { %v3086_v21 = vld [vmem:[#allocation3 + $0x38] sm:$0xff] }
0x14f8   :  { %2958 = vmatmul.msk.bf16.gmra.mxu0 %vm532_vm2, %v3086_v21  ;;  %2966 = vmatmul.msk.bf16.gmra.mxu1 %vm532_vm2, %v3086_v21 }
0x154f   :  { %v2462_v55 = vpop.permute.xlu2 %2461 }
0x1550   :  { %3011 = vmatmul.msk.bf16.vlgmr.msrb.gmra.mxu2 %vm532_vm2, %v2462_v55  ;;  %3012 = vmatmul.msk.bf16.vlgmr.msrb.gmra.mxu3 %vm532_vm2, %v2462_v55 }
0x1575   :  { %v1775_v22 = vpop.f32.mrf.mxu0  ;;  %v1824_v0 = vpop.f32.mrf.mxu1 }
0x1576   :  { %v1776_v60 = vadd.f32 %v1775_v22, %v4331_v59  ;;  %v1825_v27 = vadd.f32 %v1824_v0, %v4338_v25 }
0x157d   :  { %v1777_v38 = vpop.f32.mrf.mxu0  ;;  %v1826_v58 = vpop.f32.mrf.mxu1 }
0x157e   :  { %v1778_v42 = vadd.f32 %v1777_v38, %v4331_v59  ;;  %v1827_v4 = vadd.f32 %v1826_v58, %v4338_v25  ;;  %v2540_v25 = vld [vmem:[#allocation6 + $0x30] sm:$0xff] }
0x157f   :  { %2565 = vmatpush.msrb.mxu0 %v2540_v25  ;;  %3104 = vmatpush.msrb.mxu1 %v2540_v25 }
0x1581   :  { %2566 = vmatpush.msrb.mxu0 %v2539_v37  ;;  %3105 = vmatpush.msrb.mxu1 %v2539_v37 }
0x1583   :  { %2567 = vmatpush.msrb.mxu0 %v2538_v40  ;;  %3106 = vmatpush.msrb.mxu1 %v2538_v40 }
0x1585   :  { %2568 = vmatpush.msrb.mxu0 %v2537_v44  ;;  %3107 = vmatpush.msrb.mxu1 %v2537_v44 }
0x1587   :  { %2569 = vmatpush.msrb.mxu0 %v2536_v2  ;;  %3108 = vmatpush.msrb.mxu1 %v2536_v2 }
0x1589   :  { %2570 = vmatpush.msrb.mxu0 %v2535_v10  ;;  %3109 = vmatpush.msrb.mxu1 %v2535_v10 }
0x158b   :  { %2571 = vmatpush.msrb.mxu0 %v2534_v28  ;;  %3110 = vmatpush.msrb.mxu1 %v2534_v28 }
0x15d3   :  { %v2475_v12 = vpop.f32.mrf.mxu2  ;;  %v2489_v13 = vpop.f32.mrf.mxu3 }
0x15d4   :  { %v2494_v14 = vadd.f32 %v2475_v12, %v1776_v60  ;;  %v2495_v45 = vadd.f32 %v2489_v13, %v1825_v27 }
0x15d6   :  { %v2498_v1 = vmul.f32 0.5, %v2494_v14  ;;  %v2508_v63 = vmul.f32 0.5, %v2495_v45 }
0x15d8   :  { %3358 = vtanh.f32 %v2498_v1 }
0x15d9   :  { %3360 = vtanh.f32 %v2495_v45 }
0x15db   :  { %v2477_v61 = vpop.f32.mrf.mxu2  ;;  %v2491_v33 = vpop.f32.mrf.mxu3 }
0x15dc   :  { %v2496_v8 = vadd.f32 %v2477_v61, %v1778_v42  ;;  %v2497_v53 = vadd.f32 %v2491_v33, %v1827_v4 }
0x15de   :  { %v3359_v62 = vpop.eup %3358  ;;  %v2499_v48 = vmul.f32 0.5, %v2496_v8  ;;  %v2509_v52 = vmul.f32 0.5, %v2497_v53 }
0x15df   :  { %v2502_v57 = vmul.f32 0.5, %v3359_v62  ;;  %v3361_v35 = vpop.eup %3360 }
0x15e0   :  { %3362 = vtanh.f32 %v2499_v48 }
0x15e1   :  { %v2504_v46 = vadd.f32 0.5, %v2502_v57  ;;  %3364 = vtanh.f32 %v2497_v53 }
0x15e2   :  { %3366 = vtanh.f32 %v2508_v63 }
0x15e3   :  { %v2518_v32 = vmul.f32 %v3361_v35, %v2504_v46  ;;  %v2516_v11 = vmul.f32 %v2504_v46, %v4557_v49  ;;  %3368 = vtanh.f32 %v2509_v52 }
0x15e5   :  { %2522 = vrot.lane.b32.xlu0 %v2518_v32, %s3431_s3 }
0x15e6   :  { %v3363_v15 = vpop.eup %3362 }
0x15e7   :  { %v2503_v59 = vmul.f32 0.5, %v3363_v15  ;;  %v3365_v30 = vpop.eup %3364 }
0x15e8   :  { %v3367_v54 = vpop.eup %3366 }
0x15e9   :  { %v2505_v9 = vadd.f32 0.5, %v2503_v59  ;;  %v2512_v20 = vmul.f32 0.5, %v3367_v54  ;;  %v3369_v31 = vpop.eup %3368 }
0x15ea   :  { %v2513_v49 = vmul.f32 0.5, %v3369_v31 }
0x15eb   :  { %v2519_v50 = vmul.f32 %v3365_v30, %v2505_v9  ;;  %v2517_v7 = vmul.f32 %v2505_v9, %v4553_v24  ;;  %v2514_v43 = vadd.f32 0.5, %v2512_v20  ;;  %v3117_v24 = vld [vmem:[%s4595_s8] ss:$0 sm:$0xff] }
0x15ec   :  { %v2515_v29 = vadd.f32 0.5, %v2513_v49 }
0x15ed   :  { %2524 = vrot.lane.b32.xlu1 %v2519_v50, %s3431_s3 }
0x1657   :  { %v2523_v41 = vpop.permute.xlu0 %2522 }
0x1658   :  { %v2528_v6 = vadd.f32 %v2523_v41, %v2516_v11 }
0x165a   :  { %3370 = vtanh.f32 %v2528_v6 }
0x165f   :  { %v2525_v16 = vpop.permute.xlu1 %2524 }
0x1660   :  { %v3371_v5 = vpop.eup %3370  ;;  %v2529_v51 = vadd.f32 %v2525_v16, %v2517_v7 }
0x1661   :  { %v2532_v39 = vmul.f32 %v3371_v5, %v2514_v43 }
0x1662   :  { %3372 = vtanh.f32 %v2529_v51 }
0x1663   :  { %2548 = vrot.lane.b32.xlu2 %v2532_v39, %s3431_s3 }
0x1668   :  { %v3373_v34 = vpop.eup %3372 }
0x1669   :  { %v2533_v26 = vmul.f32 %v3373_v34, %v2515_v29 }
0x166b   :  { %2550 = vrot.lane.b32.xlu0 %v2533_v26, %s3431_s3 }
0x16bd   :  { %v2549_v47 = vpop.permute.xlu2 %2548 }
0x16be   :  { %3013 = vmatmul.msk.f32.vlgmr.msrb.gmra.mxu0 %vm532_vm2, %v2549_v47 }
0x16dd   :  { %v2551_v18 = vpop.permute.xlu0 %2550 }
0x16de   :  { %3014 = vmatmul.msk.f32.vlgmr.msrb.gmra.mxu1 %vm532_vm2, %v2551_v18 }
0x173b   :  { %v2573_v23 = vpop.f32.mrf.mxu0 }
0x173c   :  { %v2574_v3 = vadd.f32 %v3117_v24, %v2573_v23 }
0x173e   :  { %2579 = vst [vmem:[%s4596_s9] sm:$0xff] %v2574_v3 }
0x175b   :  { %v2576_v17 = vpop.f32.mrf.mxu1 }
0x175c   :  { %v2577_v19 = vadd.f32 %v3117_v24, %v2576_v17 }
0x175e   :  { %2580 = vst [vmem:[%s4596_s9 + $0x8] sm:$0xff] %v2577_v19 }
0x175f   :  { %2585 = vsyncpa [#allocation5], 1 }
0x1760   :  { %2586 = vsyncpa [#allocation7], 1 }

</bundles_post_ra>
